<compile_context>
chip_gen: v5e
topology: v5e:2x2
jax: 0.10.0
libtpu: 0.0.40
codegen_flags: <defaults>
</compile_context>

<pallas_src>
import functools

import jax
import jax.numpy as jnp
from jax import lax
from jax.experimental import pallas as pl
from jax.experimental.pallas import tpu as pltpu


# ----------------------------------------------------------------------------
# In-kernel helpers
# ----------------------------------------------------------------------------
def _group_index(idx, size):
    """floor(idx / size) for non-negative int32 vectors without integer div.

    Uses an f32 reciprocal multiply + truncation; the 1e-4 nudge absorbs f32
    rounding for any realistic group count here (idx/size <= a few hundred).
    """
    if size == 1:
        return idx
    return (idx.astype(jnp.float32) * (1.0 / size) + 1e-4).astype(jnp.int32)


def _make_wmask(mlane, R, C, n, l, cdt):
    """(R, C) attention mask = block-diag(instance groups) * key mask, in cdt."""
    ri = lax.broadcasted_iota(jnp.int32, (R, C), 0)
    ci = lax.broadcasted_iota(jnp.int32, (R, C), 1)
    bd = _group_index(ri, n) == _group_index(ci, l)
    return jnp.where(bd, mlane, 0.0).astype(cdt)


def _gated_layer(h, cc_cdt, wmask, wq, bq, wk, wr, wv, bv, gam, bet, *,
                 cdt, eps, self_attn):
    """One gated_attention layer on a (R, D) query block / (C, D) key block."""
    hc = h.astype(cdt)
    cc = hc if self_attn else cc_cdt

    # projections as single large matmuls, f32 accumulation
    q = jnp.tanh(jnp.dot(hc, wq, preferred_element_type=jnp.float32) + bq)   # (R, D) f32
    k = jnp.tanh(jnp.dot(cc, wk, preferred_element_type=jnp.float32))        # (C, D) f32

    # weight_reduce(q_i + k_j) == (q.wr)_i + (k.wr)_j  (no bias)
    qr = lax.dot_general(q, wr, (((1,), (1,)), ((), ())),
                         preferred_element_type=jnp.float32)                 # (R, 1)
    kr = lax.dot_general(wr, k, (((1,), (1,)), ((), ())),
                         preferred_element_type=jnp.float32)                 # (1, C)

    s = (qr + kr).astype(cdt)                                                # (R, C)
    w = jnp.maximum(jnp.tanh(s), 0.0) * wmask                                # (R, C) cdt
    v = (jnp.dot(cc, wv, preferred_element_type=jnp.float32) + bv).astype(cdt)   # (C, D)
    add = jnp.dot(w, v, preferred_element_type=jnp.float32)                  # (R, D) f32

    # LayerNorm(x + add), PyTorch defaults (biased var, eps=1e-5), f32
    y = h + add
    mu = jnp.mean(y, axis=-1, keepdims=True)
    var = jnp.mean((y - mu) ** 2, axis=-1, keepdims=True)
    return (y - mu) * lax.rsqrt(var + eps) * gam + bet


def _run_layers(h0, cc_f32, mlane, wrefs, *, n, l, layers, eps, cdt, self_attn):
    wq_ref, bq_ref, wk_ref, wr_ref, wv_ref, bv_ref, g_ref, b_ref = wrefs
    R = h0.shape[0]
    C = R if self_attn else cc_f32.shape[0]
    wmask = _make_wmask(mlane, R, C, n, l, cdt)          # hoisted, layer-invariant
    cc_cdt = None if self_attn else cc_f32.astype(cdt)   # cast fixed keys once

    def one_layer(layer, h):
        return _gated_layer(h, cc_cdt, wmask,
                            wq_ref[layer], bq_ref[layer], wk_ref[layer],
                            wr_ref[layer], wv_ref[layer], bv_ref[layer],
                            g_ref[layer], b_ref[layer],
                            cdt=cdt, eps=eps, self_attn=self_attn)

    if layers <= 4:                       # small stacks: static unroll
        h = h0
        for layer in range(layers):
            h = one_layer(layer, h)
        return h
    # deep stacks: bound live ranges / vreg pressure with a real loop
    return lax.fori_loop(0, layers, one_layer, h0)


# ----------------------------------------------------------------------------
# Kernels
# ----------------------------------------------------------------------------
def _med_selfattn_maxpool_kernel(x_ref, mlane_ref, mrow_ref,
                                 wq_ref, bq_ref, wk_ref, wr_ref, wv_ref,
                                 bv_ref, g_ref, b_ref, o_ref,
                                 *, n, layers, eps, cdt):
    h = _run_layers(x_ref[...], None, mlane_ref[0],
                    (wq_ref, bq_ref, wk_ref, wr_ref, wv_ref, bv_ref,
                     g_ref, b_ref),
                    n=n, l=n, layers=layers, eps=eps, cdt=cdt, self_attn=True)
    # fused masked max-pool over the n meds of each instance + presence gate
    R, D = h.shape
    tb = R // n
    m3 = mrow_ref[...].reshape(tb, n, 1)                          # med mask
    pooled = jnp.max(h.reshape(tb, n, D) + (m3 - 1.0) * 1e9, axis=1)   # (tb, D)
    mvis = jnp.max(m3, axis=1)                                    # (tb, 1)
    o_ref[...] = pooled * mvis


def _visit_crossattn_kernel(x_ref, c_ref, mlane_ref,
                            wq_ref, bq_ref, wk_ref, wr_ref, wv_ref,
                            bv_ref, g_ref, b_ref, o_ref,
                            *, n, l, layers, eps, cdt):
    o_ref[...] = _run_layers(x_ref[...], c_ref[...], mlane_ref[0],
                             (wq_ref, bq_ref, wk_ref, wr_ref, wv_ref, bv_ref,
                              g_ref, b_ref),
                             n=n, l=l, layers=layers, eps=eps, cdt=cdt,
                             self_attn=False)


# ----------------------------------------------------------------------------
# Wrapper: batches TB instances per grid step, fuses all layers (+ pool)
# ----------------------------------------------------------------------------
def gated_attention_stack(x2, c2, mask2, sp, *, n, dim, layers, self_attn,
                          tb_target=16, use_bf16=True):
    """Fused multi-layer gated attention.

    self_attn=True : queries==keys==x2, grouped n rows per instance; the
                     masked max-pool over those n rows and the presence gate
                     are fused into the kernel epilogue -> returns (P, D).
    self_attn=False: fixed keys/values c2 (l rows per instance), n queries
                     per instance -> returns (P*n, D).
    """
    P, l = mask2.shape
    D = dim
    assert x2.shape == (P * n, D)
    if self_attn:
        assert c2 is None and l == n
    else:
        assert c2 is not None and c2.shape == (P * l, D)

    # TB instances per grid step; tb_target=16 keeps Cb=TB*l at 128 for l=8
    # (full-width MXU pass, esp. v5e).  Sweep {8,16,32} per generation.
    if P <= tb_target:
        TB, NB = P, 1
    else:
        TB, NB = tb_target, pl.cdiv(P, tb_target)
    P_pad = NB * TB
    pad = P_pad - P

    xq, ck, mk = x2, c2, mask2.astype(jnp.float32)
    if pad:                               # zero padding is numerically inert
        xq = jnp.pad(xq, ((0, pad * n), (0, 0)))
        if not self_attn:
            ck = jnp.pad(ck, ((0, pad * l), (0, 0)))
        mk = jnp.pad(mk, ((0, pad), (0, 0)))

    Rb, Cb = TB * n, TB * l
    mask_lane = mk.reshape(NB, 1, Cb)     # key mask, lane orientation

    cdt = jnp.bfloat16 if use_bf16 else jnp.float32

    def _as(a):                           # matmul weights arrive pre-cast
        return a if a.dtype == cdt else a.astype(cdt)

    weight_args = (_as(sp["wq_t"]), sp["bq"], _as(sp["wk_t"]), sp["wr"],
                   _as(sp["wv_t"]), sp["bv"], sp["gamma"], sp["beta"])

    x_spec = pl.BlockSpec((Rb, D), lambda i: (i, 0))
    c_spec = pl.BlockSpec((Cb, D), lambda i: (i, 0))
    mlane_spec = pl.BlockSpec((1, 1, Cb), lambda i: (i, 0, 0))
    mrow_spec = pl.BlockSpec((Rb, 1), lambda i: (i, 0))
    wdd = pl.BlockSpec((layers, D, D), lambda i: (0, 0, 0))   # VMEM resident
    w1d = pl.BlockSpec((layers, 1, D), lambda i: (0, 0, 0))
    weight_specs = [wdd, w1d, wdd, w1d, wdd, w1d, w1d, w1d]

    out_rows_blk = TB if self_attn else Rb
    out_rows = NB * out_rows_blk

    # advisory cost estimate
    flops = int(layers * NB * 2 * (Rb * D * D + 2 * Cb * D * D + Rb * Cb * D
                                   + Rb * D + Cb * D))
    trans = int(layers * NB * (Rb * D + Cb * D + Rb * Cb))
    wbytes = 2 if use_bf16 else 4
    weight_bytes = layers * (3 * D * D * wbytes + 5 * D * 4)
    bytes_accessed = int(4 * (xq.size + mask_lane.size + out_rows * D)
                         + (0 if self_attn else 4 * ck.size)
                         + (4 * P_pad * n if self_attn else 0)
                         + weight_bytes)

    # explicit VMEM budget (double-buffered blocks + resident weights + temps)
    vmem_est = (2 * 4 * (Rb * D + (0 if self_attn else Cb * D) + Cb + Rb
                         + out_rows_blk * D)
                + 2 * weight_bytes
                + 3 * Rb * Cb * 4
                + 10 * max(Rb, Cb) * D * 4)
    vmem_limit = int(min(max(2 * vmem_est, 32 << 20), 64 << 20))

    common = dict(
        compiler_params=pltpu.CompilerParams(
            dimension_semantics=("parallel",),
            vmem_limit_bytes=vmem_limit),
        cost_estimate=pl.CostEstimate(flops=flops, transcendentals=trans,
                                      bytes_accessed=bytes_accessed),
    )

    if self_attn:
        mask_row = mk.reshape(P_pad * n, 1)       # med mask, sublane orientation
        kernel = functools.partial(_med_selfattn_maxpool_kernel,
                                   n=n, layers=layers, eps=1e-5, cdt=cdt)
        out = pl.pallas_call(
            kernel,
            out_shape=jax.ShapeDtypeStruct((P_pad, D), jnp.float32),
            grid_spec=pl.GridSpec(
                grid=(NB,),
                in_specs=[x_spec, mlane_spec, mrow_spec] + weight_specs,
                out_specs=pl.BlockSpec((TB, D), lambda i: (i, 0)),
            ),
            **common,
        )(xq, mask_lane, mask_row, *weight_args)
        return out[:P] if pad else out

    kernel = functools.partial(_visit_crossattn_kernel,
                               n=n, l=l, layers=layers, eps=1e-5, cdt=cdt)
    out = pl.pallas_call(
        kernel,
        out_shape=jax.ShapeDtypeStruct((P_pad * n, D), jnp.float32),
        grid_spec=pl.GridSpec(
            grid=(NB,),
            in_specs=[x_spec, c_spec, mlane_spec] + weight_specs,
            out_specs=pl.BlockSpec((Rb, D), lambda i: (i, 0)),
        ),
        **common,
    )(xq, ck, mask_lane, *weight_args)
    return out[:P * n] if pad else out


# ----------------------------------------------------------------------------
# Pure-JAX reference of gated_attention (correctness check only)
# ----------------------------------------------------------------------------
def gated_attention_ref(x, c, mask, p, dim):
    q = jnp.tanh(x @ p["wq_t"] + p["bq"][0])[..., :, None, :]
    k = jnp.tanh(c @ p["wk_t"])[..., None, :, :]
    w = jnp.maximum(jnp.tanh((q + k) @ p["wr"][0]), 0.0) * mask
    v = (c @ p["wv_t"] + p["bv"][0]) * (1.0 / dim ** 0.5)
    add = w @ v
    y = x + add
    mu = y.mean(-1, keepdims=True)
    var = ((y - mu) ** 2).mean(-1, keepdims=True)
    return (y - mu) / jnp.sqrt(var + 1e-5) * p["gamma"][0] + p["beta"][0]


# ----------------------------------------------------------------------------
# Parameter init (deterministic, synthetic) + stacked/folded layout for Pallas
# ----------------------------------------------------------------------------
def init_gated_attention(key, dim):
    ks = jax.random.split(key, 6)
    s = 0.1
    return dict(
        wq_t=jax.random.normal(ks[0], (dim, dim), jnp.float32) * s,  # queries.weight^T
        bq=jax.random.normal(ks[1], (1, dim), jnp.float32) * s,      # queries.bias
        wk_t=jax.random.normal(ks[2], (dim, dim), jnp.float32) * s,  # keys.weight^T
        wr=jax.random.normal(ks[3], (1, dim), jnp.float32) * s,      # weight_reduce.weight
        wv_t=jax.random.normal(ks[4], (dim, dim), jnp.float32) * s,  # values.weight^T
        bv=jax.random.normal(ks[5], (1, dim), jnp.float32) * s,      # values.bias
        gamma=jnp.ones((1, dim), jnp.float32),                       # LayerNorm.weight
        beta=jnp.zeros((1, dim), jnp.float32),                       # LayerNorm.bias
    )


def stack_gated_params(layer_params, dim, matmul_dtype=jnp.float32):
    """Stack per-layer params to (LAYERS, ...), fold 1/sqrt(dim) into values,
    and pre-cast the matmul weights to `matmul_dtype` (bf16 for the fast path)."""
    deflator = 1.0 / (dim ** 0.5)

    def st(name, scale=1.0, dtype=jnp.float32):
        return jnp.stack([p[name] * scale for p in layer_params], 0).astype(dtype)

    return dict(
        wq_t=st("wq_t", dtype=matmul_dtype), bq=st("bq"),
        wk_t=st("wk_t", dtype=matmul_dtype), wr=st("wr"),
        wv_t=st("wv_t", deflator, dtype=matmul_dtype), bv=st("bv", deflator),
        gamma=st("gamma"), beta=st("beta"),
    )


def init_patient_representation(key, num_embeddings, dim, layers):
    keys = jax.random.split(key, 1 + 2 * layers)
    med = [init_gated_attention(keys[1 + i], dim) for i in range(layers)]
    visit = [init_gated_attention(keys[1 + layers + i], dim) for i in range(layers)]
    return dict(
        embed=jax.random.normal(keys[0], (num_embeddings, dim), jnp.float32),
        med=med, visit=visit,
        med_stacked_f32=stack_gated_params(med, dim, jnp.float32),
        med_stacked_bf16=stack_gated_params(med, dim, jnp.bfloat16),
        visit_stacked_f32=stack_gated_params(visit, dim, jnp.float32),
        visit_stacked_bf16=stack_gated_params(visit, dim, jnp.bfloat16),
    )


# ----------------------------------------------------------------------------
# Full forward of patient_representation
# ----------------------------------------------------------------------------
def patient_representation_forward(params, x, mask, layers,
                                   use_pallas=True, use_bf16=True):
    # x: (B, V, M) int32 codes, mask: (B, V, M) float {0,1}
    B, V, M = x.shape
    D = params["embed"].shape[1]
    mask_f = mask.astype(jnp.float32)

    e = params["embed"][x]                                        # (B, V, M, D)

    if use_pallas:
        tag = "bf16" if use_bf16 else "f32"
        sp_med = params["med_stacked_" + tag]
        sp_visit = params["visit_stacked_" + tag]

        # med-level gated self-attention, all layers + masked max-pool fused
        pooled = gated_attention_stack(
            e.reshape(B * V * M, D), None, mask_f.reshape(B * V, M),
            sp_med, n=M, dim=D, layers=layers, self_attn=True,
            use_bf16=use_bf16)
        e3 = pooled.reshape(B, V, D)          # already pooled + presence-gated

        mvis = (jnp.sum(mask_f, axis=2) > 0).astype(jnp.float32)  # (B, V)
        q = e3[:, -1]                                             # (B, D)
        k = e3[:, :-1]                                            # (B, V-1, D)
        mv = mvis[:, :-1]                                         # (B, V-1)

        # visit-level gated cross-attention, all layers fused
        q2 = gated_attention_stack(
            q, k.reshape(B * (V - 1), D), mv, sp_visit,
            n=1, dim=D, layers=layers, self_attn=False, use_bf16=use_bf16)
        return q2[:, None, :]                                     # (B, 1, D)

    # ---- pure-JAX reference path ----
    m4 = jnp.broadcast_to(mask_f[:, :, None, :], (B, V, M, M))
    ef = e.reshape(B * V, M, D)
    mf = m4.reshape(B * V, M, M)
    for l in range(layers):
        ef = gated_attention_ref(ef, ef, mf, params["med"][l], D)
    e = ef.reshape(B, V, M, D)
    e = e + (mask_f[..., None] - 1.0) * 1e9
    e = jnp.max(e, axis=2)
    mvis = (jnp.sum(mask_f, axis=2) > 0).astype(jnp.float32)[..., None]
    e = e * mvis
    q3 = e[:, -1][:, None, :]
    k = e[:, :-1]
    mv3 = mvis[:, :-1, 0][:, None, :]
    for l in range(layers):
        q3 = gated_attention_ref(q3, k, mv3, params["visit"][l], D)
    return q3

# TODO(synk): optional dropout (module default dropout=None) is not implemented.


# ----------------------------------------------------------------------------
if __name__ == "__main__":
    B, V, M = 2, 8, 8          # batch, visits, meds per visit
    D = 32                     # embedding dim
    NUM_EMB = 50
    LAYERS = 2

    root = jax.random.PRNGKey(0)
    k_par, k_x, k_m = jax.random.split(root, 3)

    params = init_patient_representation(k_par, NUM_EMB, D, LAYERS)

    x = jax.random.randint(k_x, (B, V, M), 0, NUM_EMB, dtype=jnp.int32)
    mask = (jax.random.uniform(k_m, (B, V, M)) > 0.3).astype(jnp.float32)
    mask = mask.at[:, :, 0].set(1.0)   # every visit has at least one med

    fwd_exact = jax.jit(lambda p_, x_, m_: patient_representation_forward(
        p_, x_, m_, LAYERS, use_pallas=True, use_bf16=False))
    fwd_bf16 = jax.jit(lambda p_, x_, m_: patient_representation_forward(
        p_, x_, m_, LAYERS, use_pallas=True, use_bf16=True))

    # Reference at full f32 matmul precision (XLA's TPU default would demote
    # f32 dots to bf16 and loosen the comparison).
    with jax.default_matmul_precision("float32"):
        ref = patient_representation_forward(params, x, mask, LAYERS,
                                             use_pallas=False)
        ref = jax.block_until_ready(ref)

    out = jax.block_until_ready(fwd_exact(params, x, mask))
    assert out.shape == (B, 1, D), out.shape
    # NOTE: tolerance kept at 2e-3 to stay robust to backend matmul-precision
    # defaults; tightening further requires pinning in-kernel dot precision.
    assert jnp.allclose(out, ref, rtol=2e-3, atol=2e-3), \
        f"max abs diff (f32 path) {jnp.max(jnp.abs(out - ref))}"

    out_bf = jax.block_until_ready(fwd_bf16(params, x, mask))
    assert out_bf.shape == (B, 1, D), out_bf.shape
    assert jnp.allclose(out_bf, ref, rtol=6e-2, atol=6e-2), \
        f"max abs diff (bf16 path) {jnp.max(jnp.abs(out_bf - ref))}"

    print("KERNEL_OK")
</pallas_src>

<mosaic_0001>
module attributes {stable_mosaic.version = 11 : i64} {
  func.func @_med_selfattn_maxpool_kernel(%arg0: i32, %arg1: memref<128x32xf32, #tpu.memory_space<vmem>>, %arg2: memref<1x1x128xf32, #tpu.memory_space<vmem>>, %arg3: memref<128x1xf32, #tpu.memory_space<vmem>>, %arg4: memref<2x32x32xf32, #tpu.memory_space<vmem>>, %arg5: memref<2x1x32xf32, #tpu.memory_space<vmem>>, %arg6: memref<2x32x32xf32, #tpu.memory_space<vmem>>, %arg7: memref<2x1x32xf32, #tpu.memory_space<vmem>>, %arg8: memref<2x32x32xf32, #tpu.memory_space<vmem>>, %arg9: memref<2x1x32xf32, #tpu.memory_space<vmem>>, %arg10: memref<2x1x32xf32, #tpu.memory_space<vmem>>, %arg11: memref<2x1x32xf32, #tpu.memory_space<vmem>>, %arg12: memref<16x32xf32, #tpu.memory_space<vmem>>) attributes {dimension_semantics = [#tpu.dimension_semantics<parallel>], iteration_bounds = array<i64: 1>, scalar_prefetch = 0 : i64, scratch_operands = 0 : i64, tpu.core_type = #tpu.core_type<tc>, window_params = [{transform_indices = @transform_0, window_bounds = array<i64: 128, 32>}, {transform_indices = @transform_1, window_bounds = array<i64: 1, 1, 128>}, {transform_indices = @transform_2, window_bounds = array<i64: 128, 1>}, {pipeline_mode = #tpu.pipeline_mode<synchronous>, transform_indices = @transform_3, window_bounds = array<i64: 2, 32, 32>}, {pipeline_mode = #tpu.pipeline_mode<synchronous>, transform_indices = @transform_4, window_bounds = array<i64: 2, 1, 32>}, {pipeline_mode = #tpu.pipeline_mode<synchronous>, transform_indices = @transform_5, window_bounds = array<i64: 2, 32, 32>}, {pipeline_mode = #tpu.pipeline_mode<synchronous>, transform_indices = @transform_6, window_bounds = array<i64: 2, 1, 32>}, {pipeline_mode = #tpu.pipeline_mode<synchronous>, transform_indices = @transform_7, window_bounds = array<i64: 2, 32, 32>}, {pipeline_mode = #tpu.pipeline_mode<synchronous>, transform_indices = @transform_8, window_bounds = array<i64: 2, 1, 32>}, {pipeline_mode = #tpu.pipeline_mode<synchronous>, transform_indices = @transform_9, window_bounds = array<i64: 2, 1, 32>}, {pipeline_mode = #tpu.pipeline_mode<synchronous>, transform_indices = @transform_10, window_bounds = array<i64: 2, 1, 32>}, {transform_indices = @transform_11, window_bounds = array<i64: 16, 32>}]} {
    %c0 = arith.constant 0 : index
    %c0_0 = arith.constant 0 : index
    %0 = vector.load %arg1[%c0, %c0_0] : memref<128x32xf32, #tpu.memory_space<vmem>>, vector<128x32xf32>
    %c0_1 = arith.constant 0 : index
    %c0_2 = arith.constant 0 : index
    %c0_3 = arith.constant 0 : index
    %1 = vector.load %arg2[%c0_1, %c0_2, %c0_3] : memref<1x1x128xf32, #tpu.memory_space<vmem>>, vector<1x1x128xf32>
    %2 = vector.shape_cast %1 : vector<1x1x128xf32> to vector<1x128xf32>
    %3 = tpu.iota {dimensions = array<i32: 0>} : vector<128x128xi32>
    %4 = tpu.iota {dimensions = array<i32: 1>} : vector<128x128xi32>
    %5 = arith.sitofp %3 : vector<128x128xi32> to vector<128x128xf32>
    %cst = arith.constant 1.250000e-01 : f32
    %6 = vector.broadcast %cst : f32 to vector<128x128xf32>
    %7 = arith.mulf %5, %6 : vector<128x128xf32>
    %cst_4 = arith.constant 9.99999974E-5 : f32
    %8 = vector.broadcast %cst_4 : f32 to vector<128x128xf32>
    %9 = arith.addf %7, %8 : vector<128x128xf32>
    %10 = arith.fptosi %9 : vector<128x128xf32> to vector<128x128xi32>
    %11 = arith.sitofp %4 : vector<128x128xi32> to vector<128x128xf32>
    %cst_5 = arith.constant 1.250000e-01 : f32
    %12 = vector.broadcast %cst_5 : f32 to vector<128x128xf32>
    %13 = arith.mulf %11, %12 : vector<128x128xf32>
    %cst_6 = arith.constant 9.99999974E-5 : f32
    %14 = vector.broadcast %cst_6 : f32 to vector<128x128xf32>
    %15 = arith.addf %13, %14 : vector<128x128xf32>
    %16 = arith.fptosi %15 : vector<128x128xf32> to vector<128x128xi32>
    %17 = arith.cmpi eq, %10, %16 : vector<128x128xi32>
    %cst_7 = arith.constant 0.000000e+00 : f32
    %18 = vector.shape_cast %2 : vector<1x128xf32> to vector<1x128xf32>
    %19 = vector.broadcast %18 : vector<1x128xf32> to vector<128x128xf32>
    %20 = vector.broadcast %cst_7 : f32 to vector<128x128xf32>
    %21 = arith.select %17, %19, %20 : vector<128x128xi1>, vector<128x128xf32>
    %c0_8 = arith.constant 0 : index
    %c0_9 = arith.constant 0 : index
    %c0_10 = arith.constant 0 : index
    %22 = vector.load %arg4[%c0_8, %c0_9, %c0_10] : memref<2x32x32xf32, #tpu.memory_space<vmem>>, vector<1x32x32xf32>
    %23 = vector.shape_cast %22 : vector<1x32x32xf32> to vector<32x32xf32>
    %c0_11 = arith.constant 0 : index
    %c0_12 = arith.constant 0 : index
    %c0_13 = arith.constant 0 : index
    %24 = vector.load %arg5[%c0_11, %c0_12, %c0_13] : memref<2x1x32xf32, #tpu.memory_space<vmem>>, vector<1x1x32xf32>
    %25 = vector.shape_cast %24 : vector<1x1x32xf32> to vector<1x32xf32>
    %c0_14 = arith.constant 0 : index
    %c0_15 = arith.constant 0 : index
    %c0_16 = arith.constant 0 : index
    %26 = vector.load %arg6[%c0_14, %c0_15, %c0_16] : memref<2x32x32xf32, #tpu.memory_space<vmem>>, vector<1x32x32xf32>
    %27 = vector.shape_cast %26 : vector<1x32x32xf32> to vector<32x32xf32>
    %c0_17 = arith.constant 0 : index
    %c0_18 = arith.constant 0 : index
    %c0_19 = arith.constant 0 : index
    %28 = vector.load %arg7[%c0_17, %c0_18, %c0_19] : memref<2x1x32xf32, #tpu.memory_space<vmem>>, vector<1x1x32xf32>
    %29 = vector.shape_cast %28 : vector<1x1x32xf32> to vector<1x32xf32>
    %c0_20 = arith.constant 0 : index
    %c0_21 = arith.constant 0 : index
    %c0_22 = arith.constant 0 : index
    %30 = vector.load %arg8[%c0_20, %c0_21, %c0_22] : memref<2x32x32xf32, #tpu.memory_space<vmem>>, vector<1x32x32xf32>
    %31 = vector.shape_cast %30 : vector<1x32x32xf32> to vector<32x32xf32>
    %c0_23 = arith.constant 0 : index
    %c0_24 = arith.constant 0 : index
    %c0_25 = arith.constant 0 : index
    %32 = vector.load %arg9[%c0_23, %c0_24, %c0_25] : memref<2x1x32xf32, #tpu.memory_space<vmem>>, vector<1x1x32xf32>
    %33 = vector.shape_cast %32 : vector<1x1x32xf32> to vector<1x32xf32>
    %c0_26 = arith.constant 0 : index
    %c0_27 = arith.constant 0 : index
    %c0_28 = arith.constant 0 : index
    %34 = vector.load %arg10[%c0_26, %c0_27, %c0_28] : memref<2x1x32xf32, #tpu.memory_space<vmem>>, vector<1x1x32xf32>
    %35 = vector.shape_cast %34 : vector<1x1x32xf32> to vector<1x32xf32>
    %c0_29 = arith.constant 0 : index
    %c0_30 = arith.constant 0 : index
    %c0_31 = arith.constant 0 : index
    %36 = vector.load %arg11[%c0_29, %c0_30, %c0_31] : memref<2x1x32xf32, #tpu.memory_space<vmem>>, vector<1x1x32xf32>
    %37 = vector.shape_cast %36 : vector<1x1x32xf32> to vector<1x32xf32>
    %cst_32 = arith.constant dense<0.000000e+00> : vector<128x32xf32>
    %38 = tpu.matmul %0, %23, %cst_32 {dimension_numbers = #tpu.dot_dimension_numbers<[1], [0], [0], [1], [0, 0, 1, 1], [], []>} : vector<128x32xf32>, vector<32x32xf32>, vector<128x32xf32> -> vector<128x32xf32>
    %39 = vector.broadcast %25 : vector<1x32xf32> to vector<128x32xf32>
    %40 = arith.addf %38, %39 : vector<128x32xf32>
    %41 = math.tanh %40 : vector<128x32xf32>
    %cst_33 = arith.constant dense<0.000000e+00> : vector<128x32xf32>
    %42 = tpu.matmul %0, %27, %cst_33 {dimension_numbers = #tpu.dot_dimension_numbers<[1], [0], [0], [1], [0, 0, 1, 1], [], []>} : vector<128x32xf32>, vector<32x32xf32>, vector<128x32xf32> -> vector<128x32xf32>
    %43 = math.tanh %42 : vector<128x32xf32>
    %cst_34 = arith.constant dense<0.000000e+00> : vector<128x1xf32>
    %44 = tpu.matmul %41, %29, %cst_34 {dimension_numbers = #tpu.dot_dimension_numbers<[1], [1], [0], [0], [0, 0, 1, 0], [], []>} : vector<128x32xf32>, vector<1x32xf32>, vector<128x1xf32> -> vector<128x1xf32>
    %cst_35 = arith.constant dense<0.000000e+00> : vector<1x128xf32>
    %45 = tpu.matmul %29, %43, %cst_35 {dimension_numbers = #tpu.dot_dimension_numbers<[1], [1], [0], [0], [0, 0, 1, 0], [], []>} : vector<1x32xf32>, vector<128x32xf32>, vector<1x128xf32> -> vector<1x128xf32>
    %46 = vector.broadcast %44 : vector<128x1xf32> to vector<128x128xf32>
    %47 = vector.broadcast %45 : vector<1x128xf32> to vector<128x128xf32>
    %48 = arith.addf %46, %47 : vector<128x128xf32>
    %49 = math.tanh %48 : vector<128x128xf32>
    %cst_36 = arith.constant 0.000000e+00 : f32
    %50 = vector.broadcast %cst_36 : f32 to vector<128x128xf32>
    %51 = arith.maximumf %49, %50 : vector<128x128xf32>
    %52 = arith.mulf %51, %21 : vector<128x128xf32>
    %cst_37 = arith.constant dense<0.000000e+00> : vector<128x32xf32>
    %53 = tpu.matmul %0, %31, %cst_37 {dimension_numbers = #tpu.dot_dimension_numbers<[1], [0], [0], [1], [0, 0, 1, 1], [], []>} : vector<128x32xf32>, vector<32x32xf32>, vector<128x32xf32> -> vector<128x32xf32>
    %54 = vector.broadcast %33 : vector<1x32xf32> to vector<128x32xf32>
    %55 = arith.addf %53, %54 : vector<128x32xf32>
    %cst_38 = arith.constant dense<0.000000e+00> : vector<128x32xf32>
    %56 = tpu.matmul %52, %55, %cst_38 {dimension_numbers = #tpu.dot_dimension_numbers<[1], [0], [0], [1], [0, 0, 1, 1], [], []>} : vector<128x128xf32>, vector<128x32xf32>, vector<128x32xf32> -> vector<128x32xf32>
    %57 = arith.addf %0, %56 : vector<128x32xf32>
    %cst_39 = arith.constant dense<0.000000e+00> : vector<128xf32>
    %58 = vector.multi_reduction <add>, %57, %cst_39 [1] : vector<128x32xf32> to vector<128xf32>
    %59 = vector.shape_cast %58 : vector<128xf32> to vector<128x1xf32>
    %cst_40 = arith.constant 3.200000e+01 : f32
    %60 = vector.broadcast %cst_40 : f32 to vector<128x1xf32>
    %61 = arith.divf %59, %60 : vector<128x1xf32>
    %62 = vector.broadcast %61 : vector<128x1xf32> to vector<128x32xf32>
    %63 = arith.subf %57, %62 : vector<128x32xf32>
    %64 = arith.mulf %63, %63 : vector<128x32xf32>
    %cst_41 = arith.constant dense<0.000000e+00> : vector<128xf32>
    %65 = vector.multi_reduction <add>, %64, %cst_41 [1] : vector<128x32xf32> to vector<128xf32>
    %66 = vector.shape_cast %65 : vector<128xf32> to vector<128x1xf32>
    %cst_42 = arith.constant 3.200000e+01 : f32
    %67 = vector.broadcast %cst_42 : f32 to vector<128x1xf32>
    %68 = arith.divf %66, %67 : vector<128x1xf32>
    %69 = vector.broadcast %61 : vector<128x1xf32> to vector<128x32xf32>
    %70 = arith.subf %57, %69 : vector<128x32xf32>
    %cst_43 = arith.constant 9.99999974E-6 : f32
    %71 = vector.broadcast %cst_43 : f32 to vector<128x1xf32>
    %72 = arith.addf %68, %71 : vector<128x1xf32>
    %73 = math.rsqrt %72 : vector<128x1xf32>
    %74 = vector.broadcast %73 : vector<128x1xf32> to vector<128x32xf32>
    %75 = arith.mulf %70, %74 : vector<128x32xf32>
    %76 = vector.broadcast %35 : vector<1x32xf32> to vector<128x32xf32>
    %77 = arith.mulf %75, %76 : vector<128x32xf32>
    %78 = vector.broadcast %37 : vector<1x32xf32> to vector<128x32xf32>
    %79 = arith.addf %77, %78 : vector<128x32xf32>
    %c1 = arith.constant 1 : index
    %c0_44 = arith.constant 0 : index
    %c0_45 = arith.constant 0 : index
    %80 = vector.load %arg4[%c1, %c0_44, %c0_45] : memref<2x32x32xf32, #tpu.memory_space<vmem>>, vector<1x32x32xf32>
    %81 = vector.shape_cast %80 : vector<1x32x32xf32> to vector<32x32xf32>
    %c1_46 = arith.constant 1 : index
    %c0_47 = arith.constant 0 : index
    %c0_48 = arith.constant 0 : index
    %82 = vector.load %arg5[%c1_46, %c0_47, %c0_48] : memref<2x1x32xf32, #tpu.memory_space<vmem>>, vector<1x1x32xf32>
    %83 = vector.shape_cast %82 : vector<1x1x32xf32> to vector<1x32xf32>
    %c1_49 = arith.constant 1 : index
    %c0_50 = arith.constant 0 : index
    %c0_51 = arith.constant 0 : index
    %84 = vector.load %arg6[%c1_49, %c0_50, %c0_51] : memref<2x32x32xf32, #tpu.memory_space<vmem>>, vector<1x32x32xf32>
    %85 = vector.shape_cast %84 : vector<1x32x32xf32> to vector<32x32xf32>
    %c1_52 = arith.constant 1 : index
    %c0_53 = arith.constant 0 : index
    %c0_54 = arith.constant 0 : index
    %86 = vector.load %arg7[%c1_52, %c0_53, %c0_54] : memref<2x1x32xf32, #tpu.memory_space<vmem>>, vector<1x1x32xf32>
    %87 = vector.shape_cast %86 : vector<1x1x32xf32> to vector<1x32xf32>
    %c1_55 = arith.constant 1 : index
    %c0_56 = arith.constant 0 : index
    %c0_57 = arith.constant 0 : index
    %88 = vector.load %arg8[%c1_55, %c0_56, %c0_57] : memref<2x32x32xf32, #tpu.memory_space<vmem>>, vector<1x32x32xf32>
    %89 = vector.shape_cast %88 : vector<1x32x32xf32> to vector<32x32xf32>
    %c1_58 = arith.constant 1 : index
    %c0_59 = arith.constant 0 : index
    %c0_60 = arith.constant 0 : index
    %90 = vector.load %arg9[%c1_58, %c0_59, %c0_60] : memref<2x1x32xf32, #tpu.memory_space<vmem>>, vector<1x1x32xf32>
    %91 = vector.shape_cast %90 : vector<1x1x32xf32> to vector<1x32xf32>
    %c1_61 = arith.constant 1 : index
    %c0_62 = arith.constant 0 : index
    %c0_63 = arith.constant 0 : index
    %92 = vector.load %arg10[%c1_61, %c0_62, %c0_63] : memref<2x1x32xf32, #tpu.memory_space<vmem>>, vector<1x1x32xf32>
    %93 = vector.shape_cast %92 : vector<1x1x32xf32> to vector<1x32xf32>
    %c1_64 = arith.constant 1 : index
    %c0_65 = arith.constant 0 : index
    %c0_66 = arith.constant 0 : index
    %94 = vector.load %arg11[%c1_64, %c0_65, %c0_66] : memref<2x1x32xf32, #tpu.memory_space<vmem>>, vector<1x1x32xf32>
    %95 = vector.shape_cast %94 : vector<1x1x32xf32> to vector<1x32xf32>
    %cst_67 = arith.constant dense<0.000000e+00> : vector<128x32xf32>
    %96 = tpu.matmul %79, %81, %cst_67 {dimension_numbers = #tpu.dot_dimension_numbers<[1], [0], [0], [1], [0, 0, 1, 1], [], []>} : vector<128x32xf32>, vector<32x32xf32>, vector<128x32xf32> -> vector<128x32xf32>
    %97 = vector.broadcast %83 : vector<1x32xf32> to vector<128x32xf32>
    %98 = arith.addf %96, %97 : vector<128x32xf32>
    %99 = math.tanh %98 : vector<128x32xf32>
    %cst_68 = arith.constant dense<0.000000e+00> : vector<128x32xf32>
    %100 = tpu.matmul %79, %85, %cst_68 {dimension_numbers = #tpu.dot_dimension_numbers<[1], [0], [0], [1], [0, 0, 1, 1], [], []>} : vector<128x32xf32>, vector<32x32xf32>, vector<128x32xf32> -> vector<128x32xf32>
    %101 = math.tanh %100 : vector<128x32xf32>
    %cst_69 = arith.constant dense<0.000000e+00> : vector<128x1xf32>
    %102 = tpu.matmul %99, %87, %cst_69 {dimension_numbers = #tpu.dot_dimension_numbers<[1], [1], [0], [0], [0, 0, 1, 0], [], []>} : vector<128x32xf32>, vector<1x32xf32>, vector<128x1xf32> -> vector<128x1xf32>
    %cst_70 = arith.constant dense<0.000000e+00> : vector<1x128xf32>
    %103 = tpu.matmul %87, %101, %cst_70 {dimension_numbers = #tpu.dot_dimension_numbers<[1], [1], [0], [0], [0, 0, 1, 0], [], []>} : vector<1x32xf32>, vector<128x32xf32>, vector<1x128xf32> -> vector<1x128xf32>
    %104 = vector.broadcast %102 : vector<128x1xf32> to vector<128x128xf32>
    %105 = vector.broadcast %103 : vector<1x128xf32> to vector<128x128xf32>
    %106 = arith.addf %104, %105 : vector<128x128xf32>
    %107 = math.tanh %106 : vector<128x128xf32>
    %cst_71 = arith.constant 0.000000e+00 : f32
    %108 = vector.broadcast %cst_71 : f32 to vector<128x128xf32>
    %109 = arith.maximumf %107, %108 : vector<128x128xf32>
    %110 = arith.mulf %109, %21 : vector<128x128xf32>
    %cst_72 = arith.constant dense<0.000000e+00> : vector<128x32xf32>
    %111 = tpu.matmul %79, %89, %cst_72 {dimension_numbers = #tpu.dot_dimension_numbers<[1], [0], [0], [1], [0, 0, 1, 1], [], []>} : vector<128x32xf32>, vector<32x32xf32>, vector<128x32xf32> -> vector<128x32xf32>
    %112 = vector.broadcast %91 : vector<1x32xf32> to vector<128x32xf32>
    %113 = arith.addf %111, %112 : vector<128x32xf32>
    %cst_73 = arith.constant dense<0.000000e+00> : vector<128x32xf32>
    %114 = tpu.matmul %110, %113, %cst_73 {dimension_numbers = #tpu.dot_dimension_numbers<[1], [0], [0], [1], [0, 0, 1, 1], [], []>} : vector<128x128xf32>, vector<128x32xf32>, vector<128x32xf32> -> vector<128x32xf32>
    %115 = arith.addf %79, %114 : vector<128x32xf32>
    %cst_74 = arith.constant dense<0.000000e+00> : vector<128xf32>
    %116 = vector.multi_reduction <add>, %115, %cst_74 [1] : vector<128x32xf32> to vector<128xf32>
    %117 = vector.shape_cast %116 : vector<128xf32> to vector<128x1xf32>
    %cst_75 = arith.constant 3.200000e+01 : f32
    %118 = vector.broadcast %cst_75 : f32 to vector<128x1xf32>
    %119 = arith.divf %117, %118 : vector<128x1xf32>
    %120 = vector.broadcast %119 : vector<128x1xf32> to vector<128x32xf32>
    %121 = arith.subf %115, %120 : vector<128x32xf32>
    %122 = arith.mulf %121, %121 : vector<128x32xf32>
    %cst_76 = arith.constant dense<0.000000e+00> : vector<128xf32>
    %123 = vector.multi_reduction <add>, %122, %cst_76 [1] : vector<128x32xf32> to vector<128xf32>
    %124 = vector.shape_cast %123 : vector<128xf32> to vector<128x1xf32>
    %cst_77 = arith.constant 3.200000e+01 : f32
    %125 = vector.broadcast %cst_77 : f32 to vector<128x1xf32>
    %126 = arith.divf %124, %125 : vector<128x1xf32>
    %127 = vector.broadcast %119 : vector<128x1xf32> to vector<128x32xf32>
    %128 = arith.subf %115, %127 : vector<128x32xf32>
    %cst_78 = arith.constant 9.99999974E-6 : f32
    %129 = vector.broadcast %cst_78 : f32 to vector<128x1xf32>
    %130 = arith.addf %126, %129 : vector<128x1xf32>
    %131 = math.rsqrt %130 : vector<128x1xf32>
    %132 = vector.broadcast %131 : vector<128x1xf32> to vector<128x32xf32>
    %133 = arith.mulf %128, %132 : vector<128x32xf32>
    %134 = vector.broadcast %93 : vector<1x32xf32> to vector<128x32xf32>
    %135 = arith.mulf %133, %134 : vector<128x32xf32>
    %136 = vector.broadcast %95 : vector<1x32xf32> to vector<128x32xf32>
    %137 = arith.addf %135, %136 : vector<128x32xf32>
    %c0_79 = arith.constant 0 : index
    %c0_80 = arith.constant 0 : index
    %138 = vector.load %arg3[%c0_79, %c0_80] : memref<128x1xf32, #tpu.memory_space<vmem>>, vector<128x1xf32>
    %139 = vector.shape_cast %138 : vector<128x1xf32> to vector<16x8x1xf32>
    %140 = vector.shape_cast %137 : vector<128x32xf32> to vector<16x8x32xf32>
    %cst_81 = arith.constant 1.000000e+00 : f32
    %141 = vector.broadcast %cst_81 : f32 to vector<16x8x1xf32>
    %142 = arith.subf %139, %141 : vector<16x8x1xf32>
    %cst_82 = arith.constant 1.000000e+09 : f32
    %143 = vector.broadcast %cst_82 : f32 to vector<16x8x1xf32>
    %144 = arith.mulf %142, %143 : vector<16x8x1xf32>
    %145 = vector.broadcast %144 : vector<16x8x1xf32> to vector<16x8x32xf32>
    %146 = arith.addf %140, %145 : vector<16x8x32xf32>
    %cst_83 = arith.constant dense<0xFF800000> : vector<16x32xf32>
    %147 = vector.multi_reduction <maximumf>, %146, %cst_83 [1] : vector<16x8x32xf32> to vector<16x32xf32>
    %cst_84 = arith.constant dense<0xFF800000> : vector<16x1xf32>
    %148 = vector.multi_reduction <maximumf>, %139, %cst_84 [1] : vector<16x8x1xf32> to vector<16x1xf32>
    %149 = vector.broadcast %148 : vector<16x1xf32> to vector<16x32xf32>
    %150 = arith.mulf %147, %149 : vector<16x32xf32>
    %c0_85 = arith.constant 0 : index
    %c0_86 = arith.constant 0 : index
    %151 = vector.load %arg12[%c0_85, %c0_86] : memref<16x32xf32, #tpu.memory_space<vmem>>, vector<16x32xf32>
    tpu.vector_store %arg12[%c0_85, %c0_86], %150 {strides = array<i32>} : memref<16x32xf32, #tpu.memory_space<vmem>>, vector<16x32xf32>,
    return
  }
  func.func @transform_0(%arg0: i32) -> (i32, i32) {
    %c0_i32 = arith.constant 0 : i32
    %c0_i32_0 = arith.constant 0 : i32
    return %arg0, %c0_i32 : i32, i32
  }
  func.func @transform_1(%arg0: i32) -> (i32, i32, i32) {
    %c0_i32 = arith.constant 0 : i32
    %c0_i32_0 = arith.constant 0 : i32
    %c0_i32_1 = arith.constant 0 : i32
    return %arg0, %c0_i32, %c0_i32_0 : i32, i32, i32
  }
  func.func @transform_2(%arg0: i32) -> (i32, i32) {
    %c0_i32 = arith.constant 0 : i32
    %c0_i32_0 = arith.constant 0 : i32
    return %arg0, %c0_i32 : i32, i32
  }
  func.func @transform_3(%arg0: i32) -> (i32, i32, i32) {
    %c0_i32 = arith.constant 0 : i32
    %c0_i32_0 = arith.constant 0 : i32
    %c0_i32_1 = arith.constant 0 : i32
    %c0_i32_2 = arith.constant 0 : i32
    return %c0_i32, %c0_i32_0, %c0_i32_1 : i32, i32, i32
  }
  func.func @transform_4(%arg0: i32) -> (i32, i32, i32) {
    %c0_i32 = arith.constant 0 : i32
    %c0_i32_0 = arith.constant 0 : i32
    %c0_i32_1 = arith.constant 0 : i32
    %c0_i32_2 = arith.constant 0 : i32
    return %c0_i32, %c0_i32_0, %c0_i32_1 : i32, i32, i32
  }
  func.func @transform_5(%arg0: i32) -> (i32, i32, i32) {
    %c0_i32 = arith.constant 0 : i32
    %c0_i32_0 = arith.constant 0 : i32
    %c0_i32_1 = arith.constant 0 : i32
    %c0_i32_2 = arith.constant 0 : i32
    return %c0_i32, %c0_i32_0, %c0_i32_1 : i32, i32, i32
  }
  func.func @transform_6(%arg0: i32) -> (i32, i32, i32) {
    %c0_i32 = arith.constant 0 : i32
    %c0_i32_0 = arith.constant 0 : i32
    %c0_i32_1 = arith.constant 0 : i32
    %c0_i32_2 = arith.constant 0 : i32
    return %c0_i32, %c0_i32_0, %c0_i32_1 : i32, i32, i32
  }
  func.func @transform_7(%arg0: i32) -> (i32, i32, i32) {
    %c0_i32 = arith.constant 0 : i32
    %c0_i32_0 = arith.constant 0 : i32
    %c0_i32_1 = arith.constant 0 : i32
    %c0_i32_2 = arith.constant 0 : i32
    return %c0_i32, %c0_i32_0, %c0_i32_1 : i32, i32, i32
  }
  func.func @transform_8(%arg0: i32) -> (i32, i32, i32) {
    %c0_i32 = arith.constant 0 : i32
    %c0_i32_0 = arith.constant 0 : i32
    %c0_i32_1 = arith.constant 0 : i32
    %c0_i32_2 = arith.constant 0 : i32
    return %c0_i32, %c0_i32_0, %c0_i32_1 : i32, i32, i32
  }
  func.func @transform_9(%arg0: i32) -> (i32, i32, i32) {
    %c0_i32 = arith.constant 0 : i32
    %c0_i32_0 = arith.constant 0 : i32
    %c0_i32_1 = arith.constant 0 : i32
    %c0_i32_2 = arith.constant 0 : i32
    return %c0_i32, %c0_i32_0, %c0_i32_1 : i32, i32, i32
  }
  func.func @transform_10(%arg0: i32) -> (i32, i32, i32) {
    %c0_i32 = arith.constant 0 : i32
    %c0_i32_0 = arith.constant 0 : i32
    %c0_i32_1 = arith.constant 0 : i32
    %c0_i32_2 = arith.constant 0 : i32
    return %c0_i32, %c0_i32_0, %c0_i32_1 : i32, i32, i32
  }
  func.func @transform_11(%arg0: i32) -> (i32, i32) {
    %c0_i32 = arith.constant 0 : i32
    %c0_i32_0 = arith.constant 0 : i32
    return %arg0, %c0_i32 : i32, i32
  }
}

module attributes {stable_mosaic.version = 11 : i64} {
  func.func @_visit_crossattn_kernel(%arg0: i32, %arg1: memref<2x32xf32, #tpu.memory_space<vmem>>, %arg2: memref<14x32xf32, #tpu.memory_space<vmem>>, %arg3: memref<1x1x14xf32, #tpu.memory_space<vmem>>, %arg4: memref<2x32x32xf32, #tpu.memory_space<vmem>>, %arg5: memref<2x1x32xf32, #tpu.memory_space<vmem>>, %arg6: memref<2x32x32xf32, #tpu.memory_space<vmem>>, %arg7: memref<2x1x32xf32, #tpu.memory_space<vmem>>, %arg8: memref<2x32x32xf32, #tpu.memory_space<vmem>>, %arg9: memref<2x1x32xf32, #tpu.memory_space<vmem>>, %arg10: memref<2x1x32xf32, #tpu.memory_space<vmem>>, %arg11: memref<2x1x32xf32, #tpu.memory_space<vmem>>, %arg12: memref<2x32xf32, #tpu.memory_space<vmem>>) attributes {dimension_semantics = [#tpu.dimension_semantics<parallel>], iteration_bounds = array<i64: 1>, scalar_prefetch = 0 : i64, scratch_operands = 0 : i64, tpu.core_type = #tpu.core_type<tc>, window_params = [{transform_indices = @transform_0, window_bounds = array<i64: 2, 32>}, {transform_indices = @transform_1, window_bounds = array<i64: 14, 32>}, {transform_indices = @transform_2, window_bounds = array<i64: 1, 1, 14>}, {pipeline_mode = #tpu.pipeline_mode<synchronous>, transform_indices = @transform_3, window_bounds = array<i64: 2, 32, 32>}, {pipeline_mode = #tpu.pipeline_mode<synchronous>, transform_indices = @transform_4, window_bounds = array<i64: 2, 1, 32>}, {pipeline_mode = #tpu.pipeline_mode<synchronous>, transform_indices = @transform_5, window_bounds = array<i64: 2, 32, 32>}, {pipeline_mode = #tpu.pipeline_mode<synchronous>, transform_indices = @transform_6, window_bounds = array<i64: 2, 1, 32>}, {pipeline_mode = #tpu.pipeline_mode<synchronous>, transform_indices = @transform_7, window_bounds = array<i64: 2, 32, 32>}, {pipeline_mode = #tpu.pipeline_mode<synchronous>, transform_indices = @transform_8, window_bounds = array<i64: 2, 1, 32>}, {pipeline_mode = #tpu.pipeline_mode<synchronous>, transform_indices = @transform_9, window_bounds = array<i64: 2, 1, 32>}, {pipeline_mode = #tpu.pipeline_mode<synchronous>, transform_indices = @transform_10, window_bounds = array<i64: 2, 1, 32>}, {transform_indices = @transform_11, window_bounds = array<i64: 2, 32>}]} {
    %c0 = arith.constant 0 : index
    %c0_0 = arith.constant 0 : index
    %0 = vector.load %arg1[%c0, %c0_0] : memref<2x32xf32, #tpu.memory_space<vmem>>, vector<2x32xf32>
    %c0_1 = arith.constant 0 : index
    %c0_2 = arith.constant 0 : index
    %1 = vector.load %arg2[%c0_1, %c0_2] : memref<14x32xf32, #tpu.memory_space<vmem>>, vector<14x32xf32>
    %c0_3 = arith.constant 0 : index
    %c0_4 = arith.constant 0 : index
    %c0_5 = arith.constant 0 : index
    %2 = vector.load %arg3[%c0_3, %c0_4, %c0_5] : memref<1x1x14xf32, #tpu.memory_space<vmem>>, vector<1x1x14xf32>
    %3 = vector.shape_cast %2 : vector<1x1x14xf32> to vector<1x14xf32>
    %4 = tpu.iota {dimensions = array<i32: 0>} : vector<2x14xi32>
    %5 = tpu.iota {dimensions = array<i32: 1>} : vector<2x14xi32>
    %6 = arith.sitofp %5 : vector<2x14xi32> to vector<2x14xf32>
    %cst = arith.constant 0.142857149 : f32
    %7 = vector.broadcast %cst : f32 to vector<2x14xf32>
    %8 = arith.mulf %6, %7 : vector<2x14xf32>
    %cst_6 = arith.constant 9.99999974E-5 : f32
    %9 = vector.broadcast %cst_6 : f32 to vector<2x14xf32>
    %10 = arith.addf %8, %9 : vector<2x14xf32>
    %11 = arith.fptosi %10 : vector<2x14xf32> to vector<2x14xi32>
    %12 = arith.cmpi eq, %4, %11 : vector<2x14xi32>
    %cst_7 = arith.constant 0.000000e+00 : f32
    %13 = vector.shape_cast %3 : vector<1x14xf32> to vector<1x14xf32>
    %14 = vector.broadcast %13 : vector<1x14xf32> to vector<2x14xf32>
    %15 = vector.broadcast %cst_7 : f32 to vector<2x14xf32>
    %16 = arith.select %12, %14, %15 : vector<2x14xi1>, vector<2x14xf32>
    %c0_8 = arith.constant 0 : index
    %c0_9 = arith.constant 0 : index
    %c0_10 = arith.constant 0 : index
    %17 = vector.load %arg4[%c0_8, %c0_9, %c0_10] : memref<2x32x32xf32, #tpu.memory_space<vmem>>, vector<1x32x32xf32>
    %18 = vector.shape_cast %17 : vector<1x32x32xf32> to vector<32x32xf32>
    %c0_11 = arith.constant 0 : index
    %c0_12 = arith.constant 0 : index
    %c0_13 = arith.constant 0 : index
    %19 = vector.load %arg5[%c0_11, %c0_12, %c0_13] : memref<2x1x32xf32, #tpu.memory_space<vmem>>, vector<1x1x32xf32>
    %20 = vector.shape_cast %19 : vector<1x1x32xf32> to vector<1x32xf32>
    %c0_14 = arith.constant 0 : index
    %c0_15 = arith.constant 0 : index
    %c0_16 = arith.constant 0 : index
    %21 = vector.load %arg6[%c0_14, %c0_15, %c0_16] : memref<2x32x32xf32, #tpu.memory_space<vmem>>, vector<1x32x32xf32>
    %22 = vector.shape_cast %21 : vector<1x32x32xf32> to vector<32x32xf32>
    %c0_17 = arith.constant 0 : index
    %c0_18 = arith.constant 0 : index
    %c0_19 = arith.constant 0 : index
    %23 = vector.load %arg7[%c0_17, %c0_18, %c0_19] : memref<2x1x32xf32, #tpu.memory_space<vmem>>, vector<1x1x32xf32>
    %24 = vector.shape_cast %23 : vector<1x1x32xf32> to vector<1x32xf32>
    %c0_20 = arith.constant 0 : index
    %c0_21 = arith.constant 0 : index
    %c0_22 = arith.constant 0 : index
    %25 = vector.load %arg8[%c0_20, %c0_21, %c0_22] : memref<2x32x32xf32, #tpu.memory_space<vmem>>, vector<1x32x32xf32>
    %26 = vector.shape_cast %25 : vector<1x32x32xf32> to vector<32x32xf32>
    %c0_23 = arith.constant 0 : index
    %c0_24 = arith.constant 0 : index
    %c0_25 = arith.constant 0 : index
    %27 = vector.load %arg9[%c0_23, %c0_24, %c0_25] : memref<2x1x32xf32, #tpu.memory_space<vmem>>, vector<1x1x32xf32>
    %28 = vector.shape_cast %27 : vector<1x1x32xf32> to vector<1x32xf32>
    %c0_26 = arith.constant 0 : index
    %c0_27 = arith.constant 0 : index
    %c0_28 = arith.constant 0 : index
    %29 = vector.load %arg10[%c0_26, %c0_27, %c0_28] : memref<2x1x32xf32, #tpu.memory_space<vmem>>, vector<1x1x32xf32>
    %30 = vector.shape_cast %29 : vector<1x1x32xf32> to vector<1x32xf32>
    %c0_29 = arith.constant 0 : index
    %c0_30 = arith.constant 0 : index
    %c0_31 = arith.constant 0 : index
    %31 = vector.load %arg11[%c0_29, %c0_30, %c0_31] : memref<2x1x32xf32, #tpu.memory_space<vmem>>, vector<1x1x32xf32>
    %32 = vector.shape_cast %31 : vector<1x1x32xf32> to vector<1x32xf32>
    %cst_32 = arith.constant dense<0.000000e+00> : vector<2x32xf32>
    %33 = tpu.matmul %0, %18, %cst_32 {dimension_numbers = #tpu.dot_dimension_numbers<[1], [0], [0], [1], [0, 0, 1, 1], [], []>} : vector<2x32xf32>, vector<32x32xf32>, vector<2x32xf32> -> vector<2x32xf32>
    %34 = vector.broadcast %20 : vector<1x32xf32> to vector<2x32xf32>
    %35 = arith.addf %33, %34 : vector<2x32xf32>
    %36 = math.tanh %35 : vector<2x32xf32>
    %cst_33 = arith.constant dense<0.000000e+00> : vector<14x32xf32>
    %37 = tpu.matmul %1, %22, %cst_33 {dimension_numbers = #tpu.dot_dimension_numbers<[1], [0], [0], [1], [0, 0, 1, 1], [], []>} : vector<14x32xf32>, vector<32x32xf32>, vector<14x32xf32> -> vector<14x32xf32>
    %38 = math.tanh %37 : vector<14x32xf32>
    %cst_34 = arith.constant dense<0.000000e+00> : vector<2x1xf32>
    %39 = tpu.matmul %36, %24, %cst_34 {dimension_numbers = #tpu.dot_dimension_numbers<[1], [1], [0], [0], [0, 0, 1, 0], [], []>} : vector<2x32xf32>, vector<1x32xf32>, vector<2x1xf32> -> vector<2x1xf32>
    %cst_35 = arith.constant dense<0.000000e+00> : vector<1x14xf32>
    %40 = tpu.matmul %24, %38, %cst_35 {dimension_numbers = #tpu.dot_dimension_numbers<[1], [1], [0], [0], [0, 0, 1, 0], [], []>} : vector<1x32xf32>, vector<14x32xf32>, vector<1x14xf32> -> vector<1x14xf32>
    %41 = vector.broadcast %39 : vector<2x1xf32> to vector<2x14xf32>
    %42 = vector.broadcast %40 : vector<1x14xf32> to vector<2x14xf32>
    %43 = arith.addf %41, %42 : vector<2x14xf32>
    %44 = math.tanh %43 : vector<2x14xf32>
    %cst_36 = arith.constant 0.000000e+00 : f32
    %45 = vector.broadcast %cst_36 : f32 to vector<2x14xf32>
    %46 = arith.maximumf %44, %45 : vector<2x14xf32>
    %47 = arith.mulf %46, %16 : vector<2x14xf32>
    %cst_37 = arith.constant dense<0.000000e+00> : vector<14x32xf32>
    %48 = tpu.matmul %1, %26, %cst_37 {dimension_numbers = #tpu.dot_dimension_numbers<[1], [0], [0], [1], [0, 0, 1, 1], [], []>} : vector<14x32xf32>, vector<32x32xf32>, vector<14x32xf32> -> vector<14x32xf32>
    %49 = vector.broadcast %28 : vector<1x32xf32> to vector<14x32xf32>
    %50 = arith.addf %48, %49 : vector<14x32xf32>
    %cst_38 = arith.constant dense<0.000000e+00> : vector<2x32xf32>
    %51 = tpu.matmul %47, %50, %cst_38 {dimension_numbers = #tpu.dot_dimension_numbers<[1], [0], [0], [1], [0, 0, 1, 1], [], []>} : vector<2x14xf32>, vector<14x32xf32>, vector<2x32xf32> -> vector<2x32xf32>
    %52 = arith.addf %0, %51 : vector<2x32xf32>
    %cst_39 = arith.constant dense<0.000000e+00> : vector<2xf32>
    %53 = vector.multi_reduction <add>, %52, %cst_39 [1] : vector<2x32xf32> to vector<2xf32>
    %54 = vector.shape_cast %53 : vector<2xf32> to vector<2x1xf32>
    %cst_40 = arith.constant 3.200000e+01 : f32
    %55 = vector.broadcast %cst_40 : f32 to vector<2x1xf32>
    %56 = arith.divf %54, %55 : vector<2x1xf32>
    %57 = vector.broadcast %56 : vector<2x1xf32> to vector<2x32xf32>
    %58 = arith.subf %52, %57 : vector<2x32xf32>
    %59 = arith.mulf %58, %58 : vector<2x32xf32>
    %cst_41 = arith.constant dense<0.000000e+00> : vector<2xf32>
    %60 = vector.multi_reduction <add>, %59, %cst_41 [1] : vector<2x32xf32> to vector<2xf32>
    %61 = vector.shape_cast %60 : vector<2xf32> to vector<2x1xf32>
    %cst_42 = arith.constant 3.200000e+01 : f32
    %62 = vector.broadcast %cst_42 : f32 to vector<2x1xf32>
    %63 = arith.divf %61, %62 : vector<2x1xf32>
    %64 = vector.broadcast %56 : vector<2x1xf32> to vector<2x32xf32>
    %65 = arith.subf %52, %64 : vector<2x32xf32>
    %cst_43 = arith.constant 9.99999974E-6 : f32
    %66 = vector.broadcast %cst_43 : f32 to vector<2x1xf32>
    %67 = arith.addf %63, %66 : vector<2x1xf32>
    %68 = math.rsqrt %67 : vector<2x1xf32>
    %69 = vector.broadcast %68 : vector<2x1xf32> to vector<2x32xf32>
    %70 = arith.mulf %65, %69 : vector<2x32xf32>
    %71 = vector.broadcast %30 : vector<1x32xf32> to vector<2x32xf32>
    %72 = arith.mulf %70, %71 : vector<2x32xf32>
    %73 = vector.broadcast %32 : vector<1x32xf32> to vector<2x32xf32>
    %74 = arith.addf %72, %73 : vector<2x32xf32>
    %c1 = arith.constant 1 : index
    %c0_44 = arith.constant 0 : index
    %c0_45 = arith.constant 0 : index
    %75 = vector.load %arg4[%c1, %c0_44, %c0_45] : memref<2x32x32xf32, #tpu.memory_space<vmem>>, vector<1x32x32xf32>
    %76 = vector.shape_cast %75 : vector<1x32x32xf32> to vector<32x32xf32>
    %c1_46 = arith.constant 1 : index
    %c0_47 = arith.constant 0 : index
    %c0_48 = arith.constant 0 : index
    %77 = vector.load %arg5[%c1_46, %c0_47, %c0_48] : memref<2x1x32xf32, #tpu.memory_space<vmem>>, vector<1x1x32xf32>
    %78 = vector.shape_cast %77 : vector<1x1x32xf32> to vector<1x32xf32>
    %c1_49 = arith.constant 1 : index
    %c0_50 = arith.constant 0 : index
    %c0_51 = arith.constant 0 : index
    %79 = vector.load %arg6[%c1_49, %c0_50, %c0_51] : memref<2x32x32xf32, #tpu.memory_space<vmem>>, vector<1x32x32xf32>
    %80 = vector.shape_cast %79 : vector<1x32x32xf32> to vector<32x32xf32>
    %c1_52 = arith.constant 1 : index
    %c0_53 = arith.constant 0 : index
    %c0_54 = arith.constant 0 : index
    %81 = vector.load %arg7[%c1_52, %c0_53, %c0_54] : memref<2x1x32xf32, #tpu.memory_space<vmem>>, vector<1x1x32xf32>
    %82 = vector.shape_cast %81 : vector<1x1x32xf32> to vector<1x32xf32>
    %c1_55 = arith.constant 1 : index
    %c0_56 = arith.constant 0 : index
    %c0_57 = arith.constant 0 : index
    %83 = vector.load %arg8[%c1_55, %c0_56, %c0_57] : memref<2x32x32xf32, #tpu.memory_space<vmem>>, vector<1x32x32xf32>
    %84 = vector.shape_cast %83 : vector<1x32x32xf32> to vector<32x32xf32>
    %c1_58 = arith.constant 1 : index
    %c0_59 = arith.constant 0 : index
    %c0_60 = arith.constant 0 : index
    %85 = vector.load %arg9[%c1_58, %c0_59, %c0_60] : memref<2x1x32xf32, #tpu.memory_space<vmem>>, vector<1x1x32xf32>
    %86 = vector.shape_cast %85 : vector<1x1x32xf32> to vector<1x32xf32>
    %c1_61 = arith.constant 1 : index
    %c0_62 = arith.constant 0 : index
    %c0_63 = arith.constant 0 : index
    %87 = vector.load %arg10[%c1_61, %c0_62, %c0_63] : memref<2x1x32xf32, #tpu.memory_space<vmem>>, vector<1x1x32xf32>
    %88 = vector.shape_cast %87 : vector<1x1x32xf32> to vector<1x32xf32>
    %c1_64 = arith.constant 1 : index
    %c0_65 = arith.constant 0 : index
    %c0_66 = arith.constant 0 : index
    %89 = vector.load %arg11[%c1_64, %c0_65, %c0_66] : memref<2x1x32xf32, #tpu.memory_space<vmem>>, vector<1x1x32xf32>
    %90 = vector.shape_cast %89 : vector<1x1x32xf32> to vector<1x32xf32>
    %cst_67 = arith.constant dense<0.000000e+00> : vector<2x32xf32>
    %91 = tpu.matmul %74, %76, %cst_67 {dimension_numbers = #tpu.dot_dimension_numbers<[1], [0], [0], [1], [0, 0, 1, 1], [], []>} : vector<2x32xf32>, vector<32x32xf32>, vector<2x32xf32> -> vector<2x32xf32>
    %92 = vector.broadcast %78 : vector<1x32xf32> to vector<2x32xf32>
    %93 = arith.addf %91, %92 : vector<2x32xf32>
    %94 = math.tanh %93 : vector<2x32xf32>
    %cst_68 = arith.constant dense<0.000000e+00> : vector<14x32xf32>
    %95 = tpu.matmul %1, %80, %cst_68 {dimension_numbers = #tpu.dot_dimension_numbers<[1], [0], [0], [1], [0, 0, 1, 1], [], []>} : vector<14x32xf32>, vector<32x32xf32>, vector<14x32xf32> -> vector<14x32xf32>
    %96 = math.tanh %95 : vector<14x32xf32>
    %cst_69 = arith.constant dense<0.000000e+00> : vector<2x1xf32>
    %97 = tpu.matmul %94, %82, %cst_69 {dimension_numbers = #tpu.dot_dimension_numbers<[1], [1], [0], [0], [0, 0, 1, 0], [], []>} : vector<2x32xf32>, vector<1x32xf32>, vector<2x1xf32> -> vector<2x1xf32>
    %cst_70 = arith.constant dense<0.000000e+00> : vector<1x14xf32>
    %98 = tpu.matmul %82, %96, %cst_70 {dimension_numbers = #tpu.dot_dimension_numbers<[1], [1], [0], [0], [0, 0, 1, 0], [], []>} : vector<1x32xf32>, vector<14x32xf32>, vector<1x14xf32> -> vector<1x14xf32>
    %99 = vector.broadcast %97 : vector<2x1xf32> to vector<2x14xf32>
    %100 = vector.broadcast %98 : vector<1x14xf32> to vector<2x14xf32>
    %101 = arith.addf %99, %100 : vector<2x14xf32>
    %102 = math.tanh %101 : vector<2x14xf32>
    %cst_71 = arith.constant 0.000000e+00 : f32
    %103 = vector.broadcast %cst_71 : f32 to vector<2x14xf32>
    %104 = arith.maximumf %102, %103 : vector<2x14xf32>
    %105 = arith.mulf %104, %16 : vector<2x14xf32>
    %cst_72 = arith.constant dense<0.000000e+00> : vector<14x32xf32>
    %106 = tpu.matmul %1, %84, %cst_72 {dimension_numbers = #tpu.dot_dimension_numbers<[1], [0], [0], [1], [0, 0, 1, 1], [], []>} : vector<14x32xf32>, vector<32x32xf32>, vector<14x32xf32> -> vector<14x32xf32>
    %107 = vector.broadcast %86 : vector<1x32xf32> to vector<14x32xf32>
    %108 = arith.addf %106, %107 : vector<14x32xf32>
    %cst_73 = arith.constant dense<0.000000e+00> : vector<2x32xf32>
    %109 = tpu.matmul %105, %108, %cst_73 {dimension_numbers = #tpu.dot_dimension_numbers<[1], [0], [0], [1], [0, 0, 1, 1], [], []>} : vector<2x14xf32>, vector<14x32xf32>, vector<2x32xf32> -> vector<2x32xf32>
    %110 = arith.addf %74, %109 : vector<2x32xf32>
    %cst_74 = arith.constant dense<0.000000e+00> : vector<2xf32>
    %111 = vector.multi_reduction <add>, %110, %cst_74 [1] : vector<2x32xf32> to vector<2xf32>
    %112 = vector.shape_cast %111 : vector<2xf32> to vector<2x1xf32>
    %cst_75 = arith.constant 3.200000e+01 : f32
    %113 = vector.broadcast %cst_75 : f32 to vector<2x1xf32>
    %114 = arith.divf %112, %113 : vector<2x1xf32>
    %115 = vector.broadcast %114 : vector<2x1xf32> to vector<2x32xf32>
    %116 = arith.subf %110, %115 : vector<2x32xf32>
    %117 = arith.mulf %116, %116 : vector<2x32xf32>
    %cst_76 = arith.constant dense<0.000000e+00> : vector<2xf32>
    %118 = vector.multi_reduction <add>, %117, %cst_76 [1] : vector<2x32xf32> to vector<2xf32>
    %119 = vector.shape_cast %118 : vector<2xf32> to vector<2x1xf32>
    %cst_77 = arith.constant 3.200000e+01 : f32
    %120 = vector.broadcast %cst_77 : f32 to vector<2x1xf32>
    %121 = arith.divf %119, %120 : vector<2x1xf32>
    %122 = vector.broadcast %114 : vector<2x1xf32> to vector<2x32xf32>
    %123 = arith.subf %110, %122 : vector<2x32xf32>
    %cst_78 = arith.constant 9.99999974E-6 : f32
    %124 = vector.broadcast %cst_78 : f32 to vector<2x1xf32>
    %125 = arith.addf %121, %124 : vector<2x1xf32>
    %126 = math.rsqrt %125 : vector<2x1xf32>
    %127 = vector.broadcast %126 : vector<2x1xf32> to vector<2x32xf32>
    %128 = arith.mulf %123, %127 : vector<2x32xf32>
    %129 = vector.broadcast %88 : vector<1x32xf32> to vector<2x32xf32>
    %130 = arith.mulf %128, %129 : vector<2x32xf32>
    %131 = vector.broadcast %90 : vector<1x32xf32> to vector<2x32xf32>
    %132 = arith.addf %130, %131 : vector<2x32xf32>
    %c0_79 = arith.constant 0 : index
    %c0_80 = arith.constant 0 : index
    %133 = vector.load %arg12[%c0_79, %c0_80] : memref<2x32xf32, #tpu.memory_space<vmem>>, vector<2x32xf32>
    tpu.vector_store %arg12[%c0_79, %c0_80], %132 {strides = array<i32>} : memref<2x32xf32, #tpu.memory_space<vmem>>, vector<2x32xf32>,
    return
  }
  func.func @transform_0(%arg0: i32) -> (i32, i32) {
    %c0_i32 = arith.constant 0 : i32
    %c0_i32_0 = arith.constant 0 : i32
    return %arg0, %c0_i32 : i32, i32
  }
  func.func @transform_1(%arg0: i32) -> (i32, i32) {
    %c0_i32 = arith.constant 0 : i32
    %c0_i32_0 = arith.constant 0 : i32
    return %arg0, %c0_i32 : i32, i32
  }
  func.func @transform_2(%arg0: i32) -> (i32, i32, i32) {
    %c0_i32 = arith.constant 0 : i32
    %c0_i32_0 = arith.constant 0 : i32
    %c0_i32_1 = arith.constant 0 : i32
    return %arg0, %c0_i32, %c0_i32_0 : i32, i32, i32
  }
  func.func @transform_3(%arg0: i32) -> (i32, i32, i32) {
    %c0_i32 = arith.constant 0 : i32
    %c0_i32_0 = arith.constant 0 : i32
    %c0_i32_1 = arith.constant 0 : i32
    %c0_i32_2 = arith.constant 0 : i32
    return %c0_i32, %c0_i32_0, %c0_i32_1 : i32, i32, i32
  }
  func.func @transform_4(%arg0: i32) -> (i32, i32, i32) {
    %c0_i32 = arith.constant 0 : i32
    %c0_i32_0 = arith.constant 0 : i32
    %c0_i32_1 = arith.constant 0 : i32
    %c0_i32_2 = arith.constant 0 : i32
    return %c0_i32, %c0_i32_0, %c0_i32_1 : i32, i32, i32
  }
  func.func @transform_5(%arg0: i32) -> (i32, i32, i32) {
    %c0_i32 = arith.constant 0 : i32
    %c0_i32_0 = arith.constant 0 : i32
    %c0_i32_1 = arith.constant 0 : i32
    %c0_i32_2 = arith.constant 0 : i32
    return %c0_i32, %c0_i32_0, %c0_i32_1 : i32, i32, i32
  }
  func.func @transform_6(%arg0: i32) -> (i32, i32, i32) {
    %c0_i32 = arith.constant 0 : i32
    %c0_i32_0 = arith.constant 0 : i32
    %c0_i32_1 = arith.constant 0 : i32
    %c0_i32_2 = arith.constant 0 : i32
    return %c0_i32, %c0_i32_0, %c0_i32_1 : i32, i32, i32
  }
  func.func @transform_7(%arg0: i32) -> (i32, i32, i32) {
    %c0_i32 = arith.constant 0 : i32
    %c0_i32_0 = arith.constant 0 : i32
    %c0_i32_1 = arith.constant 0 : i32
    %c0_i32_2 = arith.constant 0 : i32
    return %c0_i32, %c0_i32_0, %c0_i32_1 : i32, i32, i32
  }
  func.func @transform_8(%arg0: i32) -> (i32, i32, i32) {
    %c0_i32 = arith.constant 0 : i32
    %c0_i32_0 = arith.constant 0 : i32
    %c0_i32_1 = arith.constant 0 : i32
    %c0_i32_2 = arith.constant 0 : i32
    return %c0_i32, %c0_i32_0, %c0_i32_1 : i32, i32, i32
  }
  func.func @transform_9(%arg0: i32) -> (i32, i32, i32) {
    %c0_i32 = arith.constant 0 : i32
    %c0_i32_0 = arith.constant 0 : i32
    %c0_i32_1 = arith.constant 0 : i32
    %c0_i32_2 = arith.constant 0 : i32
    return %c0_i32, %c0_i32_0, %c0_i32_1 : i32, i32, i32
  }
  func.func @transform_10(%arg0: i32) -> (i32, i32, i32) {
    %c0_i32 = arith.constant 0 : i32
    %c0_i32_0 = arith.constant 0 : i32
    %c0_i32_1 = arith.constant 0 : i32
    %c0_i32_2 = arith.constant 0 : i32
    return %c0_i32, %c0_i32_0, %c0_i32_1 : i32, i32, i32
  }
  func.func @transform_11(%arg0: i32) -> (i32, i32) {
    %c0_i32 = arith.constant 0 : i32
    %c0_i32_0 = arith.constant 0 : i32
    return %arg0, %c0_i32 : i32, i32
  }
}

</mosaic_0001>

<bundles_post_ra>
// kernel: _lambda_.3
= control target key start
LH: loop header
LB: loop body
LE: loop exit
PB: predicated region body
PF: predicated region fallthrough
CT: control target
= control target key end

     0   :  { %vm76_vm0 = vcmask 261120   ;;  %s823_s0 = inlined_call_operand.vmem [shape: f32[2,32], index: 0, kind: input, shape index: {}]   ;;  %s824_s1 = inlined_call_operand.vmem [shape: f32[14,32], index: 1, kind: input, shape index: {}]   ;;  %s825_s2 = inlined_call_operand.vmem [shape: f32[1,1,14], index: 2, kind: input, shape index: {}]   ;;  %s826_s3 = inlined_call_operand.vmem [shape: f32[2,32,32], index: 3, kind: input, shape index: {}]   ;;  %s827_s4 = inlined_call_operand.vmem [shape: f32[2,1,32], index: 4, kind: input, shape index: {}]   ;;  %s828_s5 = inlined_call_operand.vmem [shape: f32[2,32,32], index: 5, kind: input, shape index: {}]   ;;  %s829_s6 = inlined_call_operand.vmem [shape: f32[2,1,32], index: 6, kind: input, shape index: {}]   ;;  %s830_s7 = inlined_call_operand.vmem [shape: f32[2,32,32], index: 7, kind: input, shape index: {}]   ;;  %s831_s8 = inlined_call_operand.vmem [shape: f32[2,1,32], index: 8, kind: input, shape index: {}]   ;;  %s832_s9 = inlined_call_operand.vmem [shape: f32[2,1,32], index: 9, kind: input, shape index: {}]   ;;  %s833_s10 = inlined_call_operand.vmem [shape: f32[2,1,32], index: 10, kind: input, shape index: {}]   ;;  %s834_s11 = inlined_call_operand.hbm [shape: f32[2,32], index: 11, kind: output, shape index: {}]  }
   0x1   :  { %v64_v0 = vld [vmem:[%s828_s5 + $0x18] sm:$0xff]  ;;  %v63_v1 = vld [vmem:[%s828_s5 + $0x10] sm:$0xff]  ;;  %v62_v2 = vld [vmem:[%s828_s5 + $0x8] sm:$0xff] }
   0x2   :  { %119 = vmatpush.msra.mxu1 %v64_v0  ;;  %v61_v3 = vld [vmem:[%s828_s5] sm:$0xff]  ;;  %v59_v4 = vld [vmem:[%s826_s3 + $0x18] sm:$0xff]  ;;  %v58_v5 = vld [vmem:[%s826_s3 + $0x10] sm:$0xff] }
   0x3   :  { %v668_v6 = vld [vmem:[%s824_s1] sm:$0xff]  ;;  %92 = vmatpush.msra.mxu0 %v59_v4  ;;  %v57_v7 = vld [vmem:[%s826_s3 + $0x8] sm:$0xff] }
   0x4   :  { %120 = vmatpush.msra.mxu1 %v63_v1  ;;  %v56_v8 = vld [vmem:[%s826_s3] sm:$0xff] }
   0x5   :  { %93 = vmatpush.msra.mxu0 %v58_v5 }
   0x6   :  { %121 = vmatpush.msra.mxu1 %v62_v2 }
   0x7   :  { %16 = vsyncpa [#allocation3], 0  ;;  %94 = vmatpush.msra.mxu0 %v57_v7  ;;  %v679_v9 = vld [vmem:[%s823_s0] sm:$0x3]  ;;  %v688_v10 = vld [vmem:[%s824_s1 + $0x8] sm:$0x3f]  ;;  %v43_v32 = vlaneseq }
   0x8   :  { %122 = vmatpush.msra.mxu1 %v61_v3  ;;  %v69_v11 = vld [vmem:[%s830_s7 + $0x18] sm:$0xff]  ;;  %v68_v12 = vld [vmem:[%s830_s7 + $0x10] sm:$0xff]  ;;  %v67_v13 = vld [vmem:[%s830_s7 + $0x8] sm:$0xff]  ;;  %vm136_vm1 = vcmask 254976   ;;  %vm203_vm2 = vcmask 1045504   ;;  %vm199_vm5 = vcmask 113664  }
   0x9   :  { %483 = vmatmul.msk.f32.vlgmr.msra.gmra.mxu1 %vm76_vm0, %v668_v6  ;;  %95 = vmatpush.msra.mxu0 %v56_v8  ;;  %v66_v14 = vld [vmem:[%s830_s7] sm:$0xff]  ;;  %v46_v33 = vand.u32 127, %v43_v32  ;;  %v44_v44 = vshrl.u32 %v43_v32, 7  ;;  %v585_v54 = vmov 32.0   ;;  %v500_v55 = vld [vmem:[%s828_s5 + $0x38] sm:$0xff]  ;;  %v499_v56 = vld [vmem:[%s828_s5 + $0x30] sm:$0xff] }
   0xa   :  { %482 = vmatmul.msk.f32.vlgmr.msra.gmra.mxu0 %vm76_vm0, %v679_v9  ;;  %188 = vmatpush.msra.mxu3 %v69_v11  ;;  %v527_v15 = vld [vmem:[%s827_s4] ss:$0 sm:$0xff]  ;;  %v498_v57 = vld [vmem:[%s828_s5 + $0x28] sm:$0xff]  ;;  %v495_v7 = vld [vmem:[%s826_s3 + $0x38] sm:$0xff]  ;;  %s586_s25 = smov [#allocation2]   ;;  %s473_s29 = sshll.u32 %s834_s11, 4  ;;  %s474_s29 = int_to_ptr.hbm [resolvable:$true] %s473_s29 }
   0xb   :  { %v526_v20 = vld [vmem:[%s829_s6] ss:$0 sm:$0xff]  ;;  %v47_v34 = vcvt.s32.f32 %v46_v33  ;;  %v494_v8 = vld [vmem:[%s826_s3 + $0x30] sm:$0xff]  ;;  %s471_s26 = sshll.u32 %s586_s25, 4  ;;  %s472_s26 = int_to_ptr.vmem [resolvable:$true] %s471_s26 }
   0xc   :  { %189 = vmatpush.msra.mxu3 %v68_v12  ;;  %v65_v26 = vld [vmem:[%s829_s6] sm:$0x1] }
   0xd   :  { %v528_v28 = vld [vmem:[%s831_s8] ss:$0 sm:$0xff]  ;;  %v48_v35 = vmul.f32 0.14285715, %v47_v34 }
   0xe   :  { %190 = vmatpush.msra.mxu3 %v67_v13  ;;  %v529_v46 = vld [vmem:[%s825_s2] ss:$0 sm:$0xff]  ;;  %v505_v13 = vld [vmem:[%s830_s7 + $0x38] sm:$0xff] }
   0xf   :  { %v49_v36 = vadd.f32 0.0001, %v48_v35  ;;  %v497_v59 = vld [vmem:[%s828_s5 + $0x20] sm:$0xff] }
  0x10   :  { %191 = vmatpush.msra.mxu3 %v66_v14  ;;  %v492_v11 = vld [vmem:[%s826_s3 + $0x20] sm:$0xff]  ;;  %v504_v14 = vld [vmem:[%s830_s7 + $0x30] sm:$0xff] }
  0x11   :  { %484 = vmatmul.msk.f32.gmra.mxu1 %vm76_vm0, %v688_v10  ;;  %488 = vmatmul.msk.f32.vlgmr.msra.gmra.mxu3 %vm76_vm0, %v668_v6  ;;  %v520_v37 = vceil.f32 %v49_v36  ;;  %v521_v38 = vfloor.f32 %v49_v36  ;;  %vm519_vm3 = vcmp.lt.s32.totalorder %v49_v36, 0  ;;  %v531_v32 = vld [vmem:[%s833_s10] ss:$0 sm:$0xff]  ;;  %v501_v35 = vld [vmem:[%s829_s6 + $0x1] sm:$0x1] }
  0x12   :  { %v532_v36 = vld [vmem:[%s827_s4 + $0x1] ss:$0 sm:$0xff] }
  0x13   :  { %v522_v42 = vsel %vm519_vm3, %v520_v37, %v521_v38 }
  0x14   :  { %v523_v45 = vcvt.f32.s32 %v522_v42  ;;  %v534_v42 = vld [vmem:[%s831_s8 + $0x1] ss:$0 sm:$0xff] }
  0x16   :  { %vm51_vm4 = vcmp.eq.s32.totalorder %v44_v44, %v523_v45 }
  0x17   :  { %v728_v48 = vsel %vm51_vm4, %v529_v46, 0.0 }
  0x19   :  { %489 = vmatmul.msk.f32.gmra.mxu3 %vm76_vm0, %v688_v10 }
  0x86   :  { %v124_v16 = vpop.f32.mrf.mxu1 }
  0x87   :  { %v97_v17 = vpop.f32.mrf.mxu0 }
  0x88   :  { %v98_v18 = vadd.f32 %v527_v15, %v97_v17  ;;  %v503_v15 = vld [vmem:[%s830_s7 + $0x28] sm:$0xff] }
  0x8a   :  { %537 = vtanh.f32 %v98_v18  ;;  %v502_v18 = vld [vmem:[%s830_s7 + $0x20] sm:$0xff] }
  0x8e   :  { %v127_v19 = vpop.f32.mrf.mxu1 }
  0x8f   :  { %539 = vtanh.f32 %v127_v19 }
  0x90   :  { %v538_v21 = vpop.eup %537  ;;  %541 = vtanh.f32 %v124_v16 }
  0x91   :  { %v135_v22 = vmul.f32 %v538_v21, %v526_v20 }
  0x93   :  { %v137_v23 = vsel %vm136_vm1, %v135_v22, 0.0 }
  0x94   :  { %138 = vadd.xlane.f32.xlu0 %v137_v23  ;;  %v193_v27 = vpop.f32.mrf.mxu3 }
  0x95   :  { %v540_v24 = vpop.eup %539  ;;  %v194_v30 = vadd.f32 %v528_v28, %v193_v27 }
  0x96   :  { %485 = vmatpush.xpose.msk.msra.mxu2 %vm76_vm0, %v540_v24  ;;  %v542_v25 = vpop.eup %541 }
  0x9a   :  { %486 = vmatpush.xpose.msk.msra.mxu2 %vm76_vm0, %v542_v25 }
  0x9c   :  { %v196_v29 = vpop.f32.mrf.mxu3 }
  0x9d   :  { %487 = vmatmul.msk.f32.vlgmr.msra.gmra.mxu2 %vm76_vm0, %v65_v26  ;;  %v197_v31 = vadd.f32 %v528_v28, %v196_v29  ;;  %v530_v29 = vld [vmem:[%s832_s9] ss:$0 sm:$0xff] }
  0x9e   :  { %308 = vmatpush.msrb.mxu2 %v495_v7 }
  0x9f   :  { %490 = vmatpush.msk.msrb.mxu0 %vm203_vm2, %v197_v31 }
  0xa0   :  { %309 = vmatpush.msrb.mxu2 %v494_v8  ;;  %v535_v8 = vld [vmem:[%s832_s9 + $0x1] ss:$0 sm:$0xff] }
  0xa1   :  { %222 = vmatpush.msrb.mxu0 %v194_v30 }
  0xa3   :  { %329 = vmatpush.msra.mxu0 %v500_v55 }
  0xa5   :  { %330 = vmatpush.msra.mxu0 %v499_v56 }
  0xa7   :  { %331 = vmatpush.msra.mxu0 %v498_v57 }
  0xa9   :  { %332 = vmatpush.msra.mxu0 %v497_v59 }
 0x107   :  { %v139_v40 = vpop.xlane.xlu0 %138 }
 0x120   :  { %v165_v39 = vpop.f32.mrf.mxu2 }
 0x121   :  { %v168_v41 = vperm.slane %v165_v39, 0 }
 0x123   :  { %v169_v43 = vadd.f32 %v168_v41, %v139_v40 }
 0x125   :  { %543 = vtanh.f32 %v169_v43 }
 0x126   :  { %545 = vrcp.f32 %v585_v54 }
 0x12b   :  { %v544_v47 = vpop.eup %543 }
 0x12c   :  { %v171_v49 = vmax.f32 %v544_v47, 0.0  ;;  %v546_v58 = vpop.eup %545 }
 0x12d   :  { %v232_v60 = vmul.f32 32.0, %v546_v58  ;;  %vm236_vm6 = vweird.f32 %v546_v58 }
 0x12e   :  { %v172_v50 = vmul.f32 %v171_v49, %v728_v48 }
 0x12f   :  { %v233_v61 = vsub.f32 1.0, %v232_v60 }
 0x130   :  { %491 = vmatmul.msk.f32.vlgmr.msrb.gmra.mxu0 %vm199_vm5, %v172_v50 }
 0x131   :  { %v234_v62 = vmul.f32 %v546_v58, %v233_v61 }
 0x133   :  { %v235_v63 = vadd.f32 %v546_v58, %v234_v62 }
 0x135   :  { %v750_v0 = vsel %vm236_vm6, %v546_v58, %v235_v63 }
 0x138   :  { %510 = vmatmul.msk.f32.vlgmr.msra.gmra.mxu0 %vm76_vm0, %v668_v6 }
 0x140   :  { %511 = vmatmul.msk.f32.gmra.mxu0 %vm76_vm0, %v688_v10 }
 0x1ad   :  { %v224_v51 = vpop.f32.mrf.mxu0 }
 0x1ae   :  { %v227_v52 = vadd.f32 %v224_v51, %v679_v9  ;;  %v493_v9 = vld [vmem:[%s826_s3 + $0x28] sm:$0xff] }
 0x1af   :  { %310 = vmatpush.msrb.mxu2 %v493_v9 }
 0x1b0   :  { %v228_v53 = vsel %vm136_vm1, %v227_v52, 0.0 }
 0x1b1   :  { %229 = vadd.xlane.f32.xlu0 %v228_v53  ;;  %311 = vmatpush.msrb.mxu2 %v492_v11 }
 0x1b3   :  { %397 = vmatpush.msra.mxu2 %v505_v13 }
 0x1b5   :  { %v334_v12 = vpop.f32.mrf.mxu0  ;;  %398 = vmatpush.msra.mxu2 %v504_v14 }
 0x1b7   :  { %399 = vmatpush.msra.mxu2 %v503_v15 }
 0x1b9   :  { %400 = vmatpush.msra.mxu2 %v502_v18 }
 0x1bd   :  { %v337_v20 = vpop.f32.mrf.mxu0 }
 0x224   :  { %v230_v1 = vpop.xlane.xlu0 %229 }
 0x225   :  { %v238_v2 = vmul.f32 %v750_v0, %v230_v1 }
 0x227   :  { %v239_v3 = vsub.f32 %v227_v52, %v238_v2 }
 0x229   :  { %v240_v4 = vmul.f32 %v239_v3, %v239_v3 }
 0x22b   :  { %v241_v5 = vsel %vm136_vm1, %v240_v4, 0.0 }
 0x22c   :  { %242 = vadd.xlane.f32.xlu1 %v241_v5 }
 0x29f   :  { %v243_v16 = vpop.xlane.xlu1 %242 }
 0x2a0   :  { %v244_v17 = vmul.f32 %v243_v16, %v750_v0 }
 0x2a2   :  { %v245_v19 = vadd.f32 1e-05, %v244_v17 }
 0x2a4   :  { %547 = vrsqrt.f32 %v245_v19  ;;  %vm252_vm8 = vweird.f32 %v245_v19 }
 0x2a5   :  { %549 = vtanh.f32 %v337_v20 }
 0x2a6   :  { %551 = vtanh.f32 %v334_v12 }
 0x2aa   :  { %v548_v21 = vpop.eup %547 }
 0x2ab   :  { %v550_v22 = vpop.eup %549  ;;  %v247_v23 = vmul.f32 %v548_v21, %v245_v19  ;;  %vm253_vm7 = vweird.f32 %v548_v21 }
 0x2ac   :  { %512 = vmatpush.xpose.msk.msrb.mxu1 %vm76_vm0, %v550_v22  ;;  %v552_v24 = vpop.eup %551  ;;  %vm254_vm9 = vmor %vm252_vm8, %vm253_vm7 }
 0x2ad   :  { %v248_v25 = vmul.f32 %v548_v21, %v247_v23 }
 0x2af   :  { %v249_v26 = vmul.f32 0.5, %v248_v25 }
 0x2b0   :  { %513 = vmatpush.xpose.msk.msrb.mxu1 %vm76_vm0, %v552_v24 }
 0x2b1   :  { %v250_v27 = vsub.f32 1.5, %v249_v26 }
 0x2b3   :  { %v251_v28 = vmul.f32 %v548_v21, %v250_v27  ;;  %514 = vmatmul.msk.f32.vlgmr.msrb.gmra.mxu1 %vm76_vm0, %v501_v35 }
 0x2b5   :  { %v255_v30 = vsel %vm254_vm9, %v548_v21, %v251_v28 }
 0x2b6   :  { %v256_v31 = vmul.f32 %v255_v30, %v239_v3 }
 0x2b8   :  { %v260_v33 = vmul.f32 %v530_v29, %v256_v31 }
 0x2ba   :  { %v264_v34 = vadd.f32 %v531_v32, %v260_v33 }
 0x2bc   :  { %509 = vmatmul.msk.f32.vlgmr.msrb.gmra.mxu2 %vm76_vm0, %v264_v34 }
 0x2c4   :  { %515 = vmatmul.msk.f32.vlgmr.msra.gmra.mxu2 %vm76_vm0, %v668_v6  ;;  %v533_v6 = vld [vmem:[%s829_s6 + $0x1] ss:$0 sm:$0xff] }
 0x2cc   :  { %516 = vmatmul.msk.f32.gmra.mxu2 %vm76_vm0, %v688_v10 }
 0x330   :  { %v374_v46 = vpop.f32.mrf.mxu1 }
 0x331   :  { %v377_v47 = vperm.slane %v374_v46, 0 }
 0x33f   :  { %v313_v37 = vpop.f32.mrf.mxu2 }
 0x340   :  { %v314_v38 = vadd.f32 %v532_v36, %v313_v37 }
 0x342   :  { %553 = vtanh.f32 %v314_v38 }
 0x347   :  { %v402_v39 = vpop.f32.mrf.mxu2 }
 0x348   :  { %v554_v40 = vpop.eup %553  ;;  %v403_v44 = vadd.f32 %v534_v42, %v402_v39 }
 0x349   :  { %v345_v10 = vmul.f32 %v554_v40, %v533_v6 }
 0x34b   :  { %v346_v41 = vsel %vm136_vm1, %v345_v10, 0.0 }
 0x34c   :  { %347 = vadd.xlane.f32.xlu1 %v346_v41 }
 0x34f   :  { %v405_v43 = vpop.f32.mrf.mxu2 }
 0x350   :  { %v406_v45 = vadd.f32 %v534_v42, %v405_v43 }
 0x352   :  { %517 = vmatpush.msk.msrb.mxu3 %vm203_vm2, %v406_v45 }
 0x354   :  { %429 = vmatpush.msrb.mxu3 %v403_v44 }
 0x3bf   :  { %v348_v49 = vpop.xlane.xlu1 %347 }
 0x3c0   :  { %v378_v50 = vadd.f32 %v377_v47, %v348_v49 }
 0x3c2   :  { %555 = vtanh.f32 %v378_v50 }
 0x3c8   :  { %v556_v51 = vpop.eup %555 }
 0x3c9   :  { %v380_v52 = vmax.f32 %v556_v51, 0.0 }
 0x3cb   :  { %v381_v53 = vmul.f32 %v380_v52, %v728_v48 }
 0x3cd   :  { %518 = vmatmul.msk.f32.vlgmr.msrb.gmra.mxu3 %vm199_vm5, %v381_v53 }
 0x450   :  { %v431_v54 = vpop.f32.mrf.mxu3 }
 0x451   :  { %v434_v55 = vadd.f32 %v431_v54, %v264_v34 }
 0x453   :  { %v435_v56 = vsel %vm136_vm1, %v434_v55, 0.0 }
 0x454   :  { %436 = vadd.xlane.f32.xlu2 %v435_v56 }
 0x4c7   :  { %v437_v57 = vpop.xlane.xlu2 %436 }
 0x4c8   :  { %v438_v58 = vmul.f32 %v437_v57, %v750_v0 }
 0x4ca   :  { %v439_v59 = vsub.f32 %v434_v55, %v438_v58 }
 0x4cc   :  { %v440_v60 = vmul.f32 %v439_v59, %v439_v59 }
 0x4ce   :  { %v441_v61 = vsel %vm136_vm1, %v440_v60, 0.0 }
 0x4cf   :  { %442 = vadd.xlane.f32.xlu2 %v441_v61 }
 0x542   :  { %v443_v62 = vpop.xlane.xlu2 %442 }
 0x543   :  { %v444_v63 = vmul.f32 %v443_v62, %v750_v0  ;;  %v536_v0 = vld [vmem:[%s833_s10 + $0x1] ss:$0 sm:$0xff] }
 0x545   :  { %v445_v1 = vadd.f32 1e-05, %v444_v63 }
 0x547   :  { %557 = vrsqrt.f32 %v445_v1  ;;  %vm452_vm11 = vweird.f32 %v445_v1 }
 0x54d   :  { %v558_v48 = vpop.eup %557 }
 0x54e   :  { %v447_v2 = vmul.f32 %v558_v48, %v445_v1  ;;  %vm453_vm10 = vweird.f32 %v558_v48 }
 0x54f   :  { %vm454_vm12 = vmor %vm452_vm11, %vm453_vm10 }
 0x550   :  { %v448_v3 = vmul.f32 %v558_v48, %v447_v2 }
 0x552   :  { %v449_v4 = vmul.f32 0.5, %v448_v3 }
 0x554   :  { %v450_v5 = vsub.f32 1.5, %v449_v4 }
 0x556   :  { %v451_v7 = vmul.f32 %v558_v48, %v450_v5 }
 0x558   :  { %v455_v9 = vsel %vm454_vm12, %v558_v48, %v451_v7 }
 0x559   :  { %v456_v11 = vmul.f32 %v455_v9, %v439_v59 }
 0x55b   :  { %v460_v12 = vmul.f32 %v535_v8, %v456_v11 }
 0x55d   :  { %v464_v13 = vadd.f32 %v536_v0, %v460_v12 }
 0x55f   :  { %465 = vst.msk [vmem:[#allocation2] sm:$0x3] %vm136_vm1, %v464_v13 }
 0x560   :  { %476 = dma.vmem_to_hbm [thread:$0]  %s472_s26, 32, %s474_s29, [#allocation3]  }
 0x561   :  { %583 = dma.done.wait [#allocation3], 32  }
 0x562   :  { %584 = vsyncadd [#allocation3], 4294967264 }
 0x563   :  { %481 = vsyncpa [#allocation3], 1 }

// kernel: _lambda_.2
= control target key start
LH: loop header
LB: loop body
LE: loop exit
PB: predicated region body
PF: predicated region fallthrough
CT: control target
= control target key end

     0   :  { %vm197_vm0 = vcmask 261120   ;;  %s4919_s5 = inlined_call_operand.vmem [shape: f32[2,32,32], index: 5, kind: input, shape index: {}]   ;;  %s4920_s7 = inlined_call_operand.vmem [shape: f32[2,32,32], index: 7, kind: input, shape index: {}]   ;;  %s4921_s0 = inlined_call_operand.vmem [shape: f32[128,32], index: 0, kind: input, shape index: {}]   ;;  %s4922_s3 = inlined_call_operand.vmem [shape: f32[2,32,32], index: 3, kind: input, shape index: {}]   ;;  %s4923_s4 = inlined_call_operand.vmem [shape: f32[2,1,32], index: 4, kind: input, shape index: {}]   ;;  %s4924_s8 = inlined_call_operand.vmem [shape: f32[2,1,32], index: 8, kind: input, shape index: {}]   ;;  %s4925_s6 = inlined_call_operand.vmem [shape: f32[2,1,32], index: 6, kind: input, shape index: {}]   ;;  %s4926_s1 = inlined_call_operand.vmem [shape: f32[1,1,128], index: 1, kind: input, shape index: {}]   ;;  %s4927_s9 = inlined_call_operand.vmem [shape: f32[2,1,32], index: 9, kind: input, shape index: {}]   ;;  %s4928_s10 = inlined_call_operand.vmem [shape: f32[2,1,32], index: 10, kind: input, shape index: {}]   ;;  %s4929_s2 = inlined_call_operand.vmem [shape: f32[128,1], index: 2, kind: input, shape index: {}]   ;;  %s4930_s11 = inlined_call_operand.vmem [shape: f32[16,32], index: 11, kind: output, shape index: {}]  }
   0x1   :  { %v185_v0 = vld [vmem:[%s4919_s5 + $0x18] sm:$0xff]  ;;  %v184_v1 = vld [vmem:[%s4919_s5 + $0x10] sm:$0xff]  ;;  %v183_v3 = vld [vmem:[%s4919_s5 + $0x8] sm:$0xff] }
   0x2   :  { %339 = vmatpush.msra.mxu1 %v185_v0  ;;  %v190_v2 = vld [vmem:[%s4920_s7 + $0x18] sm:$0xff]  ;;  %v189_v4 = vld [vmem:[%s4920_s7 + $0x10] sm:$0xff]  ;;  %v188_v5 = vld [vmem:[%s4920_s7 + $0x8] sm:$0xff] }
   0x3   :  { %625 = vmatpush.msra.mxu3 %v190_v2  ;;  %v182_v6 = vld [vmem:[%s4919_s5] sm:$0xff]  ;;  %v39_v9 = vld [vmem:[%s4921_s0 + $0x8] sm:$0xff]  ;;  %v40_v10 = vld [vmem:[%s4921_s0 + $0x10] sm:$0xff] }
   0x4   :  { %340 = vmatpush.msra.mxu1 %v184_v1  ;;  %v38_v7 = vld [vmem:[%s4921_s0] sm:$0xff]  ;;  %v41_v11 = vld [vmem:[%s4921_s0 + $0x18] sm:$0xff]  ;;  %v179_v14 = vld [vmem:[%s4922_s3 + $0x10] sm:$0xff] }
   0x5   :  { %626 = vmatpush.msra.mxu3 %v189_v4  ;;  %v187_v8 = vld [vmem:[%s4920_s7] sm:$0xff]  ;;  %v180_v12 = vld [vmem:[%s4922_s3 + $0x18] sm:$0xff]  ;;  %v178_v15 = vld [vmem:[%s4922_s3 + $0x8] sm:$0xff] }
   0x6   :  { %341 = vmatpush.msra.mxu1 %v183_v3  ;;  %258 = vmatpush.msra.mxu0 %v180_v12  ;;  %v42_v13 = vld [vmem:[%s4921_s0 + $0x20] sm:$0xff]  ;;  %v43_v17 = vld [vmem:[%s4921_s0 + $0x28] sm:$0xff]  ;;  %v44_v18 = vld [vmem:[%s4921_s0 + $0x30] sm:$0xff] }
   0x7   :  { %627 = vmatpush.msra.mxu3 %v188_v5  ;;  %v177_v16 = vld [vmem:[%s4922_s3] sm:$0xff]  ;;  %v45_v19 = vld [vmem:[%s4921_s0 + $0x38] sm:$0xff]  ;;  %v47_v21 = vld [vmem:[%s4921_s0 + $0x48] sm:$0xff] }
   0x8   :  { %342 = vmatpush.msra.mxu1 %v182_v6  ;;  %259 = vmatpush.msra.mxu0 %v179_v14  ;;  %v46_v20 = vld [vmem:[%s4921_s0 + $0x40] sm:$0xff]  ;;  %v48_v22 = vld [vmem:[%s4921_s0 + $0x50] sm:$0xff]  ;;  %v49_v23 = vld [vmem:[%s4921_s0 + $0x58] sm:$0xff] }
   0x9   :  { %2661 = vmatmul.msk.f32.vlgmr.msra.gmra.mxu1 %vm197_vm0, %v38_v7  ;;  %628 = vmatpush.msra.mxu3 %v187_v8  ;;  %v50_v24 = vld [vmem:[%s4921_s0 + $0x60] sm:$0xff]  ;;  %v51_v25 = vld [vmem:[%s4921_s0 + $0x68] sm:$0xff]  ;;  %v52_v26 = vld [vmem:[%s4921_s0 + $0x70] sm:$0xff] }
   0xa   :  { %2694 = vmatmul.msk.f32.vlgmr.msra.gmra.mxu3 %vm197_vm0, %v38_v7  ;;  %260 = vmatpush.msra.mxu0 %v178_v15  ;;  %v53_v27 = vld [vmem:[%s4921_s0 + $0x78] sm:$0xff]  ;;  %v3446_v1 = vld [vmem:[%s4923_s4] ss:$0 sm:$0xff] }
   0xb   :  { %v3464_v14 = vld [vmem:[%s4925_s6] ss:$0 sm:$0xff] }
   0xc   :  { %261 = vmatpush.msra.mxu0 %v177_v16 }
   0xd   :  { %2645 = vmatmul.msk.f32.vlgmr.msra.gmra.mxu0 %vm197_vm0, %v38_v7 }
  0x11   :  { %2662 = vmatmul.msk.f32.gmra.mxu1 %vm197_vm0, %v39_v9 }
  0x12   :  { %2695 = vmatmul.msk.f32.gmra.mxu3 %vm197_vm0, %v39_v9 }
  0x15   :  { %2646 = vmatmul.msk.f32.gmra.mxu0 %vm197_vm0, %v39_v9 }
  0x19   :  { %2663 = vmatmul.msk.f32.gmra.mxu1 %vm197_vm0, %v40_v10 }
  0x1a   :  { %2696 = vmatmul.msk.f32.gmra.mxu3 %vm197_vm0, %v40_v10 }
  0x1d   :  { %2647 = vmatmul.msk.f32.gmra.mxu0 %vm197_vm0, %v40_v10 }
  0x21   :  { %2664 = vmatmul.msk.f32.gmra.mxu1 %vm197_vm0, %v41_v11 }
  0x22   :  { %2697 = vmatmul.msk.f32.gmra.mxu3 %vm197_vm0, %v41_v11 }
  0x25   :  { %2648 = vmatmul.msk.f32.gmra.mxu0 %vm197_vm0, %v41_v11  ;;  %v3457_v11 = vld [vmem:[%s4924_s8] ss:$0 sm:$0xff] }
  0x29   :  { %2665 = vmatmul.msk.f32.gmra.mxu1 %vm197_vm0, %v42_v13 }
  0x2a   :  { %2698 = vmatmul.msk.f32.gmra.mxu3 %vm197_vm0, %v42_v13 }
  0x2d   :  { %2649 = vmatmul.msk.f32.gmra.mxu0 %vm197_vm0, %v42_v13 }
  0x31   :  { %2666 = vmatmul.msk.f32.gmra.mxu1 %vm197_vm0, %v43_v17 }
  0x32   :  { %2699 = vmatmul.msk.f32.gmra.mxu3 %vm197_vm0, %v43_v17 }
  0x35   :  { %2650 = vmatmul.msk.f32.gmra.mxu0 %vm197_vm0, %v43_v17 }
  0x39   :  { %2667 = vmatmul.msk.f32.gmra.mxu1 %vm197_vm0, %v44_v18 }
  0x3a   :  { %2700 = vmatmul.msk.f32.gmra.mxu3 %vm197_vm0, %v44_v18 }
  0x3d   :  { %2651 = vmatmul.msk.f32.gmra.mxu0 %vm197_vm0, %v44_v18 }
  0x41   :  { %2668 = vmatmul.msk.f32.gmra.mxu1 %vm197_vm0, %v45_v19 }
  0x42   :  { %2701 = vmatmul.msk.f32.gmra.mxu3 %vm197_vm0, %v45_v19 }
  0x45   :  { %2652 = vmatmul.msk.f32.gmra.mxu0 %vm197_vm0, %v45_v19 }
  0x49   :  { %2669 = vmatmul.msk.f32.gmra.mxu1 %vm197_vm0, %v46_v20 }
  0x4a   :  { %2702 = vmatmul.msk.f32.gmra.mxu3 %vm197_vm0, %v46_v20 }
  0x4d   :  { %2653 = vmatmul.msk.f32.gmra.mxu0 %vm197_vm0, %v46_v20 }
  0x51   :  { %2670 = vmatmul.msk.f32.gmra.mxu1 %vm197_vm0, %v47_v21 }
  0x52   :  { %2703 = vmatmul.msk.f32.gmra.mxu3 %vm197_vm0, %v47_v21 }
  0x55   :  { %2654 = vmatmul.msk.f32.gmra.mxu0 %vm197_vm0, %v47_v21 }
  0x59   :  { %2671 = vmatmul.msk.f32.gmra.mxu1 %vm197_vm0, %v48_v22 }
  0x5a   :  { %2704 = vmatmul.msk.f32.gmra.mxu3 %vm197_vm0, %v48_v22 }
  0x5d   :  { %2655 = vmatmul.msk.f32.gmra.mxu0 %vm197_vm0, %v48_v22 }
  0x61   :  { %2672 = vmatmul.msk.f32.gmra.mxu1 %vm197_vm0, %v49_v23 }
  0x62   :  { %2705 = vmatmul.msk.f32.gmra.mxu3 %vm197_vm0, %v49_v23 }
  0x65   :  { %2656 = vmatmul.msk.f32.gmra.mxu0 %vm197_vm0, %v49_v23 }
  0x69   :  { %2673 = vmatmul.msk.f32.gmra.mxu1 %vm197_vm0, %v50_v24 }
  0x6a   :  { %2706 = vmatmul.msk.f32.gmra.mxu3 %vm197_vm0, %v50_v24 }
  0x6d   :  { %2657 = vmatmul.msk.f32.gmra.mxu0 %vm197_vm0, %v50_v24 }
  0x71   :  { %2674 = vmatmul.msk.f32.gmra.mxu1 %vm197_vm0, %v51_v25 }
  0x72   :  { %2707 = vmatmul.msk.f32.gmra.mxu3 %vm197_vm0, %v51_v25 }
  0x75   :  { %2658 = vmatmul.msk.f32.gmra.mxu0 %vm197_vm0, %v51_v25 }
  0x79   :  { %2675 = vmatmul.msk.f32.gmra.mxu1 %vm197_vm0, %v52_v26 }
  0x7a   :  { %2708 = vmatmul.msk.f32.gmra.mxu3 %vm197_vm0, %v52_v26 }
  0x7d   :  { %2659 = vmatmul.msk.f32.gmra.mxu0 %vm197_vm0, %v52_v26 }
  0x81   :  { %2676 = vmatmul.msk.f32.gmra.mxu1 %vm197_vm0, %v53_v27 }
  0x82   :  { %2709 = vmatmul.msk.f32.gmra.mxu3 %vm197_vm0, %v53_v27 }
  0x85   :  { %2660 = vmatmul.msk.f32.gmra.mxu0 %vm197_vm0, %v53_v27 }
  0x86   :  { %v3388_v28 = vpop.f32.mrf.mxu1 }
  0x8a   :  { %v263_v37 = vpop.f32.mrf.mxu0 }
  0x8b   :  { %v264_v4 = vadd.f32 %v3446_v1, %v263_v37 }
  0x8d   :  { %v3391_v29 = vpop.f32.mrf.mxu3  ;;  %2925 = vtanh.f32 %v264_v4 }
  0x8e   :  { %v3393_v30 = vpop.f32.mrf.mxu1 }
  0x92   :  { %v266_v40 = vpop.f32.mrf.mxu0 }
  0x93   :  { %v267_v7 = vadd.f32 %v3446_v1, %v266_v40  ;;  %v2926_v12 = vpop.eup %2925 }
  0x94   :  { %v411_v20 = vmul.f32 %v2926_v12, %v3464_v14 }
  0x95   :  { %v3396_v31 = vpop.f32.mrf.mxu3 }
  0x96   :  { %v3398_v32 = vpop.f32.mrf.mxu1  ;;  %v427_v24 = vsel %vm197_vm0, %v411_v20, 0.0 }
  0x97   :  { %428 = vadd.xlane.f32.xlu0 %v427_v24 }
  0x9a   :  { %v269_v43 = vpop.f32.mrf.mxu0 }
  0x9b   :  { %v270_v9 = vadd.f32 %v3446_v1, %v269_v43 }
  0x9d   :  { %v3401_v33 = vpop.f32.mrf.mxu3 }
  0x9e   :  { %v3403_v34 = vpop.f32.mrf.mxu1 }
  0xa2   :  { %v272_v46 = vpop.f32.mrf.mxu0 }
  0xa3   :  { %v273_v17 = vadd.f32 %v3446_v1, %v272_v46 }
  0xa5   :  { %v3406_v35 = vpop.f32.mrf.mxu3 }
  0xa6   :  { %v3408_v36 = vpop.f32.mrf.mxu1 }
  0xaa   :  { %v275_v49 = vpop.f32.mrf.mxu0 }
  0xab   :  { %v276_v10 = vadd.f32 %v3446_v1, %v275_v49 }
  0xad   :  { %v3411_v38 = vpop.f32.mrf.mxu3 }
  0xae   :  { %v3413_v39 = vpop.f32.mrf.mxu1 }
  0xb2   :  { %v278_v52 = vpop.f32.mrf.mxu0 }
  0xb3   :  { %v279_v22 = vadd.f32 %v3446_v1, %v278_v52 }
  0xb5   :  { %v3415_v41 = vpop.f32.mrf.mxu3 }
  0xb6   :  { %v3417_v42 = vpop.f32.mrf.mxu1 }
  0xba   :  { %v281_v55 = vpop.f32.mrf.mxu0 }
  0xbb   :  { %v282_v26 = vadd.f32 %v3446_v1, %v281_v55 }
  0xbd   :  { %v3419_v44 = vpop.f32.mrf.mxu3 }
  0xbe   :  { %v3421_v45 = vpop.f32.mrf.mxu1 }
  0xc2   :  { %v3437_v58 = vpop.f32.mrf.mxu0 }
  0xc5   :  { %v3423_v47 = vpop.f32.mrf.mxu3 }
  0xc6   :  { %v3425_v48 = vpop.f32.mrf.mxu1 }
  0xca   :  { %v3439_v61 = vpop.f32.mrf.mxu0 }
  0xcd   :  { %v3427_v50 = vpop.f32.mrf.mxu3 }
  0xce   :  { %v3429_v51 = vpop.f32.mrf.mxu1 }
  0xd2   :  { %v3441_v0 = vpop.f32.mrf.mxu0 }
  0xd5   :  { %v3431_v53 = vpop.f32.mrf.mxu3 }
  0xd6   :  { %v3433_v54 = vpop.f32.mrf.mxu1 }
  0xda   :  { %v3449_v5 = vpop.f32.mrf.mxu0 }
  0xdd   :  { %v660_v56 = vpop.f32.mrf.mxu3 }
  0xde   :  { %v3435_v57 = vpop.f32.mrf.mxu1  ;;  %v661_v52 = vadd.f32 %v3457_v11, %v660_v56  ;;  %v288_v56 = vadd.f32 %v3446_v1, %v3439_v61 }
  0xe2   :  { %v3459_v13 = vpop.f32.mrf.mxu0 }
  0xe5   :  { %v663_v59 = vpop.f32.mrf.mxu3 }
  0xe6   :  { %v380_v60 = vpop.f32.mrf.mxu1  ;;  %v664_v43 = vadd.f32 %v3457_v11, %v663_v59 }
  0xea   :  { %v299_v46 = vpop.f32.mrf.mxu0 }
  0xed   :  { %v666_v62 = vpop.f32.mrf.mxu3 }
  0xee   :  { %v383_v63 = vpop.f32.mrf.mxu1  ;;  %v667_v37 = vadd.f32 %v3457_v11, %v666_v62 }
  0xf5   :  { %v669_v2 = vpop.f32.mrf.mxu3 }
  0xf6   :  { %v386_v3 = vpop.f32.mrf.mxu1  ;;  %v670_v23 = vadd.f32 %v3457_v11, %v669_v2  ;;  %v658_v2 = vadd.f32 %v3457_v11, %v3431_v53  ;;  %v655_v53 = vadd.f32 %v3457_v11, %v3427_v50  ;;  %v649_v50 = vadd.f32 %v3457_v11, %v3419_v44 }
  0xf7   :  { %v646_v44 = vadd.f32 %v3457_v11, %v3415_v41  ;;  %v643_v41 = vadd.f32 %v3457_v11, %v3411_v38 }
  0xfd   :  { %v672_v6 = vpop.f32.mrf.mxu3 }
  0xfe   :  { %v389_v8 = vpop.f32.mrf.mxu1  ;;  %v673_v18 = vadd.f32 %v3457_v11, %v672_v6 }
  0xff   :  { %2927 = vtanh.f32 %v389_v8  ;;  %v302_v8 = vpop.f32.mrf.mxu0 }
 0x100   :  { %2929 = vtanh.f32 %v267_v7 }
 0x101   :  { %2931 = vtanh.f32 %v386_v3 }
 0x102   :  { %2933 = vtanh.f32 %v270_v9 }
 0x103   :  { %2935 = vtanh.f32 %v276_v10 }
 0x104   :  { %2937 = vtanh.f32 %v383_v63 }
 0x105   :  { %v2928_v15 = vpop.eup %2927  ;;  %v675_v16 = vpop.f32.mrf.mxu3  ;;  %2939 = vtanh.f32 %v273_v17 }
 0x106   :  { %2677 = vmatpush.xpose.msk.msrb.mxu0 %vm197_vm0, %v2928_v15  ;;  %v676_v19 = vadd.f32 %v3457_v11, %v675_v16  ;;  %v2930_v21 = vpop.eup %2929  ;;  %2941 = vtanh.f32 %v380_v60  ;;  %v285_v60 = vadd.f32 %v3446_v1, %v3437_v58  ;;  %v297_v15 = vadd.f32 %v3446_v1, %v3459_v13 }
 0x107   :  { %v2932_v25 = vpop.eup %2931  ;;  %2943 = vtanh.f32 %v279_v22  ;;  %v412_v62 = vmul.f32 %v2930_v21, %v3464_v14  ;;  %v300_v16 = vadd.f32 %v3446_v1, %v299_v46  ;;  %v305_v21 = vpop.f32.mrf.mxu0 }
 0x108   :  { %678 = vmatpush.msrb.mxu1 %v676_v19  ;;  %2808 = vmatpush.msra.mxu2 %v676_v19  ;;  %v2934_v27 = vpop.eup %2933  ;;  %2945 = vtanh.f32 %v282_v26  ;;  %v306_v24 = vadd.f32 %v3446_v1, %v305_v21 }
 0x109   :  { %v2936_v40 = vpop.eup %2935  ;;  %2947 = vtanh.f32 %v3435_v57  ;;  %v413_v59 = vmul.f32 %v2934_v27, %v3464_v14  ;;  %v291_v57 = vadd.f32 %v3446_v1, %v3441_v0  ;;  %v430_v6 = vsel %vm197_vm0, %v412_v62, 0.0 }
 0x10a   :  { %2678 = vmatpush.xpose.msk.msrb.mxu0 %vm197_vm0, %v2932_v25  ;;  %679 = vmatpush.msrb.mxu1 %v673_v18  ;;  %v2938_v49 = vpop.eup %2937  ;;  %v415_v55 = vmul.f32 %v2936_v40, %v3464_v14  ;;  %2949 = vtanh.f32 %v3433_v54  ;;  %v652_v0 = vadd.f32 %v3457_v11, %v3423_v47  ;;  %v294_v54 = vadd.f32 %v3446_v1, %v3449_v5 }
 0x10b   :  { %2809 = vmatpush.msra.mxu2 %v673_v18  ;;  %v2940_v63 = vpop.eup %2939  ;;  %v433_v58 = vsel %vm197_vm0, %v413_v59, 0.0  ;;  %2951 = vtanh.f32 %v285_v60  ;;  %431 = vadd.xlane.f32.xlu0 %v430_v6 }
 0x10c   :  { %680 = vmatpush.msrb.mxu1 %v670_v23  ;;  %v439_v3 = vsel %vm197_vm0, %v415_v55, 0.0  ;;  %v2942_v4 = vpop.eup %2941  ;;  %434 = vadd.xlane.f32.xlu1 %v433_v58  ;;  %2953 = vtanh.f32 %v288_v56  ;;  %v414_v12 = vmul.f32 %v2940_v63, %v3464_v14 }
 0x10d   :  { %2810 = vmatpush.msra.mxu2 %v670_v23  ;;  %440 = vadd.xlane.f32.xlu2 %v439_v3  ;;  %v2944_v7 = vpop.eup %2943  ;;  %2955 = vtanh.f32 %v291_v57  ;;  %v637_v23 = vadd.f32 %v3457_v11, %v3401_v33  ;;  %v634_v33 = vadd.f32 %v3457_v11, %v3396_v31 }
 0x10e   :  { %2679 = vmatpush.xpose.msk.msrb.mxu0 %vm197_vm0, %v2938_v49  ;;  %681 = vmatpush.msrb.mxu1 %v667_v37  ;;  %v2946_v61 = vpop.eup %2945  ;;  %v416_v10 = vmul.f32 %v2944_v7, %v3464_v14  ;;  %2957 = vtanh.f32 %v3429_v51  ;;  %v436_v18 = vsel %vm197_vm0, %v414_v12, 0.0 }
 0x10f   :  { %2811 = vmatpush.msra.mxu2 %v667_v37  ;;  %v2948_v9 = vpop.eup %2947  ;;  %v417_v47 = vmul.f32 %v2946_v61, %v3464_v14  ;;  %2959 = vtanh.f32 %v3425_v48  ;;  %v640_v48 = vadd.f32 %v3457_v11, %v3406_v35  ;;  %v303_v35 = vadd.f32 %v3446_v1, %v302_v8  ;;  %v308_v31 = vpop.f32.mrf.mxu0 }
 0x110   :  { %682 = vmatpush.msrb.mxu1 %v664_v43  ;;  %v2950_v5 = vpop.eup %2949  ;;  %v442_v17 = vsel %vm197_vm0, %v416_v10, 0.0  ;;  %2961 = vtanh.f32 %v294_v54  ;;  %v309_v60 = vadd.f32 %v3446_v1, %v308_v31  ;;  %v55_v8 = vlaneseq }
 0x111   :  { %2812 = vmatpush.msra.mxu2 %v664_v43  ;;  %v2952_v19 = vpop.eup %2951  ;;  %v445_v51 = vsel %vm197_vm0, %v417_v47, 0.0  ;;  %2963 = vtanh.f32 %v297_v15 }
 0x112   :  { %2680 = vmatpush.xpose.msk.msrb.mxu0 %vm197_vm0, %v2942_v4  ;;  %683 = vmatpush.msrb.mxu1 %v661_v52  ;;  %v2954_v20 = vpop.eup %2953  ;;  %2965 = vtanh.f32 %v300_v16  ;;  %v418_v25 = vmul.f32 %v2952_v19, %v3464_v14 }
 0x113   :  { %2813 = vmatpush.msra.mxu2 %v661_v52  ;;  %v2956_v13 = vpop.eup %2955  ;;  %446 = vadd.xlane.f32.xlu0 %v445_v51  ;;  %v419_v38 = vmul.f32 %v2954_v20, %v3464_v14  ;;  %2967 = vtanh.f32 %v3421_v45  ;;  %v631_v45 = vadd.f32 %v3457_v11, %v3391_v29 }
 0x114   :  { %684 = vmatpush.msrb.mxu1 %v658_v2  ;;  %437 = vadd.xlane.f32.xlu1 %v436_v18  ;;  %v2958_v22 = vpop.eup %2957  ;;  %v420_v26 = vmul.f32 %v2956_v13, %v3464_v14  ;;  %v448_v43 = vsel %vm197_vm0, %v418_v25, 0.0  ;;  %2969 = vtanh.f32 %v306_v24 }
 0x115   :  { %2814 = vmatpush.msra.mxu2 %v658_v2  ;;  %443 = vadd.xlane.f32.xlu2 %v442_v17  ;;  %v2960_v27 = vpop.eup %2959  ;;  %v451_v40 = vsel %vm197_vm0, %v419_v38, 0.0  ;;  %2971 = vtanh.f32 %v3417_v42 }
 0x116   :  { %2681 = vmatpush.xpose.msk.msrb.mxu0 %vm197_vm0, %v2948_v9  ;;  %685 = vmatpush.msrb.mxu1 %v655_v53  ;;  %v2962_v37 = vpop.eup %2961  ;;  %v454_v49 = vsel %vm197_vm0, %v420_v26, 0.0  ;;  %2973 = vtanh.f32 %v303_v35  ;;  %v73_v9 = vand.u32 127, %v55_v8 }
 0x117   :  { %2815 = vmatpush.msra.mxu2 %v655_v53  ;;  %v2964_v46 = vpop.eup %2963  ;;  %v421_v42 = vmul.f32 %v2962_v37, %v3464_v14  ;;  %2975 = vtanh.f32 %v3413_v39 }
 0x118   :  { %686 = vmatpush.msrb.mxu1 %v652_v0  ;;  %v2966_v52 = vpop.eup %2965  ;;  %v422_v59 = vmul.f32 %v2964_v46, %v3464_v14  ;;  %2977 = vtanh.f32 %v309_v60  ;;  %v138_v54 = vcvt.s32.f32 %v73_v9 }
 0x119   :  { %2816 = vmatpush.msra.mxu2 %v652_v0  ;;  %v2968_v55 = vpop.eup %2967  ;;  %v423_v62 = vmul.f32 %v2966_v52, %v3464_v14  ;;  %v457_v2 = vsel %vm197_vm0, %v421_v42, 0.0  ;;  %2979 = vtanh.f32 %v3408_v36 }
 0x11a   :  { %2682 = vmatpush.xpose.msk.msrb.mxu0 %vm197_vm0, %v2950_v5  ;;  %687 = vmatpush.msrb.mxu1 %v649_v50  ;;  %v2970_v29 = vpop.eup %2969  ;;  %v460_v11 = vsel %vm197_vm0, %v422_v59, 0.0  ;;  %2981 = vtanh.f32 %v3403_v34  ;;  %v139_v12 = vmul.f32 0.125, %v138_v54 }
 0x11b   :  { %2817 = vmatpush.msra.mxu2 %v649_v50  ;;  %455 = vadd.xlane.f32.xlu0 %v454_v49  ;;  %v2972_v63 = vpop.eup %2971  ;;  %v463_v56 = vsel %vm197_vm0, %v423_v62, 0.0  ;;  %v425_v3 = vmul.f32 %v2970_v29, %v3464_v14  ;;  %2983 = vtanh.f32 %v3398_v32  ;;  %v186_v32 = vld [vmem:[%s4925_s6] sm:$0x1] }
 0x11c   :  { %688 = vmatpush.msrb.mxu1 %v646_v44  ;;  %449 = vadd.xlane.f32.xlu1 %v448_v43  ;;  %v2974_v1 = vpop.eup %2973  ;;  %2985 = vtanh.f32 %v3393_v30  ;;  %v3573_v30 = vshrl.u32 %v55_v8, 7  ;;  %v140_v17 = vadd.f32 0.0001, %v139_v12  ;;  %v3589_v29 = vld [vmem:[%s4926_s1] ss:$0 sm:$0xff] }
 0x11d   :  { %2818 = vmatpush.msra.mxu2 %v646_v44  ;;  %452 = vadd.xlane.f32.xlu2 %v451_v40  ;;  %v2976_v39 = vpop.eup %2975  ;;  %v424_v4 = vmul.f32 %v2974_v1, %v3464_v14  ;;  %v469_v58 = vsel %vm197_vm0, %v425_v3, 0.0  ;;  %2987 = vtanh.f32 %v3388_v28 }
 0x11e   :  { %2683 = vmatpush.xpose.msk.msrb.mxu0 %vm197_vm0, %v2958_v22  ;;  %689 = vmatpush.msrb.mxu1 %v643_v41  ;;  %v2978_v57 = vpop.eup %2977  ;;  %v57_v50 = vadd.s32 8, %v3573_v30  ;;  %v74_v28 = vcvt.s32.f32 %v3573_v30  ;;  %v65_v10 = vadd.s32 72, %v3573_v30  ;;  %v58_v5 = vadd.s32 16, %v3573_v30 }
 0x11f   :  { %2819 = vmatpush.msra.mxu2 %v643_v41  ;;  %v426_v6 = vmul.f32 %v2978_v57, %v3464_v14  ;;  %v466_v7 = vsel %vm197_vm0, %v424_v4, 0.0  ;;  %v2980_v53 = vpop.eup %2979  ;;  %v66_v16 = vadd.s32 80, %v3573_v30  ;;  %v59_v20 = vadd.s32 24, %v3573_v30  ;;  %v429_v41 = vpop.xlane.xlu0 %428 }
 0x120   :  { %690 = vmatpush.msrb.mxu1 %v640_v48  ;;  %v2982_v61 = vpop.eup %2981  ;;  %v75_v47 = vcvt.s32.f32 %v57_v50  ;;  %v90_v15 = vmul.f32 0.125, %v74_v28  ;;  %v83_v44 = vcvt.s32.f32 %v65_v10  ;;  %v2905_v21 = vceil.f32 %v140_v17 }
 0x121   :  { %2820 = vmatpush.msra.mxu2 %v640_v48  ;;  %v472_v36 = vsel %vm197_vm0, %v426_v6, 0.0  ;;  %v2984_v14 = vpop.eup %2983  ;;  %v84_v51 = vcvt.s32.f32 %v66_v16  ;;  %v76_v48 = vcvt.s32.f32 %v58_v5  ;;  %v2906_v22 = vfloor.f32 %v140_v17 }
 0x122   :  { %2684 = vmatpush.xpose.msk.msrb.mxu0 %vm197_vm0, %v2960_v27  ;;  %691 = vmatpush.msrb.mxu1 %v637_v23  ;;  %v2986_v34 = vpop.eup %2985  ;;  %v91_v18 = vmul.f32 0.125, %v75_v47  ;;  %v99_v19 = vmul.f32 0.125, %v83_v44  ;;  %v106_v13 = vadd.f32 0.0001, %v90_v15  ;;  %vm2904_vm1 = vcmp.lt.s32.totalorder %v140_v17, 0 }
 0x123   :  { %2821 = vmatpush.msra.mxu2 %v637_v23  ;;  %464 = vadd.xlane.f32.xlu0 %v463_v56  ;;  %v2988_v0 = vpop.eup %2987  ;;  %v100_v24 = vmul.f32 0.125, %v84_v51  ;;  %v77_v25 = vcvt.s32.f32 %v59_v20  ;;  %v92_v27 = vmul.f32 0.125, %v76_v48  ;;  %v2907_v40 = vsel %vm2904_vm1, %v2905_v21, %v2906_v22 }
 0x124   :  { %692 = vmatpush.msrb.mxu1 %v634_v33  ;;  %458 = vadd.xlane.f32.xlu1 %v457_v2  ;;  %v115_v23 = vadd.f32 0.0001, %v99_v19  ;;  %v107_v38 = vadd.f32 0.0001, %v91_v18  ;;  %v2825_v26 = vceil.f32 %v106_v13  ;;  %vm2824_vm3 = vcmp.lt.s32.totalorder %v106_v13, 0 }
 0x125   :  { %2822 = vmatpush.msra.mxu2 %v634_v33  ;;  %461 = vadd.xlane.f32.xlu2 %v460_v11  ;;  %v2826_v33 = vfloor.f32 %v106_v13  ;;  %v116_v43 = vadd.f32 0.0001, %v100_v24  ;;  %v67_v31 = vadd.s32 88, %v3573_v30  ;;  %v3584_v60 = vcvt.f32.s32 %v2907_v40 }
 0x126   :  { %2685 = vmatpush.xpose.msk.msrb.mxu0 %vm197_vm0, %v2968_v55  ;;  %693 = vmatpush.msrb.mxu1 %v631_v45  ;;  %vm2869_vm2 = vcmp.lt.s32.totalorder %v115_v23, 0  ;;  %v2870_v35 = vceil.f32 %v115_v23  ;;  %v2871_v37 = vfloor.f32 %v115_v23  ;;  %v2830_v49 = vceil.f32 %v107_v38 }
 0x127   :  { %2823 = vmatpush.msra.mxu2 %v631_v45  ;;  %v2831_v52 = vfloor.f32 %v107_v38  ;;  %vm2829_vm4 = vcmp.lt.s32.totalorder %v107_v38, 0  ;;  %v93_v59 = vmul.f32 0.125, %v77_v25  ;;  %v2827_v62 = vsel %vm2824_vm3, %v2825_v26, %v2826_v33 }
 0x128   :  { %v2872_v45 = vsel %vm2869_vm2, %v2870_v35, %v2871_v37  ;;  %v108_v11 = vadd.f32 0.0001, %v92_v27  ;;  %v2876_v2 = vfloor.f32 %v116_v43  ;;  %vm2874_vm5 = vcmp.lt.s32.totalorder %v116_v43, 0 }
 0x129   :  { %v2873_v42 = vcvt.f32.s32 %v2872_v45  ;;  %v2832_v3 = vsel %vm2829_vm4, %v2830_v49, %v2831_v52  ;;  %v68_v6 = vadd.s32 96, %v3573_v30  ;;  %v69_v51 = vadd.s32 104, %v3573_v30 }
 0x12a   :  { %2686 = vmatpush.xpose.msk.msrb.mxu0 %vm197_vm0, %v2972_v63  ;;  %v2875_v63 = vceil.f32 %v116_v43  ;;  %vm2834_vm7 = vcmp.lt.s32.totalorder %v108_v11, 0  ;;  %v70_v21 = vadd.s32 112, %v3573_v30 }
 0x12b   :  { %473 = vadd.xlane.f32.xlu0 %v472_v36  ;;  %v3596_v36 = vadd.s32 40, %v3573_v30  ;;  %vm151_vm6 = vcmp.eq.s32.totalorder %v2873_v42, %v3584_v60  ;;  %v86_v50 = vcvt.s32.f32 %v68_v6 }
 0x12c   :  { %467 = vadd.xlane.f32.xlu1 %v466_v7  ;;  %v2828_v7 = vcvt.f32.s32 %v2827_v62  ;;  %v88_v45 = vcvt.s32.f32 %v70_v21 }
 0x12d   :  { %470 = vadd.xlane.f32.xlu2 %v469_v58  ;;  %v60_v58 = vadd.s32 32, %v3573_v30  ;;  %v102_v5 = vmul.f32 0.125, %v86_v50  ;;  %v79_v52 = vcvt.s32.f32 %v3596_v36 }
 0x12e   :  { %2687 = vmatpush.xpose.msk.msrb.mxu0 %vm197_vm0, %v2976_v39  ;;  %v85_v39 = vcvt.s32.f32 %v67_v31  ;;  %vm3604_vm8 = vcmp.eq.s32.totalorder %v2828_v7, %v3584_v60 }
 0x12f   :  { %v78_v10 = vcvt.s32.f32 %v60_v58  ;;  %v118_v19 = vadd.f32 0.0001, %v102_v5 }
 0x130   :  { %v101_v9 = vmul.f32 0.125, %v85_v39  ;;  %v62_v39 = vadd.s32 48, %v3573_v30 }
 0x131   :  { %v94_v48 = vmul.f32 0.125, %v78_v10  ;;  %v2885_v33 = vceil.f32 %v118_v19  ;;  %vm2884_vm13 = vcmp.lt.s32.totalorder %v118_v19, 0  ;;  %v2886_v43 = vfloor.f32 %v118_v19 }
 0x132   :  { %2688 = vmatpush.xpose.msk.msrb.mxu0 %vm197_vm0, %v2980_v53  ;;  %v109_v53 = vadd.f32 0.0001, %v93_v59  ;;  %v117_v12 = vadd.f32 0.0001, %v101_v9  ;;  %v63_v19 = vadd.s32 56, %v3573_v30 }
 0x133   :  { %v110_v62 = vadd.f32 0.0001, %v94_v48 }
 0x134   :  { %vm2839_vm10 = vcmp.lt.s32.totalorder %v109_v53, 0  ;;  %v2840_v47 = vceil.f32 %v109_v53  ;;  %vm2879_vm12 = vcmp.lt.s32.totalorder %v117_v12, 0  ;;  %v2880_v17 = vceil.f32 %v117_v12 }
 0x135   :  { %v2881_v18 = vfloor.f32 %v117_v12  ;;  %v2841_v13 = vfloor.f32 %v109_v53  ;;  %v2845_v7 = vceil.f32 %v110_v62  ;;  %vm2844_vm3 = vcmp.lt.s32.totalorder %v110_v62, 0 }
 0x136   :  { %2689 = vmatpush.xpose.msk.msrb.mxu0 %vm197_vm0, %v2982_v61  ;;  %v2833_v61 = vcvt.f32.s32 %v2832_v3  ;;  %v95_v3 = vmul.f32 0.125, %v79_v52  ;;  %v80_v12 = vcvt.s32.f32 %v62_v39 }
 0x137   :  { %v2882_v26 = vsel %vm2879_vm12, %v2880_v17, %v2881_v18  ;;  %v2842_v42 = vsel %vm2839_vm10, %v2840_v47, %v2841_v13 }
 0x138   :  { %vm3613_vm11 = vcmp.eq.s32.totalorder %v2833_v61, %v3584_v60  ;;  %v2883_v37 = vcvt.f32.s32 %v2882_v26  ;;  %v2843_v58 = vcvt.f32.s32 %v2842_v42  ;;  %v71_v61 = vadd.s32 120, %v3573_v30 }
 0x139   :  { %v3627_v38 = vsel %vm3613_vm11, %v3589_v29, 0.0  ;;  %v111_v50 = vadd.f32 0.0001, %v95_v3 }
 0x13a   :  { %2690 = vmatpush.xpose.msk.msrb.mxu0 %vm197_vm0, %v2984_v14  ;;  %v2835_v14 = vceil.f32 %v108_v11  ;;  %vm153_vm14 = vcmp.eq.s32.totalorder %v2883_v37, %v3584_v60  ;;  %v89_v5 = vcvt.s32.f32 %v71_v61 }
 0x13b   :  { %v3636_v59 = vsel %vm153_vm14, %v3589_v29, 0.0  ;;  %v2850_v48 = vceil.f32 %v111_v50 }
 0x13e   :  { %2691 = vmatpush.xpose.msk.msrb.mxu0 %vm197_vm0, %v2986_v34  ;;  %v3600_v34 = vsel %vm151_vm6, %v3589_v29, 0.0  ;;  %vm2849_vm6 = vcmp.lt.s32.totalorder %v111_v50, 0 }
 0x142   :  { %2692 = vmatpush.xpose.msk.msrb.mxu0 %vm197_vm0, %v2988_v0  ;;  %v2877_v0 = vsel %vm2874_vm5, %v2875_v63, %v2876_v2  ;;  %vm145_vm5 = vcmp.eq.s32.totalorder %v2843_v58, %v3584_v60 }
 0x143   :  { %v2878_v8 = vcvt.f32.s32 %v2877_v0  ;;  %v3654_v13 = vsel %vm145_vm5, %v3589_v29, 0.0 }
 0x145   :  { %2693 = vmatmul.msk.f32.vlgmr.msrb.gmra.mxu0 %vm197_vm0, %v186_v32  ;;  %v2836_v32 = vfloor.f32 %v108_v11  ;;  %vm152_vm9 = vcmp.eq.s32.totalorder %v2878_v8, %v3584_v60  ;;  %v2887_v11 = vsel %vm2884_vm13, %v2885_v33, %v2886_v43 }
 0x146   :  { %v3610_v15 = vsel %vm152_vm9, %v3589_v29, 0.0  ;;  %v2888_v63 = vcvt.f32.s32 %v2887_v11 }
 0x147   :  { %v2837_v16 = vsel %vm2834_vm7, %v2835_v14, %v2836_v32  ;;  %v2846_v14 = vfloor.f32 %v110_v62 }
 0x148   :  { %v2838_v25 = vcvt.f32.s32 %v2837_v16  ;;  %vm154_vm1 = vcmp.eq.s32.totalorder %v2888_v63, %v3584_v60 }
 0x149   :  { %v3646_v53 = vsel %vm154_vm1, %v3589_v29, 0.0  ;;  %v2847_v44 = vsel %vm2844_vm3, %v2845_v7, %v2846_v14 }
 0x14a   :  { %vm144_vm15 = vcmp.eq.s32.totalorder %v2838_v25, %v3584_v60  ;;  %v2851_v25 = vfloor.f32 %v111_v50 }
 0x14c   :  { %v2852_v52 = vsel %vm2849_vm6, %v2850_v48, %v2851_v25 }
 0x14d   :  { %v2853_v63 = vcvt.f32.s32 %v2852_v52 }
 0x14f   :  { %vm147_vm13 = vcmp.eq.s32.totalorder %v2853_v63, %v3584_v60 }
 0x150   :  { %v3680_v14 = vsel %vm147_vm13, %v3589_v29, 0.0 }
 0x17e   :  { %v432_v1 = vpop.xlane.xlu0 %431 }
 0x17f   :  { %v435_v4 = vpop.xlane.xlu1 %434 }
 0x186   :  { %v447_v11 = vpop.xlane.xlu0 %446 }
 0x187   :  { %v438_v23 = vpop.xlane.xlu1 %437 }
 0x18e   :  { %v456_v25 = vpop.xlane.xlu0 %455 }
 0x1c2   :  { %v542_v46 = vpop.f32.mrf.mxu0 }
 0x1c3   :  { %v3582_v55 = vperm.slane %v542_v46, 0  ;;  %v87_v46 = vcvt.s32.f32 %v69_v51 }
 0x1c5   :  { %v546_v56 = vadd.f32 %v3582_v55, %v429_v41  ;;  %v547_v57 = vadd.f32 %v3582_v55, %v432_v1  ;;  %v548_v54 = vadd.f32 %v3582_v55, %v435_v4  ;;  %v3621_v41 = vsel %vm3604_vm8, %v3589_v29, 0.0  ;;  %v441_v1 = vpop.xlane.xlu2 %440 }
 0x1c6   :  { %v549_v35 = vadd.f32 %v3582_v55, %v438_v23  ;;  %v103_v2 = vmul.f32 0.125, %v87_v46  ;;  %v104_v4 = vmul.f32 0.125, %v88_v45  ;;  %v550_v0 = vadd.f32 %v3582_v55, %v441_v1 }
 0x1c7   :  { %2989 = vtanh.f32 %v546_v56  ;;  %v81_v46 = vcvt.s32.f32 %v63_v19  ;;  %v552_v39 = vadd.f32 %v3582_v55, %v447_v11 }
 0x1c8   :  { %2991 = vtanh.f32 %v547_v57  ;;  %v3642_v57 = vsel %vm144_vm15, %v3589_v29, 0.0  ;;  %v119_v6 = vadd.f32 0.0001, %v103_v2  ;;  %v120_v36 = vadd.f32 0.0001, %v104_v4 }
 0x1c9   :  { %2993 = vtanh.f32 %v548_v54  ;;  %v64_v2 = vadd.s32 64, %v3573_v30  ;;  %v97_v4 = vmul.f32 0.125, %v81_v46 }
 0x1ca   :  { %2995 = vtanh.f32 %v549_v35  ;;  %vm2889_vm2 = vcmp.lt.s32.totalorder %v119_v6, 0  ;;  %v2890_v32 = vceil.f32 %v119_v6  ;;  %v2891_v9 = vfloor.f32 %v119_v6 }
 0x1cb   :  { %vm2894_vm4 = vcmp.lt.s32.totalorder %v120_v36, 0  ;;  %v2895_v28 = vceil.f32 %v120_v36  ;;  %v2896_v10 = vfloor.f32 %v120_v36  ;;  %2997 = vtanh.f32 %v550_v0  ;;  %v450_v0 = vpop.xlane.xlu1 %449 }
 0x1cc   :  { %v2892_v47 = vsel %vm2889_vm2, %v2890_v32, %v2891_v9  ;;  %v113_v36 = vadd.f32 0.0001, %v97_v4  ;;  %v82_v61 = vcvt.s32.f32 %v64_v2 }
 0x1cd   :  { %v2990_v20 = vpop.eup %2989  ;;  %v2893_v16 = vcvt.f32.s32 %v2892_v47  ;;  %v2897_v17 = vsel %vm2894_vm4, %v2895_v28, %v2896_v10  ;;  %v444_v21 = vpop.xlane.xlu2 %443 }
 0x1ce   :  { %v2992_v22 = vpop.eup %2991  ;;  %v578_v24 = vmax.f32 %v2990_v20, 0.0  ;;  %v2898_v51 = vcvt.f32.s32 %v2897_v17  ;;  %v105_v20 = vmul.f32 0.125, %v89_v5  ;;  %v551_v26 = vadd.f32 %v3582_v55, %v444_v21 }
 0x1cf   :  { %v579_v27 = vmax.f32 %v2992_v22, 0.0  ;;  %v2994_v31 = vpop.eup %2993  ;;  %vm155_vm7 = vcmp.eq.s32.totalorder %v2893_v16, %v3584_v60  ;;  %v2848_v22 = vcvt.f32.s32 %v2847_v44  ;;  %v2861_v9 = vfloor.f32 %v113_v36 }
 0x1d0   :  { %v594_v40 = vmul.f32 %v578_v24, %v3621_v41  ;;  %v580_v56 = vmax.f32 %v2994_v31, 0.0  ;;  %v2996_v54 = vpop.eup %2995  ;;  %v3658_v23 = vsel %vm155_vm7, %v3589_v29, 0.0  ;;  %vm156_vm8 = vcmp.eq.s32.totalorder %v2898_v51, %v3584_v60 }
 0x1d1   :  { %v595_v49 = vmul.f32 %v579_v27, %v3627_v38  ;;  %v581_v18 = vmax.f32 %v2996_v54, 0.0  ;;  %v121_v24 = vadd.f32 0.0001, %v105_v20  ;;  %v96_v27 = vmul.f32 0.125, %v80_v12  ;;  %v2998_v43 = vpop.eup %2997 }
 0x1d2   :  { %694 = vmatmul.f32.vlgmr.msrb.gmra.mxu1 %v594_v40  ;;  %v596_v8 = vmul.f32 %v580_v56, %v3642_v57  ;;  %v3663_v35 = vsel %vm156_vm8, %v3589_v29, 0.0  ;;  %vm146_vm10 = vcmp.eq.s32.totalorder %v2848_v22, %v3584_v60  ;;  %2999 = vtanh.f32 %v551_v26 }
 0x1d3   :  { %697 = vmatmul.f32.vlgmr.msra.gmra.mxu2 %v595_v49  ;;  %v597_v37 = vmul.f32 %v581_v18, %v3654_v13  ;;  %vm2899_vm9 = vcmp.lt.s32.totalorder %v121_v24, 0  ;;  %v2900_v33 = vceil.f32 %v121_v24  ;;  %v2901_v40 = vfloor.f32 %v121_v24  ;;  %v459_v46 = vpop.xlane.xlu1 %458 }
 0x1d4   :  { %v112_v45 = vadd.f32 0.0001, %v96_v27  ;;  %v582_v42 = vmax.f32 %v2998_v43, 0.0  ;;  %v3669_v62 = vsel %vm146_vm10, %v3589_v29, 0.0  ;;  %3001 = vtanh.f32 %v552_v39 }
 0x1d5   :  { %v2902_v49 = vsel %vm2899_vm9, %v2900_v33, %v2901_v40  ;;  %v553_v54 = vadd.f32 %v3582_v55, %v450_v0  ;;  %v98_v50 = vmul.f32 0.125, %v82_v61  ;;  %vm2859_vm14 = vcmp.lt.s32.totalorder %v113_v36, 0  ;;  %v453_v16 = vpop.xlane.xlu2 %452 }
 0x1d6   :  { %v2903_v31 = vcvt.f32.s32 %v2902_v49  ;;  %v2855_v56 = vceil.f32 %v112_v45  ;;  %v2856_v3 = vfloor.f32 %v112_v45  ;;  %v598_v58 = vmul.f32 %v582_v42, %v3669_v62 }
 0x1d7   :  { %vm2854_vm12 = vcmp.lt.s32.totalorder %v112_v45, 0  ;;  %3003 = vtanh.f32 %v553_v54  ;;  %v114_v47 = vadd.f32 0.0001, %v98_v50  ;;  %v554_v51 = vadd.f32 %v3582_v55, %v453_v16 }
 0x1d8   :  { %vm157_vm11 = vcmp.eq.s32.totalorder %v2903_v31, %v3584_v60  ;;  %v3000_v6 = vpop.eup %2999  ;;  %v2857_v7 = vsel %vm2854_vm12, %v2855_v56, %v2856_v3  ;;  %v555_v27 = vadd.f32 %v3582_v55, %v456_v25  ;;  %v556_v49 = vadd.f32 %v3582_v55, %v459_v46 }
 0x1d9   :  { %v3674_v1 = vsel %vm157_vm11, %v3589_v29, 0.0  ;;  %v583_v30 = vmax.f32 %v3000_v6, 0.0  ;;  %v2858_v32 = vcvt.f32.s32 %v2857_v7  ;;  %v2865_v18 = vceil.f32 %v114_v47 }
 0x1da   :  { %v3002_v10 = vpop.eup %3001  ;;  %v2866_v19 = vfloor.f32 %v114_v47  ;;  %vm2864_vm1 = vcmp.lt.s32.totalorder %v114_v47, 0  ;;  %3005 = vtanh.f32 %v554_v51 }
 0x1db   :  { %700 = vmatmul.f32.gmra.mxu2 %v596_v8  ;;  %v2860_v8 = vceil.f32 %v113_v36  ;;  %v599_v28 = vmul.f32 %v583_v30, %v3680_v14  ;;  %vm148_vm15 = vcmp.eq.s32.totalorder %v2858_v32, %v3584_v60  ;;  %v584_v5 = vmax.f32 %v3002_v10, 0.0  ;;  %v468_v4 = vpop.xlane.xlu1 %467 }
 0x1dc   :  { %v3686_v44 = vsel %vm148_vm15, %v3589_v29, 0.0  ;;  %v2867_v21 = vsel %vm2864_vm1, %v2865_v18, %v2866_v19  ;;  %3007 = vtanh.f32 %v555_v27  ;;  %v559_v6 = vadd.f32 %v3582_v55, %v468_v4  ;;  %v3183_v19 = vld [vmem:[%s4921_s0] sm:$0xff] }
 0x1dd   :  { %v2862_v12 = vsel %vm2859_vm14, %v2860_v8, %v2861_v9  ;;  %v600_v20 = vmul.f32 %v584_v5, %v3686_v44  ;;  %v3004_v48 = vpop.eup %3003  ;;  %v2868_v26 = vcvt.f32.s32 %v2867_v21  ;;  %3009 = vtanh.f32 %v556_v49  ;;  %v462_v42 = vpop.xlane.xlu2 %461 }
 0x1de   :  { %v2863_v17 = vcvt.f32.s32 %v2862_v12  ;;  %v585_v22 = vmax.f32 %v3004_v48, 0.0  ;;  %v557_v11 = vadd.f32 %v3582_v55, %v462_v42  ;;  %v3184_v48 = vld [vmem:[%s4921_s0 + $0x8] sm:$0xff]  ;;  %v3199_v4 = vmov 32.0  }
 0x1df   :  { %vm150_vm3 = vcmp.eq.s32.totalorder %v2868_v26, %v3584_v60  ;;  %v3185_v26 = vld [vmem:[%s4921_s0 + $0x10] sm:$0xff] }
 0x1e0   :  { %vm149_vm2 = vcmp.eq.s32.totalorder %v2863_v17, %v3584_v60  ;;  %v3006_v33 = vpop.eup %3005  ;;  %v3698_v43 = vsel %vm150_vm3, %v3589_v29, 0.0  ;;  %3011 = vtanh.f32 %v557_v11 }
 0x1e1   :  { %v3692_v24 = vsel %vm149_vm2, %v3589_v29, 0.0  ;;  %v586_v40 = vmax.f32 %v3006_v33, 0.0  ;;  %v465_v29 = vpop.xlane.xlu0 %464 }
 0x1e2   :  { %v3008_v45 = vpop.eup %3007  ;;  %v558_v56 = vadd.f32 %v3582_v55, %v465_v29 }
 0x1e3   :  { %703 = vmatmul.f32.gmra.mxu2 %v597_v37  ;;  %v601_v37 = vmul.f32 %v585_v22, %v3692_v24  ;;  %v602_v52 = vmul.f32 %v586_v40, %v3698_v43  ;;  %v587_v31 = vmax.f32 %v3008_v45, 0.0  ;;  %v3010_v60 = vpop.eup %3009  ;;  %v3186_v40 = vld [vmem:[%s4921_s0 + $0x18] sm:$0xff]  ;;  %v3187_v45 = vld [vmem:[%s4921_s0 + $0x20] sm:$0xff] }
 0x1e4   :  { %v588_v2 = vmax.f32 %v3010_v60, 0.0  ;;  %3013 = vtanh.f32 %v558_v56  ;;  %v3189_v56 = vld [vmem:[%s4921_s0 + $0x30] sm:$0xff] }
 0x1e5   :  { %v603_v63 = vmul.f32 %v587_v31, %v3600_v34  ;;  %3015 = vtanh.f32 %v559_v6  ;;  %v471_v61 = vpop.xlane.xlu2 %470 }
 0x1e6   :  { %v604_v3 = vmul.f32 %v588_v2, %v3610_v15  ;;  %v3012_v39 = vpop.eup %3011  ;;  %v560_v0 = vadd.f32 %v3582_v55, %v471_v61 }
 0x1e8   :  { %3017 = vtanh.f32 %v560_v0 }
 0x1e9   :  { %v474_v54 = vpop.xlane.xlu0 %473 }
 0x1ea   :  { %v3014_v36 = vpop.eup %3013  ;;  %v561_v50 = vadd.f32 %v3582_v55, %v474_v54 }
 0x1eb   :  { %706 = vmatmul.f32.gmra.mxu2 %v598_v58  ;;  %v589_v58 = vmax.f32 %v3012_v39, 0.0  ;;  %v590_v30 = vmax.f32 %v3014_v36, 0.0  ;;  %v3016_v8 = vpop.eup %3015 }
 0x1ec   :  { %v591_v9 = vmax.f32 %v3016_v8, 0.0  ;;  %3019 = vtanh.f32 %v561_v50 }
 0x1ed   :  { %v605_v7 = vmul.f32 %v589_v58, %v3636_v59  ;;  %v606_v32 = vmul.f32 %v590_v30, %v3646_v53  ;;  %3021 = vrcp.f32 %v3199_v4 }
 0x1ee   :  { %v3018_v10 = vpop.eup %3017 }
 0x1ef   :  { %v592_v12 = vmax.f32 %v3018_v10, 0.0 }
 0x1f1   :  { %v608_v47 = vmul.f32 %v592_v12, %v3663_v35 }
 0x1f2   :  { %v3020_v5 = vpop.eup %3019 }
 0x1f3   :  { %709 = vmatmul.f32.gmra.mxu2 %v599_v28  ;;  %v607_v28 = vmul.f32 %v591_v9, %v3658_v23  ;;  %v593_v16 = vmax.f32 %v3020_v5, 0.0  ;;  %v3022_v58 = vpop.eup %3021  ;;  %v3190_v5 = vld [vmem:[%s4921_s0 + $0x38] sm:$0xff] }
 0x1f4   :  { %v808_v6 = vmul.f32 32.0, %v3022_v58  ;;  %vm812_vm4 = vweird.f32 %v3022_v58 }
 0x1f5   :  { %v609_v17 = vmul.f32 %v593_v16, %v3674_v1 }
 0x1fb   :  { %712 = vmatmul.f32.gmra.mxu2 %v600_v20 }
 0x203   :  { %715 = vmatmul.f32.gmra.mxu2 %v601_v37 }
 0x20b   :  { %718 = vmatmul.f32.gmra.mxu2 %v602_v52 }
 0x213   :  { %721 = vmatmul.f32.gmra.mxu2 %v603_v63  ;;  %v3188_v63 = vld [vmem:[%s4921_s0 + $0x28] sm:$0xff] }
 0x21b   :  { %724 = vmatmul.f32.gmra.mxu2 %v604_v3 }
 0x223   :  { %727 = vmatmul.f32.gmra.mxu2 %v605_v7  ;;  %v809_v7 = vsub.f32 1.0, %v808_v6 }
 0x225   :  { %v810_v36 = vmul.f32 %v3022_v58, %v809_v7 }
 0x227   :  { %v811_v61 = vadd.f32 %v3022_v58, %v810_v36 }
 0x229   :  { %v3751_v0 = vsel %vm812_vm4, %v3022_v58, %v811_v61 }
 0x22b   :  { %730 = vmatmul.f32.gmra.mxu2 %v606_v32 }
 0x233   :  { %733 = vmatmul.f32.gmra.mxu2 %v607_v28 }
 0x23b   :  { %736 = vmatmul.f32.gmra.mxu2 %v608_v47 }
 0x243   :  { %739 = vmatmul.f32.gmra.mxu2 %v609_v17 }
 0x24f   :  { %v695_v18 = vpop.f32.mrf.mxu1 }
 0x250   :  { %v743_v55 = vadd.f32 %v3183_v19, %v695_v18 }
 0x252   :  { %v759_v51 = vsel %vm197_vm0, %v743_v55, 0.0 }
 0x253   :  { %760 = vadd.xlane.f32.xlu1 %v759_v51 }
 0x256   :  { %v698_v20 = vpop.f32.mrf.mxu2 }
 0x257   :  { %v744_v21 = vadd.f32 %v3184_v48, %v698_v20  ;;  %v3191_v48 = vld [vmem:[%s4921_s0 + $0x40] sm:$0xff] }
 0x259   :  { %v762_v22 = vsel %vm197_vm0, %v744_v21, 0.0 }
 0x25a   :  { %763 = vadd.xlane.f32.xlu2 %v762_v22 }
 0x25e   :  { %v701_v25 = vpop.f32.mrf.mxu2 }
 0x25f   :  { %v745_v27 = vadd.f32 %v3185_v26, %v701_v25 }
 0x261   :  { %v765_v37 = vsel %vm197_vm0, %v745_v27, 0.0 }
 0x262   :  { %766 = vadd.xlane.f32.xlu0 %v765_v37 }
 0x266   :  { %v704_v33 = vpop.f32.mrf.mxu2 }
 0x267   :  { %v746_v46 = vadd.f32 %v3186_v40, %v704_v33 }
 0x269   :  { %v768_v49 = vsel %vm197_vm0, %v746_v46, 0.0 }
 0x26a   :  { %769 = vadd.xlane.f32.xlu1 %v768_v49 }
 0x26e   :  { %v707_v52 = vpop.f32.mrf.mxu2 }
 0x26f   :  { %v3733_v31 = vadd.f32 %v3187_v45, %v707_v52  ;;  %v3192_v52 = vld [vmem:[%s4921_s0 + $0x48] sm:$0xff] }
 0x271   :  { %v771_v42 = vsel %vm197_vm0, %v3733_v31, 0.0 }
 0x272   :  { %772 = vadd.xlane.f32.xlu2 %v771_v42 }
 0x276   :  { %v710_v11 = vpop.f32.mrf.mxu2 }
 0x277   :  { %v3740_v60 = vadd.f32 %v3188_v63, %v710_v11 }
 0x279   :  { %v774_v2 = vsel %vm197_vm0, %v3740_v60, 0.0 }
 0x27a   :  { %775 = vadd.xlane.f32.xlu0 %v774_v2 }
 0x27e   :  { %v713_v29 = vpop.f32.mrf.mxu2 }
 0x27f   :  { %v3747_v3 = vadd.f32 %v3189_v56, %v713_v29  ;;  %v3193_v56 = vld [vmem:[%s4921_s0 + $0x50] sm:$0xff] }
 0x281   :  { %v777_v39 = vsel %vm197_vm0, %v3747_v3, 0.0 }
 0x282   :  { %778 = vadd.xlane.f32.xlu2 %v777_v39 }
 0x286   :  { %v716_v30 = vpop.f32.mrf.mxu2 }
 0x287   :  { %v3765_v16 = vadd.f32 %v3190_v5, %v716_v30  ;;  %v3194_v30 = vld [vmem:[%s4921_s0 + $0x58] sm:$0xff]  ;;  %v3195_v5 = vld [vmem:[%s4921_s0 + $0x60] sm:$0xff] }
 0x289   :  { %v780_v51 = vsel %vm197_vm0, %v3765_v16, 0.0 }
 0x28e   :  { %v719_v54 = vpop.f32.mrf.mxu2 }
 0x296   :  { %v722_v19 = vpop.f32.mrf.mxu2 }
 0x29e   :  { %v725_v49 = vpop.f32.mrf.mxu2 }
 0x29f   :  { %v3802_v39 = vadd.f32 %v3193_v56, %v725_v49 }
 0x2a1   :  { %v789_v7 = vsel %vm197_vm0, %v3802_v39, 0.0 }
 0x2a6   :  { %v728_v4 = vpop.f32.mrf.mxu2 }
 0x2c6   :  { %v761_v32 = vpop.xlane.xlu1 %760 }
 0x2c7   :  { %v814_v8 = vmul.f32 %v3751_v0, %v761_v32 }
 0x2c9   :  { %v3754_v9 = vsub.f32 %v743_v55, %v814_v8 }
 0x2cb   :  { %v846_v50 = vmul.f32 %v3754_v9, %v3754_v9 }
 0x2cd   :  { %v764_v28 = vpop.xlane.xlu2 %763  ;;  %v862_v10 = vsel %vm197_vm0, %v846_v50, 0.0 }
 0x2ce   :  { %v815_v12 = vmul.f32 %v3751_v0, %v764_v28  ;;  %863 = vadd.xlane.f32.xlu1 %v862_v10 }
 0x2d0   :  { %v3760_v47 = vsub.f32 %v744_v21, %v815_v12  ;;  %v3776_v21 = vadd.f32 %v3191_v48, %v719_v54  ;;  %v731_v54 = vpop.f32.mrf.mxu2 }
 0x2d2   :  { %v847_v17 = vmul.f32 %v3760_v47, %v3760_v47  ;;  %v783_v26 = vsel %vm197_vm0, %v3776_v21, 0.0 }
 0x2d4   :  { %v865_v18 = vsel %vm197_vm0, %v847_v17, 0.0 }
 0x2d5   :  { %866 = vadd.xlane.f32.xlu0 %v865_v18  ;;  %v767_v55 = vpop.xlane.xlu0 %766 }
 0x2d6   :  { %v816_v20 = vmul.f32 %v3751_v0, %v767_v55  ;;  %781 = vadd.xlane.f32.xlu1 %v780_v51 }
 0x2d8   :  { %v3778_v22 = vsub.f32 %v745_v27, %v816_v20  ;;  %v3789_v27 = vadd.f32 %v3192_v52, %v722_v19  ;;  %v734_v51 = vpop.f32.mrf.mxu2  ;;  %v3196_v20 = vld [vmem:[%s4921_s0 + $0x68] sm:$0xff] }
 0x2d9   :  { %v3843_v48 = vadd.f32 %v3196_v20, %v734_v51  ;;  %v3197_v20 = vld [vmem:[%s4921_s0 + $0x70] sm:$0xff] }
 0x2da   :  { %v848_v25 = vmul.f32 %v3778_v22, %v3778_v22  ;;  %v786_v63 = vsel %vm197_vm0, %v3789_v27, 0.0 }
 0x2dc   :  { %v868_v37 = vsel %vm197_vm0, %v848_v25, 0.0 }
 0x2dd   :  { %v770_v33 = vpop.xlane.xlu1 %769  ;;  %784 = vadd.xlane.f32.xlu0 %v783_v26  ;;  %869 = vadd.xlane.f32.xlu2 %v868_v37 }
 0x2de   :  { %v817_v40 = vmul.f32 %v3751_v0, %v770_v33  ;;  %v2713_v33 = vld [vmem:[%s4922_s3 + $0x38] sm:$0xff] }
 0x2df   :  { %1244 = vmatpush.msra.mxu0 %v2713_v33 }
 0x2e0   :  { %v3791_v45 = vsub.f32 %v746_v46, %v817_v40  ;;  %v2718_v40 = vld [vmem:[%s4919_s5 + $0x38] sm:$0xff]  ;;  %v737_v56 = vpop.f32.mrf.mxu2 }
 0x2e1   :  { %1325 = vmatpush.msra.mxu1 %v2718_v40 }
 0x2e2   :  { %v849_v42 = vmul.f32 %v3791_v45, %v3791_v45 }
 0x2e4   :  { %v871_v11 = vsel %vm197_vm0, %v849_v42, 0.0 }
 0x2e5   :  { %v773_v2 = vpop.xlane.xlu2 %772  ;;  %872 = vadd.xlane.f32.xlu1 %v871_v11  ;;  %787 = vadd.xlane.f32.xlu2 %v786_v63 }
 0x2e6   :  { %v818_v29 = vmul.f32 %v3751_v0, %v773_v2 }
 0x2e8   :  { %v3805_v46 = vsub.f32 %v3733_v31, %v818_v29  ;;  %v3816_v31 = vadd.f32 %v3194_v30, %v728_v4 }
 0x2ea   :  { %v850_v58 = vmul.f32 %v3805_v46, %v3805_v46  ;;  %v792_v50 = vsel %vm197_vm0, %v3816_v31, 0.0 }
 0x2ec   :  { %v874_v6 = vsel %vm197_vm0, %v850_v58, 0.0 }
 0x2ed   :  { %875 = vadd.xlane.f32.xlu0 %v874_v6  ;;  %790 = vadd.xlane.f32.xlu1 %v789_v7  ;;  %v776_v36 = vpop.xlane.xlu0 %775  ;;  %v2712_v7 = vld [vmem:[%s4922_s3 + $0x30] sm:$0xff] }
 0x2ee   :  { %v819_v61 = vmul.f32 %v3751_v0, %v776_v36  ;;  %v2717_v36 = vld [vmem:[%s4919_s5 + $0x30] sm:$0xff]  ;;  %1245 = vmatpush.msra.mxu0 %v2712_v7 }
 0x2ef   :  { %1326 = vmatpush.msra.mxu1 %v2717_v36 }
 0x2f0   :  { %v3819_v32 = vsub.f32 %v3740_v60, %v819_v61  ;;  %v3830_v60 = vadd.f32 %v3195_v5, %v731_v54  ;;  %v2716_v54 = vld [vmem:[%s4919_s5 + $0x28] sm:$0xff]  ;;  %v2715_v5 = vld [vmem:[%s4919_s5 + $0x20] sm:$0xff] }
 0x2f1   :  { %1327 = vmatpush.msra.mxu1 %v2716_v54 }
 0x2f2   :  { %v851_v8 = vmul.f32 %v3819_v32, %v3819_v32  ;;  %v795_v55 = vsel %vm197_vm0, %v3830_v60, 0.0 }
 0x2f3   :  { %1328 = vmatpush.msra.mxu1 %v2715_v5 }
 0x2f4   :  { %v877_v28 = vsel %vm197_vm0, %v851_v8, 0.0 }
 0x2f5   :  { %v779_v10 = vpop.xlane.xlu2 %778  ;;  %793 = vadd.xlane.f32.xlu0 %v792_v50  ;;  %878 = vadd.xlane.f32.xlu2 %v877_v28 }
 0x2f6   :  { %v820_v12 = vmul.f32 %v3751_v0, %v779_v10 }
 0x2f8   :  { %v3833_v17 = vsub.f32 %v3747_v3, %v820_v12  ;;  %v798_v3 = vsel %vm197_vm0, %v3843_v48, 0.0  ;;  %v2710_v12 = vld [vmem:[%s4922_s3 + $0x20] sm:$0xff] }
 0x2fa   :  { %v852_v18 = vmul.f32 %v3833_v17, %v3833_v17 }
 0x2fc   :  { %v880_v19 = vsel %vm197_vm0, %v852_v18, 0.0 }
 0x2fd   :  { %881 = vadd.xlane.f32.xlu1 %v880_v19  ;;  %796 = vadd.xlane.f32.xlu2 %v795_v55 }
 0x305   :  { %799 = vadd.xlane.f32.xlu1 %v798_v3  ;;  %v3893_v3 = vadd.f32 %v3197_v20, %v737_v56 }
 0x341   :  { %v864_v25 = vpop.xlane.xlu1 %863 }
 0x342   :  { %v910_v26 = vmul.f32 %v864_v25, %v3751_v0 }
 0x344   :  { %v926_v37 = vadd.f32 1e-05, %v910_v26 }
 0x346   :  { %3023 = vrsqrt.f32 %v926_v37  ;;  %vm948_vm6 = vweird.f32 %v926_v37 }
 0x348   :  { %v867_v49 = vpop.xlane.xlu0 %866 }
 0x349   :  { %v911_v52 = vmul.f32 %v867_v49, %v3751_v0  ;;  %v782_v42 = vpop.xlane.xlu1 %781  ;;  %v740_v49 = vpop.f32.mrf.mxu2 }
 0x34a   :  { %v821_v11 = vmul.f32 %v3751_v0, %v782_v42 }
 0x34b   :  { %v3856_v63 = vadd.f32 1e-05, %v911_v52 }
 0x34c   :  { %v3024_v2 = vpop.eup %3023  ;;  %v3859_v29 = vsub.f32 %v3765_v16, %v821_v11  ;;  %v2711_v16 = vld [vmem:[%s4922_s3 + $0x28] sm:$0xff] }
 0x34d   :  { %v943_v4 = vmul.f32 %v3024_v2, %v926_v37  ;;  %3025 = vrsqrt.f32 %v3856_v63  ;;  %1246 = vmatpush.msra.mxu0 %v2711_v16  ;;  %vm949_vm5 = vweird.f32 %v3024_v2  ;;  %vm958_vm9 = vweird.f32 %v3856_v63 }
 0x34e   :  { %v853_v58 = vmul.f32 %v3859_v29, %v3859_v29  ;;  %vm950_vm7 = vmor %vm948_vm6, %vm949_vm5 }
 0x34f   :  { %v944_v6 = vmul.f32 %v3024_v2, %v943_v4  ;;  %1247 = vmatpush.msra.mxu0 %v2710_v12 }
 0x350   :  { %v870_v61 = vpop.xlane.xlu2 %869  ;;  %v785_v30 = vpop.xlane.xlu0 %784  ;;  %v883_v8 = vsel %vm197_vm0, %v853_v58, 0.0  ;;  %v801_v58 = vsel %vm197_vm0, %v3893_v3, 0.0 }
 0x351   :  { %v945_v50 = vmul.f32 0.5, %v944_v6  ;;  %v912_v28 = vmul.f32 %v870_v61, %v3751_v0  ;;  %v822_v10 = vmul.f32 %v3751_v0, %v785_v30  ;;  %884 = vadd.xlane.f32.xlu0 %v883_v8  ;;  %v3911_v6 = vld [vmem:[%s4928_s10] ss:$0 sm:$0xff]  ;;  %v3198_v61 = vld [vmem:[%s4921_s0 + $0x78] sm:$0xff] }
 0x352   :  { %v3919_v30 = vadd.f32 %v3198_v61, %v740_v49 }
 0x353   :  { %v3026_v18 = vpop.eup %3025  ;;  %v946_v19 = vsub.f32 1.5, %v945_v50  ;;  %v3885_v55 = vadd.f32 1e-05, %v912_v28  ;;  %v3888_v51 = vsub.f32 %v3776_v21, %v822_v10  ;;  %v3902_v21 = vld [vmem:[%s4927_s9] ss:$0 sm:$0xff] }
 0x354   :  { %v953_v25 = vmul.f32 %v3026_v18, %v3856_v63  ;;  %vm959_vm8 = vweird.f32 %v3026_v18  ;;  %v804_v20 = vsel %vm197_vm0, %v3919_v30, 0.0 }
 0x355   :  { %v947_v26 = vmul.f32 %v3024_v2, %v946_v19  ;;  %3027 = vrsqrt.f32 %v3885_v55  ;;  %v854_v33 = vmul.f32 %v3888_v51, %v3888_v51  ;;  %vm960_vm10 = vmor %vm958_vm9, %vm959_vm8  ;;  %vm968_vm12 = vweird.f32 %v3885_v55 }
 0x356   :  { %v954_v40 = vmul.f32 %v3026_v18, %v953_v25 }
 0x357   :  { %v951_v52 = vsel %vm950_vm7, %v3024_v2, %v947_v26  ;;  %v886_v42 = vsel %vm197_vm0, %v854_v33, 0.0 }
 0x358   :  { %v1102_v11 = vmul.f32 %v951_v52, %v3754_v9  ;;  %v955_v56 = vmul.f32 0.5, %v954_v40  ;;  %v873_v37 = vpop.xlane.xlu1 %872  ;;  %v788_v4 = vpop.xlane.xlu2 %787  ;;  %887 = vadd.xlane.f32.xlu2 %v886_v42 }
 0x359   :  { %v913_v7 = vmul.f32 %v873_v37, %v3751_v0  ;;  %v823_v2 = vmul.f32 %v3751_v0, %v788_v4  ;;  %802 = vadd.xlane.f32.xlu0 %v801_v58 }
 0x35a   :  { %v1121_v36 = vmul.f32 %v3902_v21, %v1102_v11  ;;  %v956_v9 = vsub.f32 1.5, %v955_v56 }
 0x35b   :  { %v3028_v16 = vpop.eup %3027  ;;  %v929_v8 = vadd.f32 1e-05, %v913_v7  ;;  %v3922_v54 = vsub.f32 %v3789_v27, %v823_v2 }
 0x35c   :  { %v957_v50 = vmul.f32 %v3026_v18, %v956_v9  ;;  %v963_v28 = vmul.f32 %v3028_v16, %v3885_v55  ;;  %v3927_v10 = vadd.f32 %v3911_v6, %v1121_v36  ;;  %vm969_vm11 = vweird.f32 %v3028_v16 }
 0x35d   :  { %3029 = vrsqrt.f32 %v929_v8  ;;  %v855_v12 = vmul.f32 %v3922_v54, %v3922_v54  ;;  %vm970_vm13 = vmor %vm968_vm12, %vm969_vm11  ;;  %vm978_vm15 = vweird.f32 %v929_v8 }
 0x35e   :  { %v961_v5 = vsel %vm960_vm10, %v3026_v18, %v957_v50  ;;  %v964_v19 = vmul.f32 %v3028_v16, %v963_v28  ;;  %2727 = vmatmul.msk.f32.vlgmr.msra.gmra.mxu0 %vm197_vm0, %v3927_v10  ;;  %2743 = vmatmul.msk.f32.vlgmr.msra.gmra.mxu1 %vm197_vm0, %v3927_v10 }
 0x35f   :  { %v1103_v27 = vmul.f32 %v961_v5, %v3760_v47  ;;  %v889_v63 = vsel %vm197_vm0, %v855_v12, 0.0 }
 0x360   :  { %v965_v25 = vmul.f32 0.5, %v964_v19  ;;  %v791_v26 = vpop.xlane.xlu1 %790  ;;  %890 = vadd.xlane.f32.xlu1 %v889_v63  ;;  %805 = vadd.xlane.f32.xlu2 %v804_v20  ;;  %v876_v33 = vpop.xlane.xlu0 %875 }
 0x361   :  { %v824_v18 = vmul.f32 %v3751_v0, %v791_v26  ;;  %v914_v40 = vmul.f32 %v876_v33, %v3751_v0  ;;  %v1122_v49 = vmul.f32 %v3902_v21, %v1103_v27 }
 0x362   :  { %v966_v52 = vsub.f32 1.5, %v965_v25 }
 0x363   :  { %v3030_v42 = vpop.eup %3029  ;;  %v3943_v47 = vsub.f32 %v3802_v39, %v824_v18  ;;  %v930_v11 = vadd.f32 1e-05, %v914_v40  ;;  %v3947_v4 = vadd.f32 %v3911_v6, %v1122_v49 }
 0x364   :  { %v967_v56 = vmul.f32 %v3028_v16, %v966_v52  ;;  %v973_v37 = vmul.f32 %v3030_v42, %v929_v8  ;;  %vm979_vm14 = vweird.f32 %v3030_v42 }
 0x365   :  { %3031 = vrsqrt.f32 %v930_v11  ;;  %v856_v58 = vmul.f32 %v3943_v47, %v3943_v47  ;;  %vm980_vm1 = vmor %vm978_vm15, %vm979_vm14  ;;  %vm988_vm3 = vweird.f32 %v930_v11 }
 0x366   :  { %v971_v7 = vsel %vm970_vm13, %v3028_v16, %v967_v56  ;;  %v974_v2 = vmul.f32 %v3030_v42, %v973_v37  ;;  %2728 = vmatmul.msk.f32.gmra.mxu0 %vm197_vm0, %v3947_v4  ;;  %2744 = vmatmul.msk.f32.gmra.mxu1 %vm197_vm0, %v3947_v4 }
 0x367   :  { %v1104_v39 = vmul.f32 %v971_v7, %v3778_v22  ;;  %v892_v55 = vsel %vm197_vm0, %v856_v58, 0.0 }
 0x368   :  { %v975_v36 = vmul.f32 0.5, %v974_v2  ;;  %893 = vadd.xlane.f32.xlu0 %v892_v55  ;;  %v879_v9 = vpop.xlane.xlu2 %878  ;;  %v794_v61 = vpop.xlane.xlu0 %793 }
 0x369   :  { %v915_v50 = vmul.f32 %v879_v9, %v3751_v0  ;;  %v825_v28 = vmul.f32 %v3751_v0, %v794_v61  ;;  %v1123_v16 = vmul.f32 %v3902_v21, %v1104_v39 }
 0x36a   :  { %v976_v12 = vsub.f32 1.5, %v975_v36 }
 0x36b   :  { %v3032_v5 = vpop.eup %3031  ;;  %v931_v19 = vadd.f32 1e-05, %v915_v50  ;;  %v3961_v27 = vsub.f32 %v3816_v31, %v825_v28  ;;  %v3964_v20 = vadd.f32 %v3911_v6, %v1123_v16 }
 0x36c   :  { %v977_v22 = vmul.f32 %v3030_v42, %v976_v12  ;;  %v983_v63 = vmul.f32 %v3032_v5, %v930_v11  ;;  %vm989_vm2 = vweird.f32 %v3032_v5 }
 0x36d   :  { %3033 = vrsqrt.f32 %v931_v19  ;;  %v857_v25 = vmul.f32 %v3961_v27, %v3961_v27  ;;  %vm990_vm4 = vmor %vm988_vm3, %vm989_vm2  ;;  %vm998_vm6 = vweird.f32 %v931_v19 }
 0x36e   :  { %v981_v26 = vsel %vm980_vm1, %v3030_v42, %v977_v22  ;;  %v984_v33 = vmul.f32 %v3032_v5, %v983_v63  ;;  %2729 = vmatmul.msk.f32.gmra.mxu0 %vm197_vm0, %v3964_v20  ;;  %2745 = vmatmul.msk.f32.gmra.mxu1 %vm197_vm0, %v3964_v20 }
 0x36f   :  { %v1105_v31 = vmul.f32 %v981_v26, %v3791_v45  ;;  %v895_v8 = vsel %vm197_vm0, %v857_v25, 0.0 }
 0x370   :  { %v985_v18 = vmul.f32 0.5, %v984_v33  ;;  %v882_v40 = vpop.xlane.xlu1 %881  ;;  %v797_v49 = vpop.xlane.xlu2 %796  ;;  %896 = vadd.xlane.f32.xlu1 %v895_v8 }
 0x371   :  { %v916_v52 = vmul.f32 %v882_v40, %v3751_v0  ;;  %v826_v56 = vmul.f32 %v3751_v0, %v797_v49  ;;  %v1124_v42 = vmul.f32 %v3902_v21, %v1105_v31 }
 0x372   :  { %v986_v37 = vsub.f32 1.5, %v985_v18 }
 0x373   :  { %v3034_v58 = vpop.eup %3033  ;;  %v932_v7 = vadd.f32 1e-05, %v916_v52  ;;  %v3978_v2 = vsub.f32 %v3830_v60, %v826_v56  ;;  %v3981_v55 = vadd.f32 %v3911_v6, %v1124_v42 }
 0x374   :  { %v987_v45 = vmul.f32 %v3032_v5, %v986_v37  ;;  %v993_v39 = vmul.f32 %v3034_v58, %v931_v19  ;;  %vm999_vm5 = vweird.f32 %v3034_v58 }
 0x375   :  { %3035 = vrsqrt.f32 %v932_v7  ;;  %v858_v36 = vmul.f32 %v3978_v2, %v3978_v2  ;;  %vm1000_vm7 = vmor %vm998_vm6, %vm999_vm5  ;;  %vm1008_vm9 = vweird.f32 %v932_v7 }
 0x376   :  { %v991_v9 = vsel %vm990_vm4, %v3032_v5, %v987_v45  ;;  %v994_v61 = vmul.f32 %v3034_v58, %v993_v39  ;;  %2730 = vmatmul.msk.f32.gmra.mxu0 %vm197_vm0, %v3981_v55  ;;  %2746 = vmatmul.msk.f32.gmra.mxu1 %vm197_vm0, %v3981_v55 }
 0x377   :  { %v1106_v60 = vmul.f32 %v991_v9, %v3805_v46  ;;  %v898_v11 = vsel %vm197_vm0, %v858_v36, 0.0 }
 0x378   :  { %v995_v50 = vmul.f32 0.5, %v994_v61  ;;  %v800_v28 = vpop.xlane.xlu1 %799  ;;  %899 = vadd.xlane.f32.xlu2 %v898_v11 }
 0x379   :  { %v827_v16 = vmul.f32 %v3751_v0, %v800_v28  ;;  %v1125_v12 = vmul.f32 %v3902_v21, %v1106_v60 }
 0x37a   :  { %v996_v22 = vsub.f32 1.5, %v995_v50 }
 0x37b   :  { %v3036_v5 = vpop.eup %3035  ;;  %v3994_v63 = vsub.f32 %v3843_v48, %v827_v16  ;;  %v3997_v46 = vadd.f32 %v3911_v6, %v1125_v12 }
 0x37c   :  { %v997_v25 = vmul.f32 %v3034_v58, %v996_v22  ;;  %v1003_v26 = vmul.f32 %v3036_v5, %v932_v7  ;;  %vm1009_vm8 = vweird.f32 %v3036_v5 }
 0x37d   :  { %v859_v33 = vmul.f32 %v3994_v63, %v3994_v63  ;;  %vm1010_vm10 = vmor %vm1008_vm9, %vm1009_vm8 }
 0x37e   :  { %v1001_v31 = vsel %vm1000_vm7, %v3034_v58, %v997_v25  ;;  %v1004_v8 = vmul.f32 %v3036_v5, %v1003_v26  ;;  %2731 = vmatmul.msk.f32.gmra.mxu0 %vm197_vm0, %v3997_v46  ;;  %2747 = vmatmul.msk.f32.gmra.mxu1 %vm197_vm0, %v3997_v46 }
 0x37f   :  { %v1107_v48 = vmul.f32 %v1001_v31, %v3819_v32  ;;  %v901_v19 = vsel %vm197_vm0, %v859_v33, 0.0 }
 0x380   :  { %v1005_v18 = vmul.f32 0.5, %v1004_v8  ;;  %902 = vadd.xlane.f32.xlu0 %v901_v19 }
 0x381   :  { %v1126_v40 = vmul.f32 %v3902_v21, %v1107_v48 }
 0x382   :  { %v1006_v49 = vsub.f32 1.5, %v1005_v18 }
 0x383   :  { %v4009_v56 = vadd.f32 %v3911_v6, %v1126_v40 }
 0x384   :  { %v1007_v52 = vmul.f32 %v3036_v5, %v1006_v49 }
 0x386   :  { %v1011_v42 = vsel %vm1010_vm10, %v3036_v5, %v1007_v52  ;;  %2732 = vmatmul.msk.f32.gmra.mxu0 %vm197_vm0, %v4009_v56  ;;  %2748 = vmatmul.msk.f32.gmra.mxu1 %vm197_vm0, %v4009_v56  ;;  %v4043_v52 = vld [vmem:[%s4923_s4 + $0x1] ss:$0 sm:$0xff] }
 0x387   :  { %v1108_v32 = vmul.f32 %v1011_v42, %v3833_v17 }
 0x389   :  { %v1127_v37 = vmul.f32 %v3902_v21, %v1108_v32 }
 0x38b   :  { %v4018_v58 = vadd.f32 %v3911_v6, %v1127_v37 }
 0x38e   :  { %2733 = vmatmul.msk.f32.gmra.mxu0 %vm197_vm0, %v4018_v58  ;;  %2749 = vmatmul.msk.f32.gmra.mxu1 %vm197_vm0, %v4018_v58 }
 0x3c4   :  { %v885_v7 = vpop.xlane.xlu0 %884 }
 0x3c5   :  { %v917_v45 = vmul.f32 %v885_v7, %v3751_v0 }
 0x3c7   :  { %v933_v39 = vadd.f32 1e-05, %v917_v45 }
 0x3c9   :  { %3037 = vrsqrt.f32 %v933_v39  ;;  %vm1018_vm12 = vweird.f32 %v933_v39 }
 0x3cb   :  { %v888_v36 = vpop.xlane.xlu2 %887 }
 0x3cc   :  { %v918_v9 = vmul.f32 %v888_v36, %v3751_v0  ;;  %v803_v17 = vpop.xlane.xlu0 %802 }
 0x3cd   :  { %v828_v61 = vmul.f32 %v3751_v0, %v803_v17 }
 0x3ce   :  { %v934_v60 = vadd.f32 1e-05, %v918_v9 }
 0x3cf   :  { %v3038_v11 = vpop.eup %3037  ;;  %v4028_v50 = vsub.f32 %v3893_v3, %v828_v61 }
 0x3d0   :  { %v1013_v28 = vmul.f32 %v3038_v11, %v933_v39  ;;  %3039 = vrsqrt.f32 %v934_v60  ;;  %vm1019_vm11 = vweird.f32 %v3038_v11  ;;  %vm1028_vm15 = vweird.f32 %v934_v60 }
 0x3d1   :  { %v860_v16 = vmul.f32 %v4028_v50, %v4028_v50  ;;  %vm1020_vm13 = vmor %vm1018_vm12, %vm1019_vm11 }
 0x3d2   :  { %v1014_v12 = vmul.f32 %v3038_v11, %v1013_v28 }
 0x3d3   :  { %v891_v22 = vpop.xlane.xlu1 %890  ;;  %v806_v5 = vpop.xlane.xlu2 %805  ;;  %v904_v25 = vsel %vm197_vm0, %v860_v16, 0.0 }
 0x3d4   :  { %v1015_v26 = vmul.f32 0.5, %v1014_v12  ;;  %v919_v33 = vmul.f32 %v891_v22, %v3751_v0  ;;  %v829_v31 = vmul.f32 %v3751_v0, %v806_v5  ;;  %905 = vadd.xlane.f32.xlu1 %v904_v25  ;;  %v4060_v25 = vld [vmem:[%s4925_s6 + $0x1] ss:$0 sm:$0xff] }
 0x3d6   :  { %v3040_v8 = vpop.eup %3039  ;;  %v1016_v48 = vsub.f32 1.5, %v1015_v26  ;;  %v935_v3 = vadd.f32 1e-05, %v919_v33  ;;  %v4036_v19 = vsub.f32 %v3919_v30, %v829_v31 }
 0x3d7   :  { %v1023_v18 = vmul.f32 %v3040_v8, %v934_v60  ;;  %vm1029_vm14 = vweird.f32 %v3040_v8 }
 0x3d8   :  { %v1017_v40 = vmul.f32 %v3038_v11, %v1016_v48  ;;  %3041 = vrsqrt.f32 %v935_v3  ;;  %v861_v49 = vmul.f32 %v4036_v19, %v4036_v19  ;;  %vm1030_vm1 = vmor %vm1028_vm15, %vm1029_vm14  ;;  %vm1038_vm3 = vweird.f32 %v935_v3 }
 0x3d9   :  { %v1024_v42 = vmul.f32 %v3040_v8, %v1023_v18 }
 0x3da   :  { %v1021_v32 = vsel %vm1020_vm13, %v3038_v11, %v1017_v40  ;;  %v907_v37 = vsel %vm197_vm0, %v861_v49, 0.0 }
 0x3db   :  { %v1109_v30 = vmul.f32 %v1021_v32, %v3859_v29  ;;  %v1025_v7 = vmul.f32 0.5, %v1024_v42  ;;  %908 = vadd.xlane.f32.xlu2 %v907_v37  ;;  %v894_v45 = vpop.xlane.xlu0 %893  ;;  %v1249_v39 = vpop.f32.mrf.mxu0 }
 0x3dc   :  { %v920_v36 = vmul.f32 %v894_v45, %v3751_v0  ;;  %v1250_v9 = vadd.f32 %v4043_v52, %v1249_v39 }
 0x3dd   :  { %v1026_v17 = vsub.f32 1.5, %v1025_v7  ;;  %v1128_v61 = vmul.f32 %v3902_v21, %v1109_v30 }
 0x3de   :  { %v3042_v28 = vpop.eup %3041  ;;  %v936_v16 = vadd.f32 1e-05, %v920_v36  ;;  %3043 = vtanh.f32 %v1250_v9 }
 0x3df   :  { %v1027_v11 = vmul.f32 %v3040_v8, %v1026_v17  ;;  %v1033_v12 = vmul.f32 %v3042_v28, %v935_v3  ;;  %v4051_v29 = vadd.f32 %v3911_v6, %v1128_v61  ;;  %vm1039_vm2 = vweird.f32 %v3042_v28 }
 0x3e0   :  { %3045 = vrsqrt.f32 %v936_v16  ;;  %vm1040_vm4 = vmor %vm1038_vm3, %vm1039_vm2  ;;  %vm1048_vm6 = vweird.f32 %v936_v16 }
 0x3e1   :  { %v1031_v22 = vsel %vm1030_vm1, %v3040_v8, %v1027_v11  ;;  %v1034_v5 = vmul.f32 %v3042_v28, %v1033_v12  ;;  %2734 = vmatmul.msk.f32.gmra.mxu0 %vm197_vm0, %v4051_v29  ;;  %2750 = vmatmul.msk.f32.gmra.mxu1 %vm197_vm0, %v4051_v29 }
 0x3e2   :  { %v1110_v60 = vmul.f32 %v1031_v22, %v3888_v51 }
 0x3e3   :  { %v1035_v26 = vmul.f32 0.5, %v1034_v5  ;;  %v897_v33 = vpop.xlane.xlu1 %896  ;;  %v1252_v31 = vpop.f32.mrf.mxu0 }
 0x3e4   :  { %v3044_v48 = vpop.eup %3043  ;;  %v921_v8 = vmul.f32 %v897_v33, %v3751_v0  ;;  %v1253_v18 = vadd.f32 %v4043_v52, %v1252_v31  ;;  %v1129_v40 = vmul.f32 %v3902_v21, %v1110_v60 }
 0x3e5   :  { %v1036_v49 = vsub.f32 1.5, %v1035_v26  ;;  %v1397_v42 = vmul.f32 %v3044_v48, %v4060_v25 }
 0x3e6   :  { %v3046_v32 = vpop.eup %3045  ;;  %v937_v37 = vadd.f32 1e-05, %v921_v8  ;;  %3047 = vtanh.f32 %v1253_v18  ;;  %v4069_v45 = vadd.f32 %v3911_v6, %v1129_v40 }
 0x3e7   :  { %v1037_v30 = vmul.f32 %v3042_v28, %v1036_v49  ;;  %v1043_v51 = vmul.f32 %v3046_v32, %v936_v16  ;;  %v1413_v7 = vsel %vm197_vm0, %v1397_v42, 0.0  ;;  %vm1049_vm5 = vweird.f32 %v3046_v32 }
 0x3e8   :  { %3049 = vrsqrt.f32 %v937_v37  ;;  %1414 = vadd.xlane.f32.xlu0 %v1413_v7  ;;  %vm1050_vm7 = vmor %vm1048_vm6, %vm1049_vm5  ;;  %vm1058_vm9 = vweird.f32 %v937_v37 }
 0x3e9   :  { %v1041_v39 = vsel %vm1040_vm4, %v3042_v28, %v1037_v30  ;;  %v1044_v36 = vmul.f32 %v3046_v32, %v1043_v51  ;;  %2735 = vmatmul.msk.f32.gmra.mxu0 %vm197_vm0, %v4069_v45  ;;  %2751 = vmatmul.msk.f32.gmra.mxu1 %vm197_vm0, %v4069_v45 }
 0x3ea   :  { %v1111_v3 = vmul.f32 %v1041_v39, %v3922_v54 }
 0x3eb   :  { %v1045_v9 = vmul.f32 0.5, %v1044_v36  ;;  %v900_v17 = vpop.xlane.xlu2 %899  ;;  %v1255_v61 = vpop.f32.mrf.mxu0 }
 0x3ec   :  { %v3048_v11 = vpop.eup %3047  ;;  %v922_v12 = vmul.f32 %v900_v17, %v3751_v0  ;;  %v1256_v22 = vadd.f32 %v4043_v52, %v1255_v61  ;;  %v1130_v5 = vmul.f32 %v3902_v21, %v1111_v3 }
 0x3ed   :  { %v1046_v28 = vsub.f32 1.5, %v1045_v9  ;;  %v1398_v60 = vmul.f32 %v3048_v11, %v4060_v25 }
 0x3ee   :  { %v3050_v26 = vpop.eup %3049  ;;  %v938_v33 = vadd.f32 1e-05, %v922_v12  ;;  %3051 = vtanh.f32 %v1256_v22  ;;  %v4082_v8 = vadd.f32 %v3911_v6, %v1130_v5 }
 0x3ef   :  { %v1047_v31 = vmul.f32 %v3046_v32, %v1046_v28  ;;  %v1053_v54 = vmul.f32 %v3050_v26, %v937_v37  ;;  %v1416_v48 = vsel %vm197_vm0, %v1398_v60, 0.0  ;;  %vm1059_vm8 = vweird.f32 %v3050_v26 }
 0x3f0   :  { %3053 = vrsqrt.f32 %v938_v33  ;;  %1417 = vadd.xlane.f32.xlu1 %v1416_v48  ;;  %vm1060_vm10 = vmor %vm1058_vm9, %vm1059_vm8  ;;  %vm1068_vm12 = vweird.f32 %v938_v33  ;;  %vm2391_vm8 = vcmask 7168  }
 0x3f1   :  { %v1051_v18 = vsel %vm1050_vm7, %v3046_v32, %v1047_v31  ;;  %v1054_v40 = vmul.f32 %v3050_v26, %v1053_v54  ;;  %2736 = vmatmul.msk.f32.gmra.mxu0 %vm197_vm0, %v4082_v8  ;;  %2752 = vmatmul.msk.f32.gmra.mxu1 %vm197_vm0, %v4082_v8 }
 0x3f2   :  { %v1112_v16 = vmul.f32 %v1051_v18, %v3943_v47 }
 0x3f3   :  { %v1055_v49 = vmul.f32 0.5, %v1054_v40  ;;  %v903_v42 = vpop.xlane.xlu0 %902  ;;  %v1258_v30 = vpop.f32.mrf.mxu0 }
 0x3f4   :  { %v3052_v51 = vpop.eup %3051  ;;  %v923_v7 = vmul.f32 %v903_v42, %v3751_v0  ;;  %v1259_v39 = vadd.f32 %v4043_v52, %v1258_v30  ;;  %v1131_v36 = vmul.f32 %v3902_v21, %v1112_v16 }
 0x3f5   :  { %v1056_v32 = vsub.f32 1.5, %v1055_v49  ;;  %v1399_v3 = vmul.f32 %v3052_v51, %v4060_v25 }
 0x3f6   :  { %v3054_v9 = vpop.eup %3053  ;;  %v939_v17 = vadd.f32 1e-05, %v923_v7  ;;  %3055 = vtanh.f32 %v1259_v39  ;;  %v4095_v12 = vadd.f32 %v3911_v6, %v1131_v36 }
 0x3f7   :  { %v1057_v61 = vmul.f32 %v3050_v26, %v1056_v32  ;;  %v1063_v47 = vmul.f32 %v3054_v9, %v938_v33  ;;  %v1419_v11 = vsel %vm197_vm0, %v1399_v3, 0.0  ;;  %vm1069_vm11 = vweird.f32 %v3054_v9 }
 0x3f8   :  { %3057 = vrsqrt.f32 %v939_v17  ;;  %1420 = vadd.xlane.f32.xlu2 %v1419_v11  ;;  %vm1070_vm13 = vmor %vm1068_vm12, %vm1069_vm11  ;;  %vm1078_vm15 = vweird.f32 %v939_v17 }
 0x3f9   :  { %v1061_v22 = vsel %vm1060_vm10, %v3050_v26, %v1057_v61  ;;  %v1064_v5 = vmul.f32 %v3054_v9, %v1063_v47  ;;  %2737 = vmatmul.msk.f32.gmra.mxu0 %vm197_vm0, %v4095_v12  ;;  %2753 = vmatmul.msk.f32.gmra.mxu1 %vm197_vm0, %v4095_v12 }
 0x3fa   :  { %v1113_v37 = vmul.f32 %v1061_v22, %v3961_v27 }
 0x3fb   :  { %v1065_v28 = vmul.f32 0.5, %v1064_v5  ;;  %v1261_v60 = vpop.f32.mrf.mxu0 }
 0x3fc   :  { %v3056_v31 = vpop.eup %3055  ;;  %v1262_v54 = vadd.f32 %v4043_v52, %v1261_v60  ;;  %v1132_v48 = vmul.f32 %v3902_v21, %v1113_v37 }
 0x3fd   :  { %v1066_v18 = vsub.f32 1.5, %v1065_v28  ;;  %v1400_v26 = vmul.f32 %v3056_v31, %v4060_v25 }
 0x3fe   :  { %v3058_v40 = vpop.eup %3057  ;;  %3059 = vtanh.f32 %v1262_v54  ;;  %v4107_v27 = vadd.f32 %v3911_v6, %v1132_v48 }
 0x3ff   :  { %v1067_v16 = vmul.f32 %v3054_v9, %v1066_v18  ;;  %v1073_v49 = vmul.f32 %v3058_v40, %v939_v17  ;;  %v1422_v42 = vsel %vm197_vm0, %v1400_v26, 0.0  ;;  %vm1079_vm14 = vweird.f32 %v3058_v40 }
 0x400   :  { %1423 = vadd.xlane.f32.xlu0 %v1422_v42  ;;  %vm1080_vm1 = vmor %vm1078_vm15, %vm1079_vm14 }
 0x401   :  { %v1071_v30 = vsel %vm1070_vm13, %v3054_v9, %v1067_v16  ;;  %v1074_v51 = vmul.f32 %v3058_v40, %v1073_v49  ;;  %2738 = vmatmul.msk.f32.gmra.mxu0 %vm197_vm0, %v4107_v27  ;;  %2754 = vmatmul.msk.f32.gmra.mxu1 %vm197_vm0, %v4107_v27 }
 0x402   :  { %v1114_v33 = vmul.f32 %v1071_v30, %v3978_v2 }
 0x403   :  { %v1075_v7 = vmul.f32 0.5, %v1074_v51  ;;  %v1264_v39 = vpop.f32.mrf.mxu0 }
 0x404   :  { %v3060_v36 = vpop.eup %3059  ;;  %v1265_v32 = vadd.f32 %v4043_v52, %v1264_v39  ;;  %v1133_v3 = vmul.f32 %v3902_v21, %v1114_v33 }
 0x405   :  { %v1076_v61 = vsub.f32 1.5, %v1075_v7  ;;  %v1401_v9 = vmul.f32 %v3060_v36, %v4060_v25 }
 0x406   :  { %3061 = vtanh.f32 %v1265_v32  ;;  %v4119_v22 = vadd.f32 %v3911_v6, %v1133_v3  ;;  %v4141_v3 = vpop.f32.mrf.mxu1 }
 0x407   :  { %v1077_v47 = vmul.f32 %v3058_v40, %v1076_v61  ;;  %v1425_v11 = vsel %vm197_vm0, %v1401_v9, 0.0 }
 0x408   :  { %1426 = vadd.xlane.f32.xlu1 %v1425_v11 }
 0x409   :  { %v1081_v2 = vsel %vm1080_vm1, %v3058_v40, %v1077_v47  ;;  %2739 = vmatmul.msk.f32.gmra.mxu0 %vm197_vm0, %v4119_v22  ;;  %2755 = vmatmul.msk.f32.gmra.mxu1 %vm197_vm0, %v4119_v22 }
 0x40a   :  { %v1115_v5 = vmul.f32 %v1081_v2, %v3994_v63 }
 0x40b   :  { %v1267_v37 = vpop.f32.mrf.mxu0 }
 0x40c   :  { %v3062_v28 = vpop.eup %3061  ;;  %v1268_v17 = vadd.f32 %v4043_v52, %v1267_v37  ;;  %v1134_v60 = vmul.f32 %v3902_v21, %v1115_v5 }
 0x40d   :  { %v1402_v31 = vmul.f32 %v3062_v28, %v4060_v25 }
 0x40e   :  { %3063 = vtanh.f32 %v1268_v17  ;;  %v4131_v48 = vadd.f32 %v3911_v6, %v1134_v60 }
 0x40f   :  { %v1428_v54 = vsel %vm197_vm0, %v1402_v31, 0.0 }
 0x410   :  { %1429 = vadd.xlane.f32.xlu2 %v1428_v54 }
 0x411   :  { %2740 = vmatmul.msk.f32.gmra.mxu0 %vm197_vm0, %v4131_v48  ;;  %2756 = vmatmul.msk.f32.gmra.mxu1 %vm197_vm0, %v4131_v48 }
 0x414   :  { %v3064_v63 = vpop.eup %3063 }
 0x415   :  { %v1403_v18 = vmul.f32 %v3064_v63, %v4060_v25 }
 0x417   :  { %v1431_v26 = vsel %vm197_vm0, %v1403_v18, 0.0  ;;  %v4149_v18 = vpop.f32.mrf.mxu1 }
 0x418   :  { %1432 = vadd.xlane.f32.xlu0 %v1431_v26 }
 0x447   :  { %v906_v40 = vpop.xlane.xlu1 %905 }
 0x448   :  { %v924_v16 = vmul.f32 %v906_v40, %v3751_v0 }
 0x44a   :  { %v940_v49 = vadd.f32 1e-05, %v924_v16 }
 0x44c   :  { %3065 = vrsqrt.f32 %v940_v49  ;;  %vm1088_vm3 = vweird.f32 %v940_v49 }
 0x44e   :  { %v909_v42 = vpop.xlane.xlu2 %908 }
 0x44f   :  { %v925_v30 = vmul.f32 %v909_v42, %v3751_v0 }
 0x451   :  { %v941_v51 = vadd.f32 1e-05, %v925_v30 }
 0x452   :  { %v3066_v33 = vpop.eup %3065 }
 0x453   :  { %v1083_v7 = vmul.f32 %v3066_v33, %v940_v49  ;;  %3067 = vrsqrt.f32 %v941_v51  ;;  %vm1089_vm2 = vweird.f32 %v3066_v33  ;;  %vm1098_vm6 = vweird.f32 %v941_v51 }
 0x454   :  { %vm1090_vm4 = vmor %vm1088_vm3, %vm1089_vm2 }
 0x455   :  { %v1084_v39 = vmul.f32 %v3066_v33, %v1083_v7 }
 0x457   :  { %v1085_v36 = vmul.f32 0.5, %v1084_v39 }
 0x459   :  { %v3068_v32 = vpop.eup %3067  ;;  %v1086_v61 = vsub.f32 1.5, %v1085_v36 }
 0x45a   :  { %v1093_v9 = vmul.f32 %v3068_v32, %v941_v51  ;;  %vm1099_vm5 = vweird.f32 %v3068_v32 }
 0x45b   :  { %v1087_v47 = vmul.f32 %v3066_v33, %v1086_v61  ;;  %vm1100_vm7 = vmor %vm1098_vm6, %vm1099_vm5 }
 0x45c   :  { %v1094_v11 = vmul.f32 %v3068_v32, %v1093_v9 }
 0x45d   :  { %v1091_v2 = vsel %vm1090_vm4, %v3066_v33, %v1087_v47 }
 0x45e   :  { %v1116_v5 = vmul.f32 %v1091_v2, %v4028_v50  ;;  %v1095_v37 = vmul.f32 0.5, %v1094_v11  ;;  %v1270_v28 = vpop.f32.mrf.mxu0 }
 0x45f   :  { %v1271_v17 = vadd.f32 %v4043_v52, %v1270_v28 }
 0x460   :  { %v1096_v60 = vsub.f32 1.5, %v1095_v37  ;;  %v1135_v31 = vmul.f32 %v3902_v21, %v1116_v5 }
 0x461   :  { %3069 = vtanh.f32 %v1271_v17 }
 0x462   :  { %v1097_v54 = vmul.f32 %v3068_v32, %v1096_v60  ;;  %v4147_v63 = vadd.f32 %v3911_v6, %v1135_v31 }
 0x464   :  { %v1101_v26 = vsel %vm1100_vm7, %v3068_v32, %v1097_v54  ;;  %2741 = vmatmul.msk.f32.gmra.mxu0 %vm197_vm0, %v4147_v63  ;;  %2757 = vmatmul.msk.f32.gmra.mxu1 %vm197_vm0, %v4147_v63 }
 0x465   :  { %v1117_v50 = vmul.f32 %v1101_v26, %v4036_v19  ;;  %v4167_v19 = vpop.f32.mrf.mxu1 }
 0x466   :  { %v1273_v40 = vpop.f32.mrf.mxu0 }
 0x467   :  { %v3070_v16 = vpop.eup %3069  ;;  %v1274_v49 = vadd.f32 %v4043_v52, %v1273_v40  ;;  %v1136_v42 = vmul.f32 %v3902_v21, %v1117_v50 }
 0x468   :  { %v1404_v30 = vmul.f32 %v3070_v16, %v4060_v25 }
 0x469   :  { %3071 = vtanh.f32 %v1274_v49  ;;  %v4161_v33 = vadd.f32 %v3911_v6, %v1136_v42 }
 0x46a   :  { %v1434_v51 = vsel %vm197_vm0, %v1404_v30, 0.0 }
 0x46b   :  { %1435 = vadd.xlane.f32.xlu1 %v1434_v51 }
 0x46c   :  { %2742 = vmatmul.msk.f32.gmra.mxu0 %vm197_vm0, %v4161_v33  ;;  %2758 = vmatmul.msk.f32.gmra.mxu1 %vm197_vm0, %v4161_v33 }
 0x46d   :  { %v4172_v9 = vpop.f32.mrf.mxu1 }
 0x46e   :  { %v1276_v7 = vpop.f32.mrf.mxu0 }
 0x46f   :  { %v3072_v39 = vpop.eup %3071  ;;  %v1277_v21 = vadd.f32 %v4043_v52, %v1276_v7 }
 0x470   :  { %v1405_v36 = vmul.f32 %v3072_v39, %v4060_v25 }
 0x471   :  { %3073 = vtanh.f32 %v1277_v21 }
 0x472   :  { %v1437_v32 = vsel %vm197_vm0, %v1405_v36, 0.0 }
 0x473   :  { %1438 = vadd.xlane.f32.xlu2 %v1437_v32 }
 0x475   :  { %v4179_v60 = vpop.f32.mrf.mxu1 }
 0x476   :  { %v1279_v6 = vpop.f32.mrf.mxu0 }
 0x477   :  { %v3074_v61 = vpop.eup %3073  ;;  %v1280_v47 = vadd.f32 %v4043_v52, %v1279_v6 }
 0x478   :  { %v1406_v11 = vmul.f32 %v3074_v61, %v4060_v25 }
 0x479   :  { %3075 = vtanh.f32 %v1280_v47 }
 0x47a   :  { %v1440_v2 = vsel %vm197_vm0, %v1406_v11, 0.0 }
 0x47b   :  { %1441 = vadd.xlane.f32.xlu0 %v1440_v2 }
 0x47d   :  { %v4185_v49 = vpop.f32.mrf.mxu1 }
 0x47e   :  { %v1282_v5 = vpop.f32.mrf.mxu0 }
 0x47f   :  { %v3076_v37 = vpop.eup %3075  ;;  %v1283_v28 = vadd.f32 %v4043_v52, %v1282_v5 }
 0x480   :  { %v1407_v17 = vmul.f32 %v3076_v37, %v4060_v25 }
 0x481   :  { %3077 = vtanh.f32 %v1283_v28 }
 0x482   :  { %v1443_v31 = vsel %vm197_vm0, %v1407_v17, 0.0 }
 0x483   :  { %1444 = vadd.xlane.f32.xlu1 %v1443_v31 }
 0x485   :  { %v1348_v21 = vpop.f32.mrf.mxu1 }
 0x486   :  { %v1285_v54 = vpop.f32.mrf.mxu0 }
 0x487   :  { %v3078_v26 = vpop.eup %3077  ;;  %v1286_v50 = vadd.f32 %v4043_v52, %v1285_v54 }
 0x488   :  { %v1408_v40 = vmul.f32 %v3078_v26, %v4060_v25 }
 0x489   :  { %3079 = vtanh.f32 %v1286_v50 }
 0x48a   :  { %v1446_v16 = vsel %vm197_vm0, %v1408_v40, 0.0 }
 0x48b   :  { %1447 = vadd.xlane.f32.xlu2 %v1446_v16 }
 0x48d   :  { %v1351_v61 = vpop.f32.mrf.mxu1 }
 0x48e   :  { %v1288_v42 = vpop.f32.mrf.mxu0 }
 0x48f   :  { %v3080_v30 = vpop.eup %3079  ;;  %v1289_v51 = vadd.f32 %v4043_v52, %v1288_v42 }
 0x490   :  { %v1409_v7 = vmul.f32 %v3080_v30, %v4060_v25 }
 0x491   :  { %3081 = vtanh.f32 %v1289_v51 }
 0x492   :  { %v1449_v39 = vsel %vm197_vm0, %v1409_v7, 0.0 }
 0x493   :  { %1450 = vadd.xlane.f32.xlu0 %v1449_v39 }
 0x495   :  { %v1354_v47 = vpop.f32.mrf.mxu1 }
 0x497   :  { %v3082_v36 = vpop.eup %3081 }
 0x498   :  { %v1410_v32 = vmul.f32 %v3082_v36, %v4060_v25 }
 0x49a   :  { %v1452_v6 = vsel %vm197_vm0, %v1410_v32, 0.0 }
 0x49b   :  { %1453 = vadd.xlane.f32.xlu1 %v1452_v6 }
 0x49d   :  { %v1357_v11 = vpop.f32.mrf.mxu1 }
 0x4a5   :  { %v1360_v2 = vpop.f32.mrf.mxu1 }
 0x4ad   :  { %v1363_v5 = vpop.f32.mrf.mxu1 }
 0x4b5   :  { %v1366_v37 = vpop.f32.mrf.mxu1 }
 0x4bd   :  { %v1369_v28 = vpop.f32.mrf.mxu1 }
 0x4e1   :  { %v1291_v17 = vpop.f32.mrf.mxu0  ;;  %v1372_v31 = vpop.f32.mrf.mxu1 }
 0x4e2   :  { %v1292_v54 = vadd.f32 %v4043_v52, %v1291_v17 }
 0x4e4   :  { %3083 = vtanh.f32 %v1292_v54 }
 0x4e9   :  { %v1294_v26 = vpop.f32.mrf.mxu0  ;;  %v1375_v50 = vpop.f32.mrf.mxu1 }
 0x4ea   :  { %v3084_v40 = vpop.eup %3083  ;;  %v1295_v16 = vadd.f32 %v4043_v52, %v1294_v26  ;;  %3085 = vtanh.f32 %v1375_v50 }
 0x4eb   :  { %v1411_v42 = vmul.f32 %v3084_v40, %v4060_v25 }
 0x4ec   :  { %3087 = vtanh.f32 %v1295_v16 }
 0x4ed   :  { %v1455_v30 = vsel %vm197_vm0, %v1411_v42, 0.0  ;;  %3089 = vtanh.f32 %v1372_v31  ;;  %v2720_v31 = vld [vmem:[%s4920_s7 + $0x20] sm:$0xff] }
 0x4ee   :  { %1456 = vadd.xlane.f32.xlu2 %v1455_v30  ;;  %3091 = vtanh.f32 %v1369_v28 }
 0x4ef   :  { %3093 = vtanh.f32 %v1366_v37 }
 0x4f0   :  { %v3086_v51 = vpop.eup %3085  ;;  %3095 = vtanh.f32 %v1363_v5 }
 0x4f1   :  { %2759 = vmatpush.xpose.msk.msrb.mxu3 %vm197_vm0, %v3086_v51  ;;  %3097 = vtanh.f32 %v1360_v2 }
 0x4f2   :  { %v3088_v7 = vpop.eup %3087  ;;  %3099 = vtanh.f32 %v1357_v11 }
 0x4f3   :  { %v1412_v39 = vmul.f32 %v3088_v7, %v4060_v25  ;;  %v3090_v36 = vpop.eup %3089  ;;  %3101 = vtanh.f32 %v1354_v47 }
 0x4f4   :  { %v3092_v32 = vpop.eup %3091  ;;  %3103 = vtanh.f32 %v1351_v61 }
 0x4f5   :  { %2760 = vmatpush.xpose.msk.msrb.mxu3 %vm197_vm0, %v3090_v36  ;;  %v1458_v52 = vsel %vm197_vm0, %v1412_v39, 0.0  ;;  %v3094_v6 = vpop.eup %3093  ;;  %3105 = vtanh.f32 %v1348_v21 }
 0x4f6   :  { %1459 = vadd.xlane.f32.xlu0 %v1458_v52  ;;  %v3096_v17 = vpop.eup %3095  ;;  %3107 = vtanh.f32 %v4185_v49 }
 0x4f7   :  { %v3098_v25 = vpop.eup %3097  ;;  %3109 = vtanh.f32 %v4179_v60 }
 0x4f8   :  { %v3100_v28 = vpop.eup %3099  ;;  %3111 = vtanh.f32 %v4172_v9  ;;  %v2723_v9 = vld [vmem:[%s4920_s7 + $0x38] sm:$0xff] }
 0x4f9   :  { %2761 = vmatpush.xpose.msk.msrb.mxu3 %vm197_vm0, %v3092_v32  ;;  %v3102_v37 = vpop.eup %3101  ;;  %3113 = vtanh.f32 %v4167_v19  ;;  %v2719_v19 = vld [vmem:[%s4925_s6 + $0x1] sm:$0x1] }
 0x4fa   :  { %v3104_v5 = vpop.eup %3103  ;;  %3115 = vtanh.f32 %v4149_v18  ;;  %v2722_v18 = vld [vmem:[%s4920_s7 + $0x30] sm:$0xff] }
 0x4fb   :  { %v3106_v2 = vpop.eup %3105  ;;  %3117 = vtanh.f32 %v4141_v3  ;;  %v2721_v3 = vld [vmem:[%s4920_s7 + $0x28] sm:$0xff] }
 0x4fc   :  { %v3108_v11 = vpop.eup %3107 }
 0x4fd   :  { %2762 = vmatpush.xpose.msk.msrb.mxu3 %vm197_vm0, %v3094_v6  ;;  %v3110_v61 = vpop.eup %3109 }
 0x4fe   :  { %v3112_v21 = vpop.eup %3111 }
 0x4ff   :  { %v3114_v49 = vpop.eup %3113 }
 0x500   :  { %v3116_v60 = vpop.eup %3115 }
 0x501   :  { %2763 = vmatpush.xpose.msk.msrb.mxu3 %vm197_vm0, %v3096_v17  ;;  %v3118_v47 = vpop.eup %3117 }
 0x505   :  { %2764 = vmatpush.xpose.msk.msrb.mxu3 %vm197_vm0, %v3098_v25 }
 0x509   :  { %2765 = vmatpush.xpose.msk.msrb.mxu3 %vm197_vm0, %v3100_v28  ;;  %v2922_v28 = vld [vmem:[%s4924_s8 + $0x1] ss:$0 sm:$0xff] }
 0x50d   :  { %2766 = vmatpush.xpose.msk.msrb.mxu3 %vm197_vm0, %v3102_v37 }
 0x511   :  { %2767 = vmatpush.xpose.msk.msrb.mxu3 %vm197_vm0, %v3104_v5 }
 0x515   :  { %2768 = vmatpush.xpose.msk.msrb.mxu3 %vm197_vm0, %v3106_v2 }
 0x519   :  { %2769 = vmatpush.xpose.msk.msrb.mxu3 %vm197_vm0, %v3108_v11 }
 0x51d   :  { %2770 = vmatpush.xpose.msk.msrb.mxu3 %vm197_vm0, %v3110_v61 }
 0x521   :  { %2771 = vmatpush.xpose.msk.msrb.mxu3 %vm197_vm0, %v3112_v21 }
 0x525   :  { %2772 = vmatpush.xpose.msk.msrb.mxu3 %vm197_vm0, %v3114_v49 }
 0x529   :  { %2773 = vmatpush.xpose.msk.msrb.mxu3 %vm197_vm0, %v3116_v60 }
 0x52d   :  { %2774 = vmatpush.xpose.msk.msrb.mxu3 %vm197_vm0, %v3118_v47  ;;  %v1415_v47 = vpop.xlane.xlu0 %1414 }
 0x530   :  { %2775 = vmatmul.msk.f32.vlgmr.msrb.gmra.mxu3 %vm197_vm0, %v2719_v19 }
 0x531   :  { %1611 = vmatpush.msra.mxu3 %v2723_v9 }
 0x533   :  { %1612 = vmatpush.msra.mxu3 %v2722_v18 }
 0x535   :  { %1613 = vmatpush.msra.mxu3 %v2721_v3 }
 0x537   :  { %1614 = vmatpush.msra.mxu3 %v2720_v31 }
 0x538   :  { %2776 = vmatmul.msk.f32.vlgmr.msra.gmra.mxu3 %vm197_vm0, %v3927_v10 }
 0x540   :  { %2777 = vmatmul.msk.f32.gmra.mxu3 %vm197_vm0, %v3947_v4 }
 0x548   :  { %2778 = vmatmul.msk.f32.gmra.mxu3 %vm197_vm0, %v3964_v20 }
 0x550   :  { %2779 = vmatmul.msk.f32.gmra.mxu3 %vm197_vm0, %v3981_v55 }
 0x558   :  { %2780 = vmatmul.msk.f32.gmra.mxu3 %vm197_vm0, %v3997_v46 }
 0x560   :  { %2781 = vmatmul.msk.f32.gmra.mxu3 %vm197_vm0, %v4009_v56 }
 0x568   :  { %2782 = vmatmul.msk.f32.gmra.mxu3 %vm197_vm0, %v4018_v58 }
 0x570   :  { %2783 = vmatmul.msk.f32.gmra.mxu3 %vm197_vm0, %v4051_v29 }
 0x578   :  { %2784 = vmatmul.msk.f32.gmra.mxu3 %vm197_vm0, %v4069_v45 }
 0x580   :  { %2785 = vmatmul.msk.f32.gmra.mxu3 %vm197_vm0, %v4082_v8 }
 0x588   :  { %2786 = vmatmul.msk.f32.gmra.mxu3 %vm197_vm0, %v4095_v12 }
 0x590   :  { %2787 = vmatmul.msk.f32.gmra.mxu3 %vm197_vm0, %v4107_v27 }
 0x598   :  { %2788 = vmatmul.msk.f32.gmra.mxu3 %vm197_vm0, %v4119_v22 }
 0x5a0   :  { %2789 = vmatmul.msk.f32.gmra.mxu3 %vm197_vm0, %v4131_v48 }
 0x5a8   :  { %2790 = vmatmul.msk.f32.gmra.mxu3 %vm197_vm0, %v4147_v63 }
 0x5b0   :  { %2791 = vmatmul.msk.f32.gmra.mxu3 %vm197_vm0, %v4161_v33 }
 0x5b3   :  { %v1528_v54 = vpop.f32.mrf.mxu3 }
 0x5b4   :  { %v4273_v49 = vperm.slane %v1528_v54, 0 }
 0x5b6   :  { %v1532_v18 = vadd.f32 %v4273_v49, %v1415_v47 }
 0x5b8   :  { %3119 = vtanh.f32 %v1532_v18 }
 0x5bb   :  { %v4268_v26 = vpop.f32.mrf.mxu3 }
 0x5c3   :  { %v1619_v50 = vpop.f32.mrf.mxu3 }
 0x5cb   :  { %v1622_v40 = vpop.f32.mrf.mxu3 }
 0x5d3   :  { %v1625_v16 = vpop.f32.mrf.mxu3 }
 0x5db   :  { %v1628_v42 = vpop.f32.mrf.mxu3 }
 0x5e3   :  { %v1631_v30 = vpop.f32.mrf.mxu3 }
 0x5eb   :  { %v1634_v51 = vpop.f32.mrf.mxu3 }
 0x5ec   :  { %v1635_v31 = vadd.f32 %v2922_v28, %v1634_v51  ;;  %v3200_v51 = vmov 0  }
 0x5ed   :  { %2912 = vset.pattern.permute.xlu1 %v3200_v51  ;;  %2913 = vset.pattern.permute.xlu2 %v3200_v51 }
 0x5ee   :  { %2911 = vset.pattern.permute.xlu0 %v3200_v51 }
 0x5f3   :  { %v1637_v7 = vpop.f32.mrf.mxu3 }
 0x5f4   :  { %v1638_v3 = vadd.f32 %v2922_v28, %v1637_v7  ;;  %v1623_v7 = vadd.f32 %v2922_v28, %v1622_v40 }
 0x5fb   :  { %v1640_v39 = vpop.f32.mrf.mxu3 }
 0x5fc   :  { %v1641_v19 = vadd.f32 %v2922_v28, %v1640_v39  ;;  %v4280_v39 = vld [vmem:[%s4929_s2 + $0x8] sm:$0xff] }
 0x603   :  { %v1643_v36 = vpop.f32.mrf.mxu3 }
 0x604   :  { %v1644_v9 = vadd.f32 %v2922_v28, %v1643_v36  ;;  %v1626_v36 = vadd.f32 %v2922_v28, %v1625_v16  ;;  %v1421_v16 = vpop.xlane.xlu2 %1420 }
 0x60b   :  { %v1646_v52 = vpop.f32.mrf.mxu3 }
 0x60c   :  { %v1647_v60 = vadd.f32 %v2922_v28, %v1646_v52  ;;  %v3120_v52 = vpop.eup %3119 }
 0x613   :  { %v1649_v32 = vpop.f32.mrf.mxu3 }
 0x614   :  { %v1650_v21 = vadd.f32 %v2922_v28, %v1649_v32  ;;  %v1418_v32 = vpop.xlane.xlu1 %1417 }
 0x615   :  { %v1533_v54 = vadd.f32 %v4273_v49, %v1418_v32 }
 0x617   :  { %3121 = vtanh.f32 %v1533_v54 }
 0x61b   :  { %v1652_v6 = vpop.f32.mrf.mxu3 }
 0x61c   :  { %v1653_v61 = vadd.f32 %v2922_v28, %v1652_v6  ;;  %v1632_v6 = vadd.f32 %v2922_v28, %v1631_v30  ;;  %v2793_v30 = vadd.f32 -1.0, %v4280_v39 }
 0x623   :  { %v1655_v17 = vpop.f32.mrf.mxu3 }
 0x624   :  { %v1656_v11 = vadd.f32 %v2922_v28, %v1655_v17  ;;  %v1629_v17 = vadd.f32 %v2922_v28, %v1628_v42  ;;  %v1620_v42 = vadd.f32 %v2922_v28, %v1619_v50  ;;  %v2137_v50 = vld [vmem:[%s4929_s2 + $0x10] sm:$0xff] }
 0x62b   :  { %v1658_v25 = vpop.f32.mrf.mxu3 }
 0x62c   :  { %v1659_v2 = vadd.f32 %v2922_v28, %v1658_v25  ;;  %v1564_v25 = vmax.f32 %v3120_v52, 0.0  ;;  %v1427_v52 = vpop.xlane.xlu1 %1426 }
 0x62e   :  { %v1580_v40 = vmul.f32 %v1564_v25, %v3621_v41  ;;  %v1424_v41 = vpop.xlane.xlu0 %1423  ;;  %v2140_v25 = vld [vmem:[%s4929_s2 + $0x28] sm:$0xff] }
 0x62f   :  { %v1535_v47 = vadd.f32 %v4273_v49, %v1424_v41 }
 0x633   :  { %v1661_v37 = vpop.f32.mrf.mxu3 }
 0x634   :  { %v1662_v5 = vadd.f32 %v2922_v28, %v1661_v37  ;;  %v2168_v37 = vmul.f32 1e+09, %v2793_v30  ;;  %v2144_v30 = vld [vmem:[%s4929_s2 + $0x48] sm:$0xff] }
 0x636   :  { %1664 = vmatpush.msrb.mxu2 %v1662_v5  ;;  %v1617_v5 = vadd.f32 %v2922_v28, %v4268_v26  ;;  %2190 = vperm.xlu1 %2912, %v2168_v37   ;;  %v2794_v28 = vadd.f32 -1.0, %v2137_v50  ;;  %v4318_v37 = vsel %vm2391_vm8, %v2144_v30, -inf }
 0x638   :  { %1665 = vmatpush.msrb.mxu2 %v1659_v2  ;;  %v1534_v2 = vadd.f32 %v4273_v49, %v1421_v16  ;;  %v2797_v16 = vadd.f32 -1.0, %v2140_v25 }
 0x63a   :  { %1666 = vmatpush.msrb.mxu2 %v1656_v11  ;;  %v3122_v11 = vpop.eup %3121  ;;  %3123 = vtanh.f32 %v1534_v2 }
 0x63b   :  { %3125 = vtanh.f32 %v1535_v47 }
 0x63c   :  { %1667 = vmatpush.msrb.mxu2 %v1653_v61  ;;  %v4289_v61 = vld [vmem:[%s4929_s2 + $0x20] sm:$0xff] }
 0x63d   :  { %v2796_v26 = vadd.f32 -1.0, %v4289_v61 }
 0x63e   :  { %1668 = vmatpush.msrb.mxu2 %v1650_v21  ;;  %v1565_v21 = vmax.f32 %v3122_v11, 0.0 }
 0x640   :  { %1669 = vmatpush.msrb.mxu2 %v1647_v60  ;;  %v2171_v60 = vmul.f32 1e+09, %v2796_v26  ;;  %v3124_v18 = vpop.eup %3123 }
 0x641   :  { %v3126_v51 = vpop.eup %3125 }
 0x642   :  { %1670 = vmatpush.msrb.mxu2 %v1644_v9  ;;  %v2169_v9 = vmul.f32 1e+09, %v2794_v28  ;;  %2205 = vperm.xlu1 %2912, %v2171_v60   ;;  %v2147_v60 = vld [vmem:[%s4929_s2 + $0x60] sm:$0xff] }
 0x643   :  { %v4337_v47 = vsel %vm2391_vm8, %v2147_v60, -inf }
 0x644   :  { %1671 = vmatpush.msrb.mxu2 %v1641_v19  ;;  %2195 = vperm.xlu2 %2913, %v2169_v9   ;;  %v1581_v19 = vmul.f32 %v1565_v21, %v3627_v38  ;;  %v4325_v21 = vld [vmem:[%s4929_s2] sm:$0xff] }
 0x645   :  { %v4333_v9 = vld [vmem:[%s4929_s2 + $0x40] sm:$0xff]  ;;  %v2792_v41 = vadd.f32 -1.0, %v4325_v21 }
 0x646   :  { %1672 = vmatpush.msrb.mxu2 %v1638_v3  ;;  %v4300_v3 = vld [vmem:[%s4929_s2 + $0x30] sm:$0xff] }
 0x648   :  { %1673 = vmatpush.msrb.mxu2 %v1635_v31  ;;  %v4305_v31 = vld [vmem:[%s4929_s2 + $0x18] sm:$0xff] }
 0x649   :  { %v2795_v32 = vadd.f32 -1.0, %v4305_v31 }
 0x64a   :  { %1674 = vmatpush.msrb.mxu2 %v1632_v6  ;;  %v2798_v6 = vadd.f32 -1.0, %v4300_v3 }
 0x64b   :  { %v2170_v38 = vmul.f32 1e+09, %v2795_v32 }
 0x64c   :  { %1675 = vmatpush.msrb.mxu2 %v1629_v17  ;;  %v1566_v17 = vmax.f32 %v3124_v18, 0.0  ;;  %v2173_v54 = vmul.f32 1e+09, %v2798_v6  ;;  %v2800_v18 = vadd.f32 -1.0, %v4333_v9  ;;  %v2167_v6 = vmul.f32 1e+09, %v2792_v41 }
 0x64d   :  { %2200 = vperm.xlu2 %2913, %v2170_v38   ;;  %v2406_v38 = vsel %vm2391_vm8, %v2137_v50, -inf  ;;  %v2146_v50 = vld [vmem:[%s4929_s2 + $0x58] sm:$0xff] }
 0x64e   :  { %1676 = vmatpush.msrb.mxu2 %v1626_v36  ;;  %v1536_v36 = vadd.f32 %v4273_v49, %v1427_v52  ;;  %2215 = vperm.xlu1 %2912, %v2173_v54   ;;  %v2175_v54 = vmul.f32 1e+09, %v2800_v18  ;;  %v2427_v18 = vsel %vm2391_vm8, %v2140_v25, -inf }
 0x64f   :  { %2185 = vperm.xlu0 %2911, %v2167_v6  }
 0x650   :  { %1677 = vmatpush.msrb.mxu2 %v1623_v7  ;;  %v1582_v7 = vmul.f32 %v1566_v17, %v3642_v57  ;;  %3127 = vtanh.f32 %v1536_v36  ;;  %v2172_v57 = vmul.f32 1e+09, %v2797_v16  ;;  %v1433_v17 = vpop.xlane.xlu0 %1432 }
 0x651   :  { %v1538_v52 = vadd.f32 %v4273_v49, %v1433_v17 }
 0x652   :  { %1678 = vmatpush.msrb.mxu2 %v1620_v42  ;;  %v2801_v42 = vadd.f32 -1.0, %v2144_v30  ;;  %v4346_v30 = vld [vmem:[%s4929_s2 + $0x38] sm:$0xff] }
 0x654   :  { %1679 = vmatpush.msrb.mxu2 %v1617_v5  ;;  %v1567_v5 = vmax.f32 %v3126_v51, 0.0  ;;  %v2176_v2 = vmul.f32 1e+09, %v2801_v42  ;;  %v2407_v51 = vrot.slane %v2406_v38, 4  ;;  %v2150_v42 = vld [vmem:[%s4929_s2 + $0x78] sm:$0xff] }
 0x655   :  { %1680 = vmatmul.f32.vlgmr.msrb.gmra.mxu2 %v1580_v40  ;;  %v1430_v40 = vpop.xlane.xlu2 %1429  ;;  %2210 = vperm.xlu2 %2913, %v2172_v57   ;;  %v2807_v16 = vadd.f32 -1.0, %v2150_v42  ;;  %v2803_v57 = vadd.f32 -1.0, %v2146_v50 }
 0x656   :  { %v1537_v11 = vadd.f32 %v4273_v49, %v1430_v40  ;;  %2230 = vperm.xlu1 %2912, %v2176_v2   ;;  %v1583_v26 = vmul.f32 %v1567_v5, %v3654_v13  ;;  %v3128_v28 = vpop.eup %3127  ;;  %v2804_v13 = vadd.f32 -1.0, %v2147_v60  ;;  %v4356_v5 = vsel %vm2391_vm8, %v2150_v42, -inf }
 0x657   :  { %v4359_v40 = vsel %vm2391_vm8, %v2146_v50, -inf  ;;  %v2408_v60 = vmax.f32 %v2406_v38, %v2407_v51  ;;  %v2145_v38 = vld [vmem:[%s4929_s2 + $0x50] sm:$0xff] }
 0x658   :  { %3129 = vtanh.f32 %v1537_v11  ;;  %v2179_v32 = vmul.f32 1e+09, %v2804_v13  ;;  %v1436_v11 = vpop.xlane.xlu1 %1435  ;;  %v2178_v13 = vmul.f32 1e+09, %v2803_v57  ;;  %v2802_v25 = vadd.f32 -1.0, %v2145_v38 }
 0x659   :  { %3131 = vtanh.f32 %v1538_v52  ;;  %v1539_v41 = vadd.f32 %v4273_v49, %v1436_v11  ;;  %v2409_v52 = vrot.slane %v2408_v60, 2  ;;  %v2420_v57 = vsel %vm2391_vm8, %v4289_v61, -inf }
 0x65a   :  { %v2177_v50 = vmul.f32 1e+09, %v2802_v25 }
 0x65b   :  { %3133 = vtanh.f32 %v1539_v41  ;;  %v2410_v42 = vmax.f32 %v2408_v60, %v2409_v52  ;;  %v2448_v41 = vsel %vm2391_vm8, %v4333_v9, -inf }
 0x65c   :  { %v2449_v61 = vrot.slane %v2448_v41, 4 }
 0x65d   :  { %1683 = vmatmul.f32.gmra.mxu2 %v1581_v19  ;;  %v1568_v19 = vmax.f32 %v3128_v28, 0.0  ;;  %2225 = vperm.xlu2 %2913, %v2175_v54   ;;  %v2182_v28 = vmul.f32 1e+09, %v2807_v16  ;;  %v2428_v54 = vrot.slane %v2427_v18, 4  ;;  %v1439_v16 = vpop.xlane.xlu2 %1438 }
 0x65e   :  { %2245 = vperm.xlu1 %2912, %v2179_v32  }
 0x65f   :  { %v1584_v36 = vmul.f32 %v1568_v19, %v3669_v62  ;;  %v2799_v62 = vadd.f32 -1.0, %v4346_v30  ;;  %v2399_v19 = vsel %vm2391_vm8, %v4280_v39, -inf  ;;  %v2149_v39 = vld [vmem:[%s4929_s2 + $0x70] sm:$0xff]  ;;  %v2429_v11 = vmax.f32 %v2427_v18, %v2428_v54 }
 0x660   :  { %v2400_v17 = vrot.slane %v2399_v19, 4 }
 0x661   :  { %v2430_v18 = vrot.slane %v2429_v11, 2 }
 0x665   :  { %1686 = vmatmul.f32.gmra.mxu2 %v1582_v7  ;;  %v3130_v7 = vpop.eup %3129  ;;  %2240 = vperm.xlu2 %2913, %v2178_v13   ;;  %v1540_v13 = vadd.f32 %v4273_v49, %v1439_v16 }
 0x666   :  { %v1569_v2 = vmax.f32 %v3130_v7, 0.0  ;;  %2260 = vperm.xlu1 %2912, %v2182_v28   ;;  %v3132_v32 = vpop.eup %3131  ;;  %v4376_v7 = vsel %vm2391_vm8, %v2149_v39, -inf  ;;  %v2392_v28 = vsel %vm2391_vm8, %v4325_v21, -inf  ;;  %v2148_v21 = vld [vmem:[%s4929_s2 + $0x68] sm:$0xff] }
 0x667   :  { %v1570_v51 = vmax.f32 %v3132_v32, 0.0  ;;  %3135 = vtanh.f32 %v1540_v13  ;;  %v2805_v9 = vadd.f32 -1.0, %v2148_v21  ;;  %v2441_v13 = vsel %vm2391_vm8, %v4346_v30, -inf }
 0x668   :  { %v1585_v6 = vmul.f32 %v1569_v2, %v3680_v14  ;;  %v2806_v14 = vadd.f32 -1.0, %v2149_v39  ;;  %v2401_v2 = vmax.f32 %v2399_v19, %v2400_v17  ;;  %v2421_v19 = vrot.slane %v2420_v57, 4 }
 0x669   :  { %v1586_v60 = vmul.f32 %v1570_v51, %v3686_v44  ;;  %v2393_v17 = vrot.slane %v2392_v28, 4  ;;  %v2431_v44 = vmax.f32 %v2429_v11, %v2430_v18  ;;  %v2180_v51 = vmul.f32 1e+09, %v2805_v9 }
 0x66a   :  { %v2402_v54 = vrot.slane %v2401_v2, 2  ;;  %v2422_v25 = vmax.f32 %v2420_v57, %v2421_v19 }
 0x66b   :  { %v2432_v16 = vrot.slane %v2431_v44, 1 }
 0x66c   :  { %v2403_v39 = vmax.f32 %v2401_v2, %v2402_v54  ;;  %v1445_v54 = vpop.xlane.xlu1 %1444 }
 0x66d   :  { %1689 = vmatmul.f32.gmra.mxu2 %v1583_v26  ;;  %v2174_v26 = vmul.f32 1e+09, %v2799_v62  ;;  %v2181_v62 = vmul.f32 1e+09, %v2806_v14  ;;  %v2413_v14 = vsel %vm2391_vm8, %v4305_v31, -inf  ;;  %v2433_v11 = vmax.f32 %v2431_v44, %v2432_v16 }
 0x66e   :  { %v2442_v31 = vrot.slane %v2441_v13, 4 }
 0x66f   :  { %2220 = vperm.xlu0 %2911, %v2174_v26   ;;  %v2411_v26 = vrot.slane %v2410_v42, 1  ;;  %2255 = vperm.xlu2 %2913, %v2181_v62   ;;  %v2450_v62 = vmax.f32 %v2448_v41, %v2449_v61  ;;  %v2423_v41 = vrot.slane %v2422_v25, 2 }
 0x670   :  { %v2443_v9 = vmax.f32 %v2441_v13, %v2442_v31 }
 0x671   :  { %v2412_v32 = vmax.f32 %v2410_v42, %v2411_v26  ;;  %v1442_v42 = vpop.xlane.xlu0 %1441  ;;  %v2404_v26 = vrot.slane %v2403_v39, 1 }
 0x673   :  { %2516 = vperm.xlu1 %2912, %v2412_v32   ;;  %v2405_v2 = vmax.f32 %v2403_v39, %v2404_v26  ;;  %v2414_v32 = vrot.slane %v2413_v14, 4  ;;  %v2434_v39 = vsel %vm2391_vm8, %v4300_v3, -inf  ;;  %v1448_v3 = vpop.xlane.xlu2 %1447 }
 0x675   :  { %1692 = vmatmul.f32.gmra.mxu2 %v1584_v36  ;;  %v4373_v36 = vsel %vm2391_vm8, %v2145_v38, -inf  ;;  %v4390_v38 = vsel %vm2391_vm8, %v2148_v21, -inf  ;;  %v2424_v21 = vmax.f32 %v2422_v25, %v2423_v41  ;;  %v2415_v18 = vmax.f32 %v2413_v14, %v2414_v32 }
 0x676   :  { %v2444_v14 = vrot.slane %v2443_v9, 2 }
 0x677   :  { %2235 = vperm.xlu0 %2911, %v2177_v50   ;;  %v2394_v50 = vmax.f32 %v2392_v28, %v2393_v17  ;;  %v2451_v28 = vrot.slane %v2450_v62, 2  ;;  %2511 = vperm.xlu2 %2913, %v2405_v2   ;;  %v2425_v44 = vrot.slane %v2424_v21, 1  ;;  %v2416_v25 = vrot.slane %v2415_v18, 2 }
 0x679   :  { %v2395_v19 = vrot.slane %v2394_v50, 2  ;;  %v2452_v30 = vmax.f32 %v2450_v62, %v2451_v28  ;;  %v2417_v13 = vmax.f32 %v2415_v18, %v2416_v25 }
 0x67b   :  { %2531 = vperm.xlu1 %2912, %v2433_v11   ;;  %v2396_v61 = vmax.f32 %v2394_v50, %v2395_v19  ;;  %v2435_v50 = vrot.slane %v2434_v39, 4  ;;  %v2445_v11 = vmax.f32 %v2443_v9, %v2444_v14 }
 0x67d   :  { %1695 = vmatmul.f32.gmra.mxu2 %v1585_v6  ;;  %v3134_v6 = vpop.eup %3133  ;;  %v2436_v2 = vmax.f32 %v2434_v39, %v2435_v50  ;;  %v2446_v32 = vrot.slane %v2445_v11, 1 }
 0x67e   :  { %v1571_v52 = vmax.f32 %v3134_v6, 0.0  ;;  %v3136_v57 = vpop.eup %3135 }
 0x67f   :  { %2250 = vperm.xlu0 %2911, %v2180_v51   ;;  %v1572_v17 = vmax.f32 %v3136_v57, 0.0  ;;  %v1542_v51 = vadd.f32 %v4273_v49, %v1445_v54  ;;  %v2418_v57 = vrot.slane %v2417_v13, 1  ;;  %v2447_v28 = vmax.f32 %v2445_v11, %v2446_v32 }
 0x680   :  { %v1587_v6 = vmul.f32 %v1571_v52, %v3692_v24  ;;  %v2397_v24 = vrot.slane %v2396_v61, 1  ;;  %v2453_v52 = vrot.slane %v2452_v30, 1 }
 0x681   :  { %v2419_v19 = vmax.f32 %v2417_v13, %v2418_v57 }
 0x682   :  { %v2398_v16 = vmax.f32 %v2396_v61, %v2397_v24  ;;  %v2454_v26 = vmax.f32 %v2452_v30, %v2453_v52 }
 0x684   :  { %2546 = vperm.xlu1 %2912, %v2454_v26   ;;  %v1457_v26 = vpop.xlane.xlu2 %1456 }
 0x685   :  { %1698 = vmatmul.f32.gmra.mxu2 %v1586_v60  ;;  %v1541_v60 = vadd.f32 %v4273_v49, %v1442_v42  ;;  %v1588_v42 = vmul.f32 %v1572_v17, %v3698_v43  ;;  %v1543_v43 = vadd.f32 %v4273_v49, %v1448_v3  ;;  %v2437_v17 = vrot.slane %v2436_v2, 2 }
 0x687   :  { %3137 = vtanh.f32 %v1541_v60  ;;  %v2426_v60 = vmax.f32 %v2424_v21, %v2425_v44  ;;  %2506 = vperm.xlu0 %2911, %v2398_v16   ;;  %v2438_v30 = vmax.f32 %v2436_v2, %v2437_v17  ;;  %v1451_v21 = vpop.xlane.xlu0 %1450  ;;  %v1454_v44 = vpop.xlane.xlu1 %1453 }
 0x688   :  { %3139 = vtanh.f32 %v1542_v51  ;;  %v1544_v54 = vadd.f32 %v4273_v49, %v1451_v21  ;;  %v1545_v39 = vadd.f32 %v4273_v49, %v1454_v44 }
 0x689   :  { %2526 = vperm.xlu2 %2913, %v2426_v60   ;;  %3141 = vtanh.f32 %v1543_v43  ;;  %v2439_v18 = vrot.slane %v2438_v30, 1  ;;  %v1546_v60 = vadd.f32 %v4273_v49, %v1457_v26 }
 0x68a   :  { %3143 = vtanh.f32 %v1544_v54 }
 0x68b   :  { %v2440_v24 = vmax.f32 %v2438_v30, %v2439_v18  ;;  %3145 = vtanh.f32 %v1545_v39 }
 0x68c   :  { %3147 = vtanh.f32 %v1546_v60 }
 0x68d   :  { %1701 = vmatmul.f32.gmra.mxu2 %v1587_v6  ;;  %v3138_v6 = vpop.eup %3137 }
 0x68e   :  { %v1573_v62 = vmax.f32 %v3138_v6, 0.0  ;;  %v3140_v41 = vpop.eup %3139 }
 0x68f   :  { %2521 = vperm.xlu0 %2911, %v2419_v19   ;;  %v1574_v61 = vmax.f32 %v3140_v41, 0.0  ;;  %v3142_v52 = vpop.eup %3141  ;;  %v1460_v25 = vpop.xlane.xlu0 %1459 }
 0x690   :  { %v1589_v31 = vmul.f32 %v1573_v62, %v3600_v34  ;;  %v1575_v34 = vmax.f32 %v3142_v52, 0.0  ;;  %v1547_v14 = vadd.f32 %v4273_v49, %v1460_v25 }
 0x691   :  { %2541 = vperm.xlu2 %2913, %v2447_v28   ;;  %v1590_v9 = vmul.f32 %v1574_v61, %v3610_v15 }
 0x692   :  { %v1591_v51 = vmul.f32 %v1575_v34, %v3636_v59  ;;  %3149 = vtanh.f32 %v1547_v14 }
 0x695   :  { %1704 = vmatmul.f32.gmra.mxu2 %v1588_v42  ;;  %v3144_v42 = vpop.eup %3143 }
 0x696   :  { %v1576_v16 = vmax.f32 %v3144_v42, 0.0  ;;  %v3146_v6 = vpop.eup %3145 }
 0x697   :  { %2536 = vperm.xlu0 %2911, %v2440_v24   ;;  %v1577_v50 = vmax.f32 %v3146_v6, 0.0  ;;  %v3148_v13 = vpop.eup %3147 }
 0x698   :  { %v1592_v15 = vmul.f32 %v1576_v16, %v3646_v53  ;;  %v1578_v59 = vmax.f32 %v3148_v13, 0.0  ;;  %v3150_v3 = vpop.eup %3149 }
 0x699   :  { %v1593_v62 = vmul.f32 %v1577_v50, %v3658_v23  ;;  %v1579_v2 = vmax.f32 %v3150_v3, 0.0 }
 0x69a   :  { %v1594_v11 = vmul.f32 %v1578_v59, %v3663_v35 }
 0x69b   :  { %v1595_v53 = vmul.f32 %v1579_v2, %v3674_v1 }
 0x69d   :  { %1707 = vmatmul.f32.gmra.mxu2 %v1589_v31 }
 0x69e   :  { %v4474_v60 = vpop.permute.xlu2 %2195 }
 0x6a5   :  { %1710 = vmatmul.f32.gmra.mxu2 %v1590_v9 }
 0x6a8   :  { %v4434_v41 = vpop.permute.xlu1 %2190 }
 0x6ad   :  { %1713 = vmatmul.f32.gmra.mxu2 %v1591_v51 }
 0x6b5   :  { %1716 = vmatmul.f32.gmra.mxu2 %v1592_v15 }
 0x6bd   :  { %1719 = vmatmul.f32.gmra.mxu2 %v1593_v62  ;;  %v4487_v62 = vpop.permute.xlu2 %2200 }
 0x6c1   :  { %v4467_v42 = vpop.permute.xlu0 %2185 }
 0x6c5   :  { %1722 = vmatmul.f32.gmra.mxu2 %v1594_v11 }
 0x6cd   :  { %1725 = vmatmul.f32.gmra.mxu2 %v1595_v53 }
 0x6d8   :  { %v1681_v57 = vpop.f32.mrf.mxu2 }
 0x6d9   :  { %v4415_v32 = vadd.f32 %v1681_v57, %v3927_v10 }
 0x6db   :  { %v1745_v49 = vsel %vm197_vm0, %v4415_v32, 0.0 }
 0x6dc   :  { %1746 = vadd.xlane.f32.xlu1 %v1745_v49 }
 0x6e0   :  { %v1684_v23 = vpop.f32.mrf.mxu2 }
 0x6e1   :  { %v4420_v43 = vadd.f32 %v1684_v23, %v3947_v4 }
 0x6e3   :  { %v1748_v35 = vsel %vm197_vm0, %v4420_v43, 0.0 }
 0x6e4   :  { %1749 = vadd.xlane.f32.xlu2 %v1748_v35 }
 0x6e8   :  { %v1687_v31 = vpop.f32.mrf.mxu2 }
 0x6e9   :  { %v4425_v1 = vadd.f32 %v1687_v31, %v3964_v20 }
 0x6eb   :  { %v1751_v10 = vsel %vm197_vm0, %v4425_v1, 0.0 }
 0x6ec   :  { %1752 = vadd.xlane.f32.xlu0 %v1751_v10 }
 0x6f0   :  { %v1690_v19 = vpop.f32.mrf.mxu2 }
 0x6f1   :  { %v4430_v28 = vadd.f32 %v1690_v19, %v3981_v55  ;;  %v4444_v55 = vpop.permute.xlu1 %2205 }
 0x6f3   :  { %v1754_v4 = vsel %vm197_vm0, %v4430_v28, 0.0 }
 0x6f4   :  { %1755 = vadd.xlane.f32.xlu1 %v1754_v4  ;;  %v2456_v4 = vrot.slane %v4318_v37, 4 }
 0x6f8   :  { %v1693_v17 = vpop.f32.mrf.mxu2 }
 0x6f9   :  { %v4437_v61 = vadd.f32 %v1693_v17, %v3997_v46  ;;  %v4453_v24 = vpop.permute.xlu1 %2215 }
 0x6fb   :  { %v1757_v20 = vsel %vm197_vm0, %v4437_v61, 0.0 }
 0x6fc   :  { %1758 = vadd.xlane.f32.xlu2 %v1757_v20 }
 0x700   :  { %v1696_v30 = vpop.f32.mrf.mxu2 }
 0x701   :  { %v4442_v21 = vadd.f32 %v1696_v30, %v4009_v56  ;;  %v4460_v44 = vpop.permute.xlu1 %2230 }
 0x703   :  { %v1760_v18 = vsel %vm197_vm0, %v4442_v21, 0.0 }
 0x704   :  { %1761 = vadd.xlane.f32.xlu0 %v1760_v18  ;;  %v2457_v18 = vmax.f32 %v4318_v37, %v2456_v4 }
 0x708   :  { %v1699_v54 = vpop.f32.mrf.mxu2 }
 0x709   :  { %v4449_v9 = vadd.f32 %v1699_v54, %v4018_v58  ;;  %v4469_v16 = vpop.permute.xlu1 %2245 }
 0x70b   :  { %v1763_v46 = vsel %vm197_vm0, %v4449_v9, 0.0 }
 0x70c   :  { %1764 = vadd.xlane.f32.xlu1 %v1763_v46 }
 0x710   :  { %v1702_v52 = vpop.f32.mrf.mxu2 }
 0x711   :  { %v4456_v56 = vadd.f32 %v1702_v52, %v4051_v29  ;;  %v4483_v25 = vpop.permute.xlu1 %2260 }
 0x712   :  { %4936 = vst [vmem:[#allocation2_spill] sm:$0xff] %v4483_v25 }
 0x713   :  { %v1766_v34 = vsel %vm197_vm0, %v4456_v56, 0.0 }
 0x714   :  { %1767 = vadd.xlane.f32.xlu2 %v1766_v34 }
 0x718   :  { %v1705_v39 = vpop.f32.mrf.mxu2 }
 0x719   :  { %v4463_v58 = vadd.f32 %v1705_v39, %v4069_v45  ;;  %v4478_v45 = vpop.permute.xlu0 %2220  ;;  %v4496_v3 = vpop.permute.xlu1 %2516  ;;  %v2458_v39 = vrot.slane %v2457_v18, 2 }
 0x71b   :  { %v1769_v51 = vsel %vm197_vm0, %v4463_v58, 0.0 }
 0x71c   :  { %1770 = vadd.xlane.f32.xlu0 %v1769_v51 }
 0x720   :  { %v1708_v29 = vpop.f32.mrf.mxu2 }
 0x721   :  { %v4472_v26 = vadd.f32 %v1708_v29, %v4082_v8  ;;  %v4489_v8 = vpop.permute.xlu0 %2235 }
 0x723   :  { %v1772_v15 = vsel %vm197_vm0, %v4472_v26, 0.0 }
 0x724   :  { %1773 = vadd.xlane.f32.xlu1 %v1772_v15 }
 0x728   :  { %v1711_v6 = vpop.f32.mrf.mxu2 }
 0x729   :  { %v4481_v50 = vadd.f32 %v1711_v6, %v4095_v12  ;;  %v4498_v12 = vpop.permute.xlu2 %2210  ;;  %v4503_v57 = vpop.permute.xlu0 %2250  ;;  %v2459_v6 = vmax.f32 %v2457_v18, %v2458_v39 }
 0x72b   :  { %v1775_v14 = vsel %vm197_vm0, %v4481_v50, 0.0 }
 0x72c   :  { %1776 = vadd.xlane.f32.xlu2 %v1775_v14 }
 0x730   :  { %v1714_v13 = vpop.f32.mrf.mxu2 }
 0x731   :  { %v4492_v59 = vadd.f32 %v1714_v13, %v4107_v27  ;;  %v4507_v27 = vpop.permute.xlu1 %2531  ;;  %v4509_v23 = vpop.permute.xlu2 %2225 }
 0x732   :  { %v4516_v19 = vpop.permute.xlu0 %2506 }
 0x733   :  { %v1778_v11 = vsel %vm197_vm0, %v4492_v59, 0.0 }
 0x734   :  { %1779 = vadd.xlane.f32.xlu0 %v1778_v11 }
 0x738   :  { %v1717_v2 = vpop.f32.mrf.mxu2 }
 0x739   :  { %v4501_v53 = vadd.f32 %v1717_v2, %v4119_v22  ;;  %v4518_v22 = vpop.permute.xlu1 %2546  ;;  %v4524_v30 = vpop.permute.xlu2 %2240 }
 0x73a   :  { %4937 = vst [vmem:[#allocation3_spill] sm:$0xff] %v4518_v22  ;;  %v4529_v54 = vpop.permute.xlu0 %2521 }
 0x73b   :  { %v1781_v49 = vsel %vm197_vm0, %v4501_v53, 0.0 }
 0x73c   :  { %1782 = vadd.xlane.f32.xlu1 %v1781_v49 }
 0x740   :  { %v1720_v35 = vpop.f32.mrf.mxu2 }
 0x741   :  { %v4512_v31 = vadd.f32 %v1720_v35, %v4131_v48  ;;  %v4540_v15 = vpop.permute.xlu2 %2255 }
 0x742   :  { %4938 = vst [vmem:[#allocation4_spill] sm:$0xff] %v4540_v15  ;;  %v4545_v13 = vpop.permute.xlu0 %2536 }
 0x743   :  { %v1784_v10 = vsel %vm197_vm0, %v4512_v31, 0.0 }
 0x744   :  { %1785 = vadd.xlane.f32.xlu2 %v1784_v10 }
 0x748   :  { %v1723_v17 = vpop.f32.mrf.mxu2 }
 0x749   :  { %v4522_v20 = vadd.f32 %v1723_v17, %v4147_v63  ;;  %v4547_v2 = vpop.permute.xlu2 %2511 }
 0x74b   :  { %v1787_v48 = vsel %vm197_vm0, %v4522_v20, 0.0 }
 0x74c   :  { %1788 = vadd.xlane.f32.xlu0 %v1787_v48 }
 0x74f   :  { %v1747_v46 = vpop.xlane.xlu1 %1746 }
 0x750   :  { %v1793_v52 = vmul.f32 %v1747_v46, %v3751_v0  ;;  %v1726_v34 = vpop.f32.mrf.mxu2 }
 0x751   :  { %v4533_v51 = vadd.f32 %v1726_v34, %v4161_v33  ;;  %v2460_v33 = vrot.slane %v2459_v6, 1  ;;  %v4556_v48 = vpop.permute.xlu2 %2526 }
 0x752   :  { %v4536_v63 = vsub.f32 %v4415_v32, %v1793_v52 }
 0x753   :  { %v1790_v29 = vsel %vm197_vm0, %v4533_v51, 0.0  ;;  %v2461_v11 = vmax.f32 %v2459_v6, %v2460_v33 }
 0x754   :  { %1791 = vadd.xlane.f32.xlu1 %v1790_v29  ;;  %v1825_v37 = vmul.f32 %v4536_v63, %v4536_v63 }
 0x756   :  { %v1841_v14 = vsel %vm197_vm0, %v1825_v37, 0.0 }
 0x757   :  { %1842 = vadd.xlane.f32.xlu2 %v1841_v14 }
 0x759   :  { %v4565_v34 = vpop.permute.xlu2 %2541 }
 0x75f   :  { %v1753_v32 = vpop.xlane.xlu0 %1752 }
 0x760   :  { %v1795_v49 = vmul.f32 %v1753_v32, %v3751_v0  ;;  %2551 = vperm.xlu0 %2911, %v2461_v11  }
 0x761   :  { %v1750_v37 = vpop.xlane.xlu2 %1749 }
 0x762   :  { %v4551_v35 = vsub.f32 %v4425_v1, %v1795_v49 }
 0x764   :  { %v1827_v10 = vmul.f32 %v4551_v35, %v4551_v35 }
 0x766   :  { %v1847_v4 = vsel %vm197_vm0, %v1827_v10, 0.0 }
 0x767   :  { %v1756_v17 = vpop.xlane.xlu1 %1755  ;;  %1848 = vadd.xlane.f32.xlu1 %v1847_v4 }
 0x768   :  { %v1796_v18 = vmul.f32 %v1756_v17, %v3751_v0 }
 0x76a   :  { %v4560_v46 = vsub.f32 %v4430_v28, %v1796_v18  ;;  %v1794_v28 = vmul.f32 %v1750_v37, %v3751_v0 }
 0x76c   :  { %v1828_v52 = vmul.f32 %v4560_v46, %v4560_v46  ;;  %v4577_v49 = vsub.f32 %v4420_v43, %v1794_v28 }
 0x76e   :  { %v1850_v1 = vsel %vm197_vm0, %v1828_v52, 0.0  ;;  %v1826_v18 = vmul.f32 %v4577_v49, %v4577_v49 }
 0x76f   :  { %1851 = vadd.xlane.f32.xlu2 %v1850_v1  ;;  %v1759_v10 = vpop.xlane.xlu2 %1758 }
 0x770   :  { %v1797_v17 = vmul.f32 %v1759_v10, %v3751_v0  ;;  %v1844_v43 = vsel %vm197_vm0, %v1826_v18, 0.0 }
 0x772   :  { %v4589_v1 = vsub.f32 %v4437_v61, %v1797_v17 }
 0x777   :  { %v1762_v39 = vpop.xlane.xlu0 %1761 }
 0x778   :  { %v1798_v29 = vmul.f32 %v1762_v39, %v3751_v0 }
 0x77a   :  { %v4569_v6 = vsub.f32 %v4442_v21, %v1798_v29  ;;  %v1829_v29 = vmul.f32 %v4589_v1, %v4589_v1 }
 0x77c   :  { %v1830_v14 = vmul.f32 %v4569_v6, %v4569_v6 }
 0x77e   :  { %v1856_v33 = vsel %vm197_vm0, %v1830_v14, 0.0 }
 0x77f   :  { %v1765_v11 = vpop.xlane.xlu1 %1764  ;;  %1857 = vadd.xlane.f32.xlu1 %v1856_v33  ;;  %v1853_v33 = vsel %vm197_vm0, %v1829_v29, 0.0 }
 0x780   :  { %v1799_v32 = vmul.f32 %v1765_v11, %v3751_v0 }
 0x782   :  { %v4580_v4 = vsub.f32 %v4449_v9, %v1799_v32 }
 0x784   :  { %v1831_v21 = vmul.f32 %v4580_v4, %v4580_v4 }
 0x786   :  { %v1859_v52 = vsel %vm197_vm0, %v1831_v21, 0.0 }
 0x787   :  { %1860 = vadd.xlane.f32.xlu2 %v1859_v52  ;;  %v1768_v39 = vpop.xlane.xlu2 %1767 }
 0x788   :  { %v1800_v9 = vmul.f32 %v1768_v39, %v3751_v0 }
 0x78a   :  { %1845 = vadd.xlane.f32.xlu0 %v1844_v43  ;;  %v4597_v28 = vsub.f32 %v4456_v56, %v1800_v9 }
 0x78c   :  { %v1832_v32 = vmul.f32 %v4597_v28, %v4597_v28 }
 0x78e   :  { %v1862_v56 = vsel %vm197_vm0, %v1832_v32, 0.0 }
 0x78f   :  { %v1771_v37 = vpop.xlane.xlu0 %1770 }
 0x790   :  { %v1801_v14 = vmul.f32 %v1771_v37, %v3751_v0 }
 0x792   :  { %v4601_v61 = vsub.f32 %v4463_v58, %v1801_v14  ;;  %1854 = vadd.xlane.f32.xlu0 %v1853_v33 }
 0x794   :  { %v1833_v11 = vmul.f32 %v4601_v61, %v4601_v61 }
 0x796   :  { %v1865_v10 = vsel %vm197_vm0, %v1833_v11, 0.0 }
 0x797   :  { %v1774_v21 = vpop.xlane.xlu1 %1773  ;;  %1866 = vadd.xlane.f32.xlu1 %v1865_v10 }
 0x798   :  { %v1802_v17 = vmul.f32 %v1774_v21, %v3751_v0 }
 0x79a   :  { %v4611_v18 = vsub.f32 %v4472_v26, %v1802_v17  ;;  %1863 = vadd.xlane.f32.xlu0 %v1862_v56 }
 0x79c   :  { %v1834_v58 = vmul.f32 %v4611_v18, %v4611_v18 }
 0x79e   :  { %v1868_v52 = vsel %vm197_vm0, %v1834_v58, 0.0 }
 0x79f   :  { %v1777_v43 = vpop.xlane.xlu2 %1776  ;;  %1869 = vadd.xlane.f32.xlu2 %v1868_v52 }
 0x7a0   :  { %v1803_v39 = vmul.f32 %v1777_v43, %v3751_v0  ;;  %v2477_v43 = vrot.slane %v4337_v47, 4 }
 0x7a2   :  { %v4618_v9 = vsub.f32 %v4481_v50, %v1803_v39 }
 0x7a4   :  { %v1835_v29 = vmul.f32 %v4618_v9, %v4618_v9 }
 0x7a6   :  { %v1871_v37 = vsel %vm197_vm0, %v1835_v29, 0.0  ;;  %v2478_v29 = vmax.f32 %v4337_v47, %v2477_v43 }
 0x7a7   :  { %1872 = vadd.xlane.f32.xlu0 %v1871_v37  ;;  %v1780_v26 = vpop.xlane.xlu0 %1779 }
 0x7a8   :  { %v1804_v14 = vmul.f32 %v1780_v26, %v3751_v0 }
 0x7aa   :  { %v4625_v33 = vsub.f32 %v4492_v59, %v1804_v14 }
 0x7ac   :  { %v1836_v11 = vmul.f32 %v4625_v33, %v4625_v33 }
 0x7ae   :  { %v1874_v32 = vsel %vm197_vm0, %v1836_v11, 0.0  ;;  %v2498_v11 = vrot.slane %v4356_v5, 4 }
 0x7af   :  { %v1783_v10 = vpop.xlane.xlu1 %1782  ;;  %1875 = vadd.xlane.f32.xlu1 %v1874_v32 }
 0x7b0   :  { %v1805_v50 = vmul.f32 %v1783_v10, %v3751_v0 }
 0x7b2   :  { %v4632_v21 = vsub.f32 %v4501_v53, %v1805_v50  ;;  %v2499_v50 = vmax.f32 %v4356_v5, %v2498_v11  ;;  %v2463_v5 = vrot.slane %v4373_v36, 4  ;;  %v2491_v11 = vrot.slane %v4376_v7, 4 }
 0x7b4   :  { %v1837_v17 = vmul.f32 %v4632_v21, %v4632_v21  ;;  %v2500_v43 = vrot.slane %v2499_v50, 2 }
 0x7b6   :  { %v1877_v56 = vsel %vm197_vm0, %v1837_v17, 0.0 }
 0x7b7   :  { %1878 = vadd.xlane.f32.xlu2 %v1877_v56  ;;  %v1786_v59 = vpop.xlane.xlu2 %1785  ;;  %v2470_v56 = vrot.slane %v4359_v40, 4 }
 0x7b8   :  { %v1806_v58 = vmul.f32 %v1786_v59, %v3751_v0 }
 0x7ba   :  { %v4639_v52 = vsub.f32 %v4512_v31, %v1806_v58  ;;  %v2479_v31 = vrot.slane %v2478_v29, 2 }
 0x7bc   :  { %v1838_v39 = vmul.f32 %v4639_v52, %v4639_v52  ;;  %v2480_v47 = vmax.f32 %v2478_v29, %v2479_v31 }
 0x7be   :  { %v1880_v53 = vsel %vm197_vm0, %v1838_v39, 0.0  ;;  %v2481_v58 = vrot.slane %v2480_v47, 1  ;;  %v2471_v39 = vmax.f32 %v4359_v40, %v2470_v56  ;;  %v2492_v40 = vmax.f32 %v4376_v7, %v2491_v11 }
 0x7bf   :  { %1881 = vadd.xlane.f32.xlu0 %v1880_v53  ;;  %v1789_v37 = vpop.xlane.xlu0 %1788 }
 0x7c0   :  { %v1807_v26 = vmul.f32 %v1789_v37, %v3751_v0  ;;  %v2482_v29 = vmax.f32 %v2480_v47, %v2481_v58  ;;  %v2472_v31 = vrot.slane %v2471_v39, 2  ;;  %v2493_v47 = vrot.slane %v2492_v40, 2 }
 0x7c2   :  { %v4648_v14 = vsub.f32 %v4522_v20, %v1807_v26  ;;  %v2501_v26 = vmax.f32 %v2499_v50, %v2500_v43 }
 0x7c4   :  { %v1839_v32 = vmul.f32 %v4648_v14, %v4648_v14 }
 0x7c6   :  { %v1883_v10 = vsel %vm197_vm0, %v1839_v32, 0.0 }
 0x7c7   :  { %v1792_v17 = vpop.xlane.xlu1 %1791  ;;  %1884 = vadd.xlane.f32.xlu1 %v1883_v10  ;;  %v2502_v10 = vrot.slane %v2501_v26, 1 }
 0x7c8   :  { %v1808_v59 = vmul.f32 %v1792_v17, %v3751_v0  ;;  %v2473_v17 = vmax.f32 %v2471_v39, %v2472_v31 }
 0x7ca   :  { %v4658_v20 = vsub.f32 %v4533_v51, %v1808_v59  ;;  %v1843_v32 = vpop.xlane.xlu2 %1842  ;;  %v2464_v51 = vmax.f32 %v4373_v36, %v2463_v5  ;;  %v2484_v59 = vrot.slane %v4390_v38, 4 }
 0x7cb   :  { %v1889_v56 = vmul.f32 %v1843_v32, %v3751_v0 }
 0x7cc   :  { %4939 = vst [vmem:[#allocation5_spill] sm:$0xff] %v4658_v20  ;;  %v1840_v53 = vmul.f32 %v4658_v20, %v4658_v20  ;;  %v2465_v22 = vrot.slane %v2464_v51, 2  ;;  %v2485_v43 = vmax.f32 %v4390_v38, %v2484_v59 }
 0x7cd   :  { %v1905_v50 = vadd.f32 1e-05, %v1889_v56 }
 0x7ce   :  { %v1886_v37 = vsel %vm197_vm0, %v1840_v53, 0.0  ;;  %v2503_v53 = vmax.f32 %v2501_v26, %v2502_v10  ;;  %v2466_v36 = vmax.f32 %v2464_v51, %v2465_v22  ;;  %v2486_v11 = vrot.slane %v2485_v43, 2 }
 0x7cf   :  { %1887 = vadd.xlane.f32.xlu2 %v1886_v37  ;;  %v2474_v37 = vrot.slane %v2473_v17, 1  ;;  %3151 = vrsqrt.f32 %v1905_v50  ;;  %vm1927_vm10 = vweird.f32 %v1905_v50 }
 0x7d0   :  { %v2467_v39 = vrot.slane %v2466_v36, 1  ;;  %v2487_v20 = vmax.f32 %v2485_v43, %v2486_v11 }
 0x7d1   :  { %v2475_v5 = vmax.f32 %v2473_v17, %v2474_v37 }
 0x7d2   :  { %v2468_v56 = vmax.f32 %v2466_v36, %v2467_v39  ;;  %v2488_v22 = vrot.slane %v2487_v20, 1  ;;  %v4674_v39 = vpop.permute.xlu0 %2551 }
 0x7d3   :  { %2566 = vperm.xlu0 %2911, %v2482_v29   ;;  %v2494_v29 = vmax.f32 %v2492_v40, %v2493_v47 }
 0x7d4   :  { %v2489_v40 = vmax.f32 %v2487_v20, %v2488_v22 }
 0x7d5   :  { %v2495_v26 = vrot.slane %v2494_v29, 1  ;;  %v3152_v32 = vpop.eup %3151 }
 0x7d6   :  { %vm1928_vm9 = vweird.f32 %v3152_v32 }
 0x7d7   :  { %v2496_v38 = vmax.f32 %v2494_v29, %v2495_v26  ;;  %vm1929_vm11 = vmor %vm1927_vm10, %vm1928_vm9 }
 0x7da   :  { %v1849_v58 = vpop.xlane.xlu1 %1848 }
 0x7db   :  { %v1891_v25 = vmul.f32 %v1849_v58, %v3751_v0  ;;  %2581 = vperm.xlu0 %2911, %v2503_v53   ;;  %v1922_v53 = vmul.f32 %v3152_v32, %v1905_v50 }
 0x7dd   :  { %v1907_v7 = vadd.f32 1e-05, %v1891_v25  ;;  %v1923_v51 = vmul.f32 %v3152_v32, %v1922_v53 }
 0x7df   :  { %3153 = vrsqrt.f32 %v1907_v7  ;;  %v1924_v47 = vmul.f32 0.5, %v1923_v51  ;;  %vm1947_vm13 = vweird.f32 %v1907_v7 }
 0x7e0   :  { %2561 = vperm.xlu1 %2912, %v2475_v5  }
 0x7e2   :  { %v1852_v31 = vpop.xlane.xlu2 %1851 }
 0x7e3   :  { %v1892_v10 = vmul.f32 %v1852_v31, %v3751_v0  ;;  %v1925_v31 = vsub.f32 1.5, %v1924_v47 }
 0x7e5   :  { %v1908_v59 = vadd.f32 1e-05, %v1892_v10  ;;  %v3154_v58 = vpop.eup %3153  ;;  %v1926_v10 = vmul.f32 %v3152_v32, %v1925_v31 }
 0x7e6   :  { %v1942_v25 = vmul.f32 %v3154_v58, %v1907_v7  ;;  %vm1948_vm12 = vweird.f32 %v3154_v58 }
 0x7e7   :  { %3155 = vrsqrt.f32 %v1908_v59  ;;  %2556 = vperm.xlu2 %2913, %v2468_v56   ;;  %vm1949_vm14 = vmor %vm1947_vm13, %vm1948_vm12  ;;  %vm1957_vm1 = vweird.f32 %v1908_v59 }
 0x7e8   :  { %2576 = vperm.xlu1 %2912, %v2496_v38   ;;  %v1943_v37 = vmul.f32 %v3154_v58, %v1942_v25  ;;  %v1930_v38 = vsel %vm1929_vm11, %v3152_v32, %v1926_v10 }
 0x7ea   :  { %v1944_v15 = vmul.f32 0.5, %v1943_v37 }
 0x7ec   :  { %v1945_v11 = vsub.f32 1.5, %v1944_v15  ;;  %v4680_v15 = vld [vmem:[%s4927_s9 + $0x1] ss:$0 sm:$0xff] }
 0x7ed   :  { %v3156_v17 = vpop.eup %3155 }
 0x7ee   :  { %v1952_v5 = vmul.f32 %v3156_v17, %v1908_v59  ;;  %v1946_v20 = vmul.f32 %v3154_v58, %v1945_v11  ;;  %vm1958_vm15 = vweird.f32 %v3156_v17 }
 0x7ef   :  { %2571 = vperm.xlu2 %2913, %v2489_v40   ;;  %v2081_v40 = vmul.f32 %v1930_v38, %v4536_v63  ;;  %vm1959_vm2 = vmor %vm1957_vm1, %vm1958_vm15 }
 0x7f0   :  { %v1953_v43 = vmul.f32 %v3156_v17, %v1952_v5  ;;  %v1950_v37 = vsel %vm1949_vm14, %v3154_v58, %v1946_v20 }
 0x7f1   :  { %v2083_v7 = vmul.f32 %v1950_v37, %v4551_v35  ;;  %v2100_v63 = vmul.f32 %v4680_v15, %v2081_v40 }
 0x7f2   :  { %v1858_v36 = vpop.xlane.xlu1 %1857  ;;  %v1954_v56 = vmul.f32 0.5, %v1953_v43 }
 0x7f3   :  { %v1894_v29 = vmul.f32 %v1858_v36, %v3751_v0  ;;  %v2102_v10 = vmul.f32 %v4680_v15, %v2083_v7 }
 0x7f4   :  { %v1955_v22 = vsub.f32 1.5, %v1954_v56 }
 0x7f5   :  { %v1910_v26 = vadd.f32 1e-05, %v1894_v29  ;;  %v4688_v29 = vld [vmem:[%s4928_s10 + $0x1] ss:$0 sm:$0xff] }
 0x7f6   :  { %v1956_v31 = vmul.f32 %v3156_v17, %v1955_v22  ;;  %v2119_v35 = vadd.f32 %v4688_v29, %v2100_v63  ;;  %v2121_v37 = vadd.f32 %v4688_v29, %v2102_v10 }
 0x7f7   :  { %3157 = vrsqrt.f32 %v1910_v26  ;;  %vm1977_vm4 = vweird.f32 %v1910_v26 }
 0x7f8   :  { %v1960_v11 = vsel %vm1959_vm2, %v3156_v17, %v1956_v31  ;;  %v2263_v31 = vadd.f32 %v4467_v42, %v2119_v35  ;;  %v2265_v63 = vadd.f32 %v4474_v60, %v2121_v37 }
 0x7fa   :  { %v1861_v53 = vpop.xlane.xlu2 %1860  ;;  %v2279_v10 = vsel %vm197_vm0, %v2263_v31, -inf  ;;  %v2293_v60 = vsel %vm197_vm0, %v2265_v63, -inf }
 0x7fb   :  { %v1895_v25 = vmul.f32 %v1861_v53, %v3751_v0  ;;  %v2084_v53 = vmul.f32 %v1960_v11, %v4560_v46  ;;  %v2294_v63 = vrot.slane %v2293_v60, 4 }
 0x7fd   :  { %v3158_v51 = vpop.eup %3157  ;;  %v1911_v50 = vadd.f32 1e-05, %v1895_v25  ;;  %v1846_v47 = vpop.xlane.xlu0 %1845 }
 0x7fe   :  { %v1972_v5 = vmul.f32 %v3158_v51, %v1910_v26  ;;  %v1890_v32 = vmul.f32 %v1846_v47, %v3751_v0  ;;  %vm1978_vm3 = vweird.f32 %v3158_v51  ;;  %v2103_v26 = vmul.f32 %v4680_v15, %v2084_v53 }
 0x7ff   :  { %3159 = vrsqrt.f32 %v1911_v50  ;;  %vm1979_vm5 = vmor %vm1977_vm4, %vm1978_vm3  ;;  %vm1987_vm7 = vweird.f32 %v1911_v50 }
 0x800   :  { %v1973_v36 = vmul.f32 %v3158_v51, %v1972_v5  ;;  %v1906_v43 = vadd.f32 1e-05, %v1890_v32 }
 0x802   :  { %v1974_v58 = vmul.f32 0.5, %v1973_v36  ;;  %3161 = vrsqrt.f32 %v1906_v43  ;;  %vm1937_vm10 = vweird.f32 %v1906_v43 }
 0x804   :  { %v1975_v56 = vsub.f32 1.5, %v1974_v58 }
 0x805   :  { %v3160_v20 = vpop.eup %3159  ;;  %v1855_v38 = vpop.xlane.xlu0 %1854 }
 0x806   :  { %v1976_v22 = vmul.f32 %v3158_v51, %v1975_v56  ;;  %v1982_v25 = vmul.f32 %v3160_v20, %v1911_v50  ;;  %v1893_v40 = vmul.f32 %v1855_v38, %v3751_v0  ;;  %vm1988_vm6 = vweird.f32 %v3160_v20 }
 0x807   :  { %v2122_v56 = vadd.f32 %v4688_v29, %v2103_v26  ;;  %vm4708_vm9 = vmor %vm1987_vm7, %vm1988_vm6  ;;  %vm2616_vm7 = vcmask 1041409  }
 0x808   :  { %v3162_v59 = vpop.eup %3161  ;;  %v1980_v17 = vsel %vm1979_vm5, %v3158_v51, %v1976_v22  ;;  %v1983_v47 = vmul.f32 %v3160_v20, %v1982_v25  ;;  %v4696_v5 = vadd.f32 1e-05, %v1893_v40 }
 0x809   :  { %v1932_v32 = vmul.f32 %v3162_v59, %v1906_v43  ;;  %v2086_v46 = vmul.f32 %v1980_v17, %v4569_v6  ;;  %vm1938_vm8 = vweird.f32 %v3162_v59  ;;  %v2266_v31 = vadd.f32 %v4487_v62, %v2122_v56 }
 0x80a   :  { %v1984_v7 = vmul.f32 0.5, %v1983_v47  ;;  %3163 = vrsqrt.f32 %v4696_v5  ;;  %v1867_v42 = vpop.xlane.xlu1 %1866  ;;  %vm1939_vm11 = vmor %vm1937_vm10, %vm1938_vm8  ;;  %vm1967_vm13 = vweird.f32 %v4696_v5 }
 0x80b   :  { %v1933_v36 = vmul.f32 %v3162_v59, %v1932_v32  ;;  %v2105_v53 = vmul.f32 %v4680_v15, %v2086_v46  ;;  %v1897_v50 = vmul.f32 %v1867_v42, %v3751_v0  ;;  %v2280_v32 = vrot.slane %v2279_v10, 4 }
 0x80c   :  { %v1985_v58 = vsub.f32 1.5, %v1984_v7  ;;  %v2300_v56 = vsel %vm197_vm0, %v2266_v31, -inf }
 0x80d   :  { %v1934_v11 = vmul.f32 0.5, %v1933_v36  ;;  %v1864_v51 = vpop.xlane.xlu0 %1863  ;;  %v2124_v7 = vadd.f32 %v4688_v29, %v2105_v53  ;;  %v2281_v62 = vmax.f32 %v2279_v10, %v2280_v32 }
 0x80e   :  { %v1986_v38 = vmul.f32 %v3160_v20, %v1985_v58  ;;  %v1896_v35 = vmul.f32 %v1864_v51, %v3751_v0  ;;  %v4724_v51 = vadd.f32 1e-05, %v1897_v50 }
 0x80f   :  { %v1935_v22 = vsub.f32 1.5, %v1934_v11 }
 0x810   :  { %v3164_v6 = vpop.eup %3163  ;;  %v4712_v40 = vadd.f32 1e-05, %v1896_v35  ;;  %v1990_v37 = vsel %vm4708_vm9, %v3160_v20, %v1986_v38  ;;  %vm2007_vm3 = vweird.f32 %v4724_v51 }
 0x811   :  { %v1936_v17 = vmul.f32 %v3162_v59, %v1935_v22  ;;  %v1962_v47 = vmul.f32 %v3164_v6, %v4696_v5  ;;  %v2087_v20 = vmul.f32 %v1990_v37, %v4580_v4  ;;  %vm1968_vm12 = vweird.f32 %v3164_v6 }
 0x812   :  { %3165 = vrsqrt.f32 %v4712_v40  ;;  %v1870_v26 = vpop.xlane.xlu2 %1869  ;;  %v2295_v4 = vmax.f32 %v2293_v60, %v2294_v63  ;;  %v2282_v37 = vrot.slane %v2281_v62, 2  ;;  %vm1969_vm14 = vmor %vm1967_vm13, %vm1968_vm12  ;;  %vm1997_vm1 = vweird.f32 %v4712_v40 }
 0x813   :  { %v1940_v43 = vsel %vm1939_vm11, %v3162_v59, %v1936_v17  ;;  %v1963_v46 = vmul.f32 %v3164_v6, %v1962_v47  ;;  %v1898_v36 = vmul.f32 %v1870_v26, %v3751_v0  ;;  %v2268_v59 = vadd.f32 %v4498_v12, %v2124_v7 }
 0x814   :  { %v2082_v58 = vmul.f32 %v1940_v43, %v4577_v49  ;;  %v2106_v49 = vmul.f32 %v4680_v15, %v2087_v20  ;;  %v2301_v17 = vrot.slane %v2300_v56, 4  ;;  %vm2618_vm11 = vcmask 1042434  }
 0x815   :  { %v1964_v11 = vmul.f32 0.5, %v1963_v46  ;;  %v4726_v38 = vadd.f32 1e-05, %v1898_v36  ;;  %v2314_v50 = vsel %vm197_vm0, %v2268_v59, -inf }
 0x816   :  { %v2101_v42 = vmul.f32 %v4680_v15, %v2082_v58  ;;  %v2125_v26 = vadd.f32 %v4688_v29, %v2106_v49  ;;  %v2302_v20 = vmax.f32 %v2300_v56, %v2301_v17  ;;  %v2315_v58 = vrot.slane %v2314_v50, 4 }
 0x817   :  { %v1965_v35 = vsub.f32 1.5, %v1964_v11  ;;  %3167 = vrsqrt.f32 %v4726_v38  ;;  %v2283_v11 = vmax.f32 %v2281_v62, %v2282_v37  ;;  %vm2017_vm6 = vweird.f32 %v4726_v38 }
 0x818   :  { %v3166_v53 = vpop.eup %3165  ;;  %v2120_v22 = vadd.f32 %v4688_v29, %v2101_v42  ;;  %3169 = vrsqrt.f32 %v4724_v51 }
 0x819   :  { %v1966_v25 = vmul.f32 %v3164_v6, %v1965_v35  ;;  %v1992_v10 = vmul.f32 %v3166_v53, %v4712_v40  ;;  %vm1998_vm15 = vweird.f32 %v3166_v53 }
 0x81a   :  { %v2264_v12 = vadd.f32 %v4434_v41, %v2120_v22  ;;  %v1873_v47 = vpop.xlane.xlu0 %1872  ;;  %v2296_v41 = vrot.slane %v2295_v4, 2  ;;  %vm1999_vm2 = vmor %vm1997_vm1, %vm1998_vm15  ;;  %vm2620_vm15 = vcmask 1043459  }
 0x81b   :  { %v1970_v60 = vsel %vm1969_vm14, %v3164_v6, %v1966_v25  ;;  %v1993_v32 = vmul.f32 %v3166_v53, %v1992_v10  ;;  %v1899_v31 = vmul.f32 %v1873_v47, %v3751_v0  ;;  %v2316_v47 = vmax.f32 %v2314_v50, %v2315_v58 }
 0x81c   :  { %v2286_v5 = vsel %vm197_vm0, %v2264_v12, -inf  ;;  %v2085_v7 = vmul.f32 %v1970_v60, %v4589_v1  ;;  %v2269_v1 = vadd.f32 %v4453_v24, %v2125_v26  ;;  %v2297_v10 = vmax.f32 %v2295_v4, %v2296_v41 }
 0x81d   :  { %v4743_v43 = vpop.eup %3167  ;;  %v2287_v46 = vrot.slane %v2286_v5, 4  ;;  %v1994_v36 = vmul.f32 0.5, %v1993_v32  ;;  %v4745_v63 = vadd.f32 1e-05, %v1899_v31  ;;  %v2303_v12 = vrot.slane %v2302_v20, 2 }
 0x81e   :  { %v2104_v6 = vmul.f32 %v4680_v15, %v2085_v7  ;;  %v4748_v42 = vpop.eup %3169  ;;  %v2012_v22 = vmul.f32 %v4743_v43, %v4726_v38  ;;  %v2284_v32 = vrot.slane %v2283_v11, 1  ;;  %v2321_v31 = vsel %vm197_vm0, %v2269_v1, -inf }
 0x81f   :  { %v2288_v59 = vmax.f32 %v2286_v5, %v2287_v46  ;;  %v1995_v35 = vsub.f32 1.5, %v1994_v36  ;;  %3171 = vrsqrt.f32 %v4745_v63  ;;  %v2002_v37 = vmul.f32 %v4748_v42, %v4724_v51 }
 0x820   :  { %v2123_v49 = vadd.f32 %v4688_v29, %v2104_v6  ;;  %v2013_v4 = vmul.f32 %v4743_v43, %v2012_v22  ;;  %v2298_v36 = vrot.slane %v2297_v10, 1  ;;  %v2304_v58 = vmax.f32 %v2302_v20, %v2303_v12 }
 0x821   :  { %v2289_v25 = vrot.slane %v2288_v59, 2  ;;  %v1996_v56 = vmul.f32 %v3166_v53, %v1995_v35  ;;  %v2317_v6 = vrot.slane %v2316_v47, 2  ;;  %v2322_v35 = vrot.slane %v2321_v31, 4 }
 0x822   :  { %v2267_v62 = vadd.f32 %v4444_v55, %v2123_v49  ;;  %v1876_v17 = vpop.xlane.xlu1 %1875  ;;  %v2014_v49 = vmul.f32 0.5, %v2013_v4  ;;  %vm2018_vm4 = vweird.f32 %v4743_v43  ;;  %vm2008_vm5 = vweird.f32 %v4748_v42 }
 0x823   :  { %v2000_v24 = vsel %vm1999_vm2, %v3166_v53, %v1996_v56  ;;  %v1900_v60 = vmul.f32 %v1876_v17, %v3751_v0  ;;  %v2290_v46 = vmax.f32 %v2288_v59, %v2289_v25  ;;  %v2003_v53 = vmul.f32 %v4748_v42, %v2002_v37  ;;  %vm4795_vm8 = vmor %vm2017_vm6, %vm2018_vm4 }
 0x824   :  { %v2307_v26 = vsel %vm197_vm0, %v2267_v62, -inf  ;;  %v2088_v40 = vmul.f32 %v2000_v24, %v4597_v28  ;;  %v2285_v59 = vmax.f32 %v2283_v11, %v2284_v32  ;;  %v2299_v62 = vmax.f32 %v2297_v10, %v2298_v36  ;;  %vm4810_vm10 = vmor %vm2007_vm3, %vm2008_vm5 }
 0x825   :  { %v4764_v55 = vpop.eup %3171  ;;  %v2308_v5 = vrot.slane %v2307_v26, 4  ;;  %v4766_v7 = vadd.f32 1e-05, %v1900_v60  ;;  %v2291_v56 = vrot.slane %v2290_v46, 1  ;;  %v2004_v37 = vmul.f32 0.5, %v2003_v53 }
 0x826   :  { %v2107_v50 = vmul.f32 %v4680_v15, %v2088_v40  ;;  %v2022_v41 = vmul.f32 %v4764_v55, %v4745_v63  ;;  %v2305_v60 = vrot.slane %v2304_v58, 1  ;;  %v2323_v20 = vmax.f32 %v2321_v31, %v2322_v35 }
 0x827   :  { %v2309_v28 = vmax.f32 %v2307_v26, %v2308_v5  ;;  %3173 = vrsqrt.f32 %v4766_v7  ;;  %v2318_v26 = vmax.f32 %v2316_v47, %v2317_v6  ;;  %v2015_v5 = vsub.f32 1.5, %v2014_v49 }
 0x828   :  { %v2126_v1 = vadd.f32 %v4688_v29, %v2107_v50  ;;  %v2023_v22 = vmul.f32 %v4764_v55, %v2022_v41  ;;  %v2584_v4 = vmul.f32 %v4516_v19, %v2285_v59  ;;  %v2292_v10 = vmax.f32 %v2290_v46, %v2291_v56 }
 0x829   :  { %v2310_v25 = vrot.slane %v2309_v28, 2  ;;  %v2586_v32 = vmul.f32 %v4496_v3, %v2299_v62  ;;  %v2005_v36 = vsub.f32 1.5, %v2004_v37  ;;  %v2306_v47 = vmax.f32 %v2304_v58, %v2305_v60 }
 0x82a   :  { %v2270_v17 = vadd.f32 %v4478_v45, %v2126_v1  ;;  %v1879_v24 = vpop.xlane.xlu2 %1878  ;;  %v2024_v50 = vmul.f32 0.5, %v2023_v22  ;;  %v2319_v6 = vrot.slane %v2318_v26, 1  ;;  %v2324_v19 = vrot.slane %v2323_v20, 2 }
 0x82b   :  { %v1901_v12 = vmul.f32 %v1879_v24, %v3751_v0  ;;  %v2311_v45 = vmax.f32 %v2309_v28, %v2310_v25  ;;  %v2016_v35 = vmul.f32 %v4743_v43, %v2015_v5  ;;  %v2585_v28 = vmul.f32 %v4547_v2, %v2292_v10 }
 0x82c   :  { %v2328_v40 = vsel %vm197_vm0, %v2270_v17, -inf  ;;  %v2025_v46 = vsub.f32 1.5, %v2024_v50  ;;  %v2006_v1 = vmul.f32 %v4748_v42, %v2005_v36  ;;  %v2587_v62 = vmul.f32 %v4529_v54, %v2306_v47 }
 0x82d   :  { %v4779_v41 = vpop.eup %3173  ;;  %v4781_v11 = vadd.f32 1e-05, %v1901_v12  ;;  %v2329_v53 = vrot.slane %v2328_v40, 4  ;;  %v2312_v58 = vrot.slane %v2311_v45, 1  ;;  %v2320_v37 = vmax.f32 %v2318_v26, %v2319_v6 }
 0x82e   :  { %v2032_v31 = vmul.f32 %v4779_v41, %v4766_v7  ;;  %v2325_v17 = vmax.f32 %v2323_v20, %v2324_v19  ;;  %v2020_v2 = vsel %vm4795_vm8, %v4743_v43, %v2016_v35  ;;  %v2026_v38 = vmul.f32 %v4764_v55, %v2025_v46 }
 0x82f   :  { %3175 = vrsqrt.f32 %v4781_v11  ;;  %v2330_v49 = vmax.f32 %v2328_v40, %v2329_v53  ;;  %vm2028_vm9 = vweird.f32 %v4764_v55  ;;  %v2617_v20 = vsel %vm2616_vm7, %v2585_v28, %v2584_v4 }
 0x830   :  { %v2033_v3 = vmul.f32 %v4779_v41, %v2032_v31  ;;  %v2313_v43 = vmax.f32 %v2311_v45, %v2312_v58  ;;  %v2010_v26 = vsel %vm4810_vm10, %v4748_v42, %v2006_v1  ;;  %vm2027_vm12 = vweird.f32 %v4745_v63 }
 0x831   :  { %v2331_v40 = vrot.slane %v2330_v49, 2  ;;  %v2090_v51 = vmul.f32 %v2020_v2, %v4611_v18  ;;  %vm4823_vm13 = vmor %vm2027_vm12, %vm2028_vm9  ;;  %vm2038_vm14 = vweird.f32 %v4779_v41  ;;  %v2619_v10 = vsel %vm2618_vm11, %v2586_v32, %v2617_v20 }
 0x832   :  { %v2034_v22 = vmul.f32 0.5, %v2033_v3  ;;  %v1882_v59 = vpop.xlane.xlu0 %1881  ;;  %v2030_v42 = vsel %vm4823_vm13, %v4764_v55, %v2026_v38  ;;  %v2089_v18 = vmul.f32 %v2010_v26, %v4601_v61  ;;  %v2588_v45 = vmul.f32 %v4556_v48, %v2313_v43 }
 0x833   :  { %v1902_v56 = vmul.f32 %v1882_v59, %v3751_v0  ;;  %v2326_v36 = vrot.slane %v2325_v17, 1  ;;  %v2589_v53 = vmul.f32 %v4507_v27, %v2320_v37  ;;  %vm2037_vm1 = vweird.f32 %v4766_v7 }
 0x834   :  { %v2035_v24 = vsub.f32 1.5, %v2034_v22  ;;  %vm2622_vm2 = vcmask 1044484   ;;  %v2332_v6 = vmax.f32 %v2330_v49, %v2331_v40  ;;  %v2109_v55 = vmul.f32 %v4680_v15, %v2090_v51  ;;  %vm4842_vm3 = vmor %vm2037_vm1, %vm2038_vm14 }
 0x835   :  { %v3176_v60 = vpop.eup %3175  ;;  %v4814_v54 = vadd.f32 1e-05, %v1902_v56  ;;  %v2091_v19 = vmul.f32 %v2030_v42, %v4618_v9  ;;  %v2621_v27 = vsel %vm2620_vm15, %v2587_v62, %v2619_v10  ;;  %v2327_v28 = vmax.f32 %v2325_v17, %v2326_v36 }
 0x836   :  { %v2042_v5 = vmul.f32 %v3176_v60, %v4781_v11  ;;  %v2036_v4 = vmul.f32 %v4779_v41, %v2035_v24  ;;  %vm2048_vm4 = vweird.f32 %v3176_v60  ;;  %v2333_v35 = vrot.slane %v2332_v6, 1 }
 0x837   :  { %3177 = vrsqrt.f32 %v4814_v54  ;;  %v2623_v9 = vsel %vm2622_vm2, %v2588_v45, %v2621_v27  ;;  %vm2624_vm5 = vcmask 1045509   ;;  %v2108_v58 = vmul.f32 %v4680_v15, %v2089_v18 }
 0x838   :  { %v2043_v63 = vmul.f32 %v3176_v60, %v2042_v5  ;;  %v2040_v61 = vsel %vm4842_vm3, %v4779_v41, %v2036_v4  ;;  %vm2047_vm6 = vweird.f32 %v4781_v11  ;;  %v2128_v22 = vadd.f32 %v4688_v29, %v2109_v55 }
 0x839   :  { %v2092_v41 = vmul.f32 %v2040_v61, %v4625_v33  ;;  %vm2049_vm8 = vmor %vm2047_vm6, %vm2048_vm4  ;;  %vm2626_vm9 = vcmask 1046534   ;;  %v2334_v56 = vmax.f32 %v2332_v6, %v2333_v35  ;;  %v2625_v62 = vsel %vm2624_vm5, %v2589_v53, %v2623_v9 }
 0x83a   :  { %v2044_v31 = vmul.f32 0.5, %v2043_v63  ;;  %v1885_v47 = vpop.xlane.xlu1 %1884  ;;  %v2110_v37 = vmul.f32 %v4680_v15, %v2091_v19  ;;  %v2590_v11 = vmul.f32 %v4545_v13, %v2327_v28  ;;  %vm2628_vm10 = vcmask 1047559  }
 0x83b   :  { %v1903_v48 = vmul.f32 %v1885_v47, %v3751_v0  ;;  %v2591_v33 = vmul.f32 %v4565_v34, %v2334_v56  ;;  %v2111_v24 = vmul.f32 %v4680_v15, %v2092_v41  ;;  %v2127_v13 = vadd.f32 %v4688_v29, %v2108_v58 }
 0x83c   :  { %v2045_v7 = vsub.f32 1.5, %v2044_v31  ;;  %v2627_v20 = vsel %vm2626_vm9, %v2590_v11, %v2625_v62  ;;  %v2272_v40 = vadd.f32 %v4460_v44, %v2128_v22  ;;  %v2129_v34 = vadd.f32 %v4688_v29, %v2110_v37  ;;  %v4950_v11 = vld [vmem:[#allocation4_spill] sm:$0xff] }
 0x83d   :  { %v3178_v46 = vpop.eup %3177  ;;  %v4851_v3 = vadd.f32 1e-05, %v1903_v48  ;;  %v2629_v26 = vsel %vm2628_vm10, %v2591_v33, %v2627_v20  ;;  %vm2057_vm13 = vweird.f32 %v4814_v54  ;;  %v2130_v42 = vadd.f32 %v4688_v29, %v2111_v24  ;;  %v4951_v24 = vld [vmem:[#allocation5_spill] sm:$0xff] }
 0x83e   :  { %v2046_v1 = vmul.f32 %v3176_v60, %v2045_v7  ;;  %v2052_v49 = vmul.f32 %v3178_v46, %v4814_v54  ;;  %vm2058_vm12 = vweird.f32 %v3178_v46  ;;  %2639 = vst.msk [vmem:[%s4930_s11] sm:$0xff] %vm197_vm0, %v2629_v26  ;;  %v2271_v63 = vadd.f32 %v4509_v23, %v2127_v13 }
 0x83f   :  { %3179 = vrsqrt.f32 %v4851_v3  ;;  %vm2059_vm14 = vmor %vm2057_vm13, %vm2058_vm12  ;;  %v2342_v10 = vsel %vm197_vm0, %v2272_v40, -inf  ;;  %v2273_v45 = vadd.f32 %v4489_v8, %v2129_v34  ;;  %v2274_v31 = vadd.f32 %v4524_v30, %v2130_v42 }
 0x840   :  { %v2050_v59 = vsel %vm2049_vm8, %v3176_v60, %v2046_v1  ;;  %v2053_v25 = vmul.f32 %v3178_v46, %v2052_v49  ;;  %v2343_v47 = vrot.slane %v2342_v10, 4  ;;  %v2335_v19 = vsel %vm197_vm0, %v2271_v63, -inf }
 0x841   :  { %v2093_v17 = vmul.f32 %v2050_v59, %v4632_v21  ;;  %v2349_v23 = vsel %vm197_vm0, %v2273_v45, -inf  ;;  %vm2067_vm3 = vweird.f32 %v4851_v3  ;;  %v2356_v30 = vsel %vm197_vm0, %v2274_v31, -inf  ;;  %v4952_v45 = vld [vmem:[#allocation2_spill] sm:$0xff] }
 0x842   :  { %v2054_v2 = vmul.f32 0.5, %v2053_v25  ;;  %v1888_v38 = vpop.xlane.xlu2 %1887  ;;  %v2336_v27 = vrot.slane %v2335_v19, 4  ;;  %v2344_v35 = vmax.f32 %v2342_v10, %v2343_v47  ;;  %v2350_v28 = vrot.slane %v2349_v23, 4 }
 0x843   :  { %v2112_v12 = vmul.f32 %v4680_v15, %v2093_v17  ;;  %v1904_v60 = vmul.f32 %v1888_v38, %v3751_v0  ;;  %v2357_v49 = vrot.slane %v2356_v30, 4 }
 0x844   :  { %v2055_v43 = vsub.f32 1.5, %v2054_v2  ;;  %v2345_v25 = vrot.slane %v2344_v35, 2  ;;  %v2351_v56 = vmax.f32 %v2349_v23, %v2350_v28  ;;  %v4953_v28 = vld [vmem:[#allocation3_spill] sm:$0xff] }
 0x845   :  { %v3180_v21 = vpop.eup %3179  ;;  %v1920_v5 = vadd.f32 1e-05, %v1904_v60  ;;  %v2131_v50 = vadd.f32 %v4688_v29, %v2112_v12  ;;  %v2358_v17 = vmax.f32 %v2356_v30, %v2357_v49 }
 0x846   :  { %v2056_v0 = vmul.f32 %v3178_v46, %v2055_v43  ;;  %v2062_v51 = vmul.f32 %v3180_v21, %v4851_v3  ;;  %vm2068_vm1 = vweird.f32 %v3180_v21  ;;  %v2352_v20 = vrot.slane %v2351_v56, 2 }
 0x847   :  { %3181 = vrsqrt.f32 %v1920_v5  ;;  %v2275_v54 = vadd.f32 %v4469_v16, %v2131_v50  ;;  %vm2069_vm4 = vmor %vm2067_vm3, %vm2068_vm1  ;;  %vm2077_vm8 = vweird.f32 %v1920_v5  ;;  %v2346_v26 = vmax.f32 %v2344_v35, %v2345_v25 }
 0x848   :  { %v2060_v44 = vsel %vm2059_vm14, %v3178_v46, %v2056_v0  ;;  %v2063_v4 = vmul.f32 %v3180_v21, %v2062_v51  ;;  %v2359_v13 = vrot.slane %v2358_v17, 2  ;;  %v2353_v50 = vmax.f32 %v2351_v56, %v2352_v20 }
 0x849   :  { %v2094_v18 = vmul.f32 %v2060_v44, %v4639_v52  ;;  %v2363_v16 = vsel %vm197_vm0, %v2275_v54, -inf  ;;  %v2347_v44 = vrot.slane %v2346_v26, 1 }
 0x84a   :  { %v2064_v36 = vmul.f32 0.5, %v2063_v4  ;;  %v2364_v9 = vrot.slane %v2363_v16, 4  ;;  %v2360_v63 = vmax.f32 %v2358_v17, %v2359_v13 }
 0x84b   :  { %v2113_v53 = vmul.f32 %v4680_v15, %v2094_v18  ;;  %v2557_v18 = vpop.permute.xlu2 %2556 }
 0x84c   :  { %v2065_v6 = vsub.f32 1.5, %v2064_v36  ;;  %v2365_v59 = vmax.f32 %v2363_v16, %v2364_v9 }
 0x84d   :  { %v3182_v55 = vpop.eup %3181  ;;  %v2132_v32 = vadd.f32 %v4688_v29, %v2113_v53 }
 0x84e   :  { %v2066_v52 = vmul.f32 %v3180_v21, %v2065_v6  ;;  %v2072_v8 = vmul.f32 %v3182_v55, %v1920_v5  ;;  %vm2078_vm6 = vweird.f32 %v3182_v55  ;;  %v2366_v60 = vrot.slane %v2365_v59, 2 }
 0x84f   :  { %v2276_v48 = vadd.f32 %v4503_v57, %v2132_v32  ;;  %v2337_v57 = vmax.f32 %v2335_v19, %v2336_v27  ;;  %vm2079_vm12 = vmor %vm2077_vm8, %vm2078_vm6  ;;  %v2354_v6 = vrot.slane %v2353_v50, 1  ;;  %v2361_v32 = vrot.slane %v2360_v63, 1 }
 0x850   :  { %v2070_v61 = vsel %vm2069_vm4, %v3180_v21, %v2066_v52  ;;  %v2073_v7 = vmul.f32 %v3182_v55, %v2072_v8  ;;  %v2367_v51 = vmax.f32 %v2365_v59, %v2366_v60  ;;  %v2567_v52 = vpop.permute.xlu0 %2566 }
 0x851   :  { %v2095_v46 = vmul.f32 %v2070_v61, %v4648_v14  ;;  %v2370_v58 = vsel %vm197_vm0, %v2276_v48, -inf  ;;  %v2338_v33 = vrot.slane %v2337_v57, 2  ;;  %v2355_v30 = vmax.f32 %v2353_v50, %v2354_v6 }
 0x852   :  { %v2074_v1 = vmul.f32 0.5, %v2073_v7  ;;  %v2371_v3 = vrot.slane %v2370_v58, 4  ;;  %v2562_v53 = vpop.permute.xlu1 %2561  ;;  %v2368_v47 = vrot.slane %v2367_v51, 1  ;;  %v2362_v35 = vmax.f32 %v2360_v63, %v2361_v32 }
 0x853   :  { %v2114_v22 = vmul.f32 %v4680_v15, %v2095_v46  ;;  %v2339_v5 = vmax.f32 %v2337_v57, %v2338_v33  ;;  %v2594_v46 = vmul.f32 %v2557_v18, %v2355_v30 }
 0x854   :  { %v2075_v41 = vsub.f32 1.5, %v2074_v1  ;;  %v2372_v14 = vmax.f32 %v2370_v58, %v2371_v3  ;;  %v2369_v48 = vmax.f32 %v2367_v51, %v2368_v47  ;;  %v2595_v3 = vmul.f32 %v2562_v53, %v2362_v35 }
 0x855   :  { %v2133_v62 = vadd.f32 %v4688_v29, %v2114_v22  ;;  %v2340_v54 = vrot.slane %v2339_v5, 1  ;;  %v2572_v22 = vpop.permute.xlu2 %2571 }
 0x856   :  { %v2076_v37 = vmul.f32 %v3182_v55, %v2075_v41  ;;  %v2373_v21 = vrot.slane %v2372_v14, 2  ;;  %v2596_v49 = vmul.f32 %v2567_v52, %v2369_v48 }
 0x857   :  { %v2277_v2 = vadd.f32 %v4950_v11, %v2133_v62  ;;  %v2341_v8 = vmax.f32 %v2339_v5, %v2340_v54 }
 0x858   :  { %v2080_v38 = vsel %vm2079_vm12, %v3182_v55, %v2076_v37  ;;  %v2374_v4 = vmax.f32 %v2372_v14, %v2373_v21  ;;  %v2348_v55 = vmax.f32 %v2346_v26, %v2347_v44  ;;  %v2582_v14 = vpop.permute.xlu0 %2581 }
 0x859   :  { %v2096_v12 = vmul.f32 %v2080_v38, %v4951_v24  ;;  %v2377_v43 = vsel %vm197_vm0, %v2277_v2, -inf  ;;  %v2592_v58 = vmul.f32 %v4953_v28, %v2341_v8 }
 0x85a   :  { %v2378_v40 = vrot.slane %v2377_v43, 4  ;;  %v2375_v23 = vrot.slane %v2374_v4, 1  ;;  %v2593_v27 = vmul.f32 %v4674_v39, %v2348_v55  ;;  %v2577_v25 = vpop.permute.xlu1 %2576 }
 0x85b   :  { %v2115_v34 = vmul.f32 %v4680_v15, %v2096_v12 }
 0x85c   :  { %v2379_v0 = vmax.f32 %v2377_v43, %v2378_v40  ;;  %v2376_v7 = vmax.f32 %v2374_v4, %v2375_v23  ;;  %v2630_v41 = vsel %vm2616_vm7, %v2593_v27, %v2592_v58 }
 0x85d   :  { %v2134_v42 = vadd.f32 %v4688_v29, %v2115_v34  ;;  %v2631_v56 = vsel %vm2618_vm11, %v2594_v46, %v2630_v41 }
 0x85e   :  { %v2380_v10 = vrot.slane %v2379_v0, 2  ;;  %v2597_v59 = vmul.f32 %v2572_v22, %v2376_v7  ;;  %v2632_v37 = vsel %vm2620_vm15, %v2595_v3, %v2631_v56 }
 0x85f   :  { %v2278_v36 = vadd.f32 %v4952_v45, %v2134_v42  ;;  %v2633_v17 = vsel %vm2622_vm2, %v2596_v49, %v2632_v37 }
 0x860   :  { %v2381_v31 = vmax.f32 %v2379_v0, %v2380_v10  ;;  %v2634_v2 = vsel %vm2624_vm5, %v2597_v59, %v2633_v17 }
 0x861   :  { %v2384_v15 = vsel %vm197_vm0, %v2278_v36, -inf }
 0x862   :  { %v2385_v19 = vrot.slane %v2384_v15, 4  ;;  %v2382_v29 = vrot.slane %v2381_v31, 1 }
 0x864   :  { %v2386_v16 = vmax.f32 %v2384_v15, %v2385_v19  ;;  %v2383_v9 = vmax.f32 %v2381_v31, %v2382_v29 }
 0x866   :  { %v2387_v61 = vrot.slane %v2386_v16, 2  ;;  %v2598_v62 = vmul.f32 %v2577_v25, %v2383_v9 }
 0x868   :  { %v2388_v1 = vmax.f32 %v2386_v16, %v2387_v61  ;;  %v2635_v38 = vsel %vm2626_vm9, %v2598_v62, %v2634_v2 }
 0x86a   :  { %v2389_v57 = vrot.slane %v2388_v1, 1 }
 0x86c   :  { %v2390_v39 = vmax.f32 %v2388_v1, %v2389_v57 }
 0x86e   :  { %v2599_v11 = vmul.f32 %v2582_v14, %v2390_v39 }
 0x870   :  { %v2636_v33 = vsel %vm2628_vm10, %v2599_v11, %v2635_v38 }
 0x871   :  { %2640 = vst.msk [vmem:[%s4930_s11 + $0x8] sm:$0xff] %vm197_vm0, %v2636_v33 }

</bundles_post_ra>
